<compile_context>
chip_gen: v5e
topology: v5e:2x2
jax: 0.10.0
libtpu: 0.0.40
codegen_flags: <defaults>
</compile_context>

<pallas_src>
import numpy as np
import jax
import jax.numpy as jnp
from jax.experimental import pallas as pl
from jax.experimental.pallas import tpu as pltpu

# ----------------------------- configuration -------------------------------
B = 2              # batch
C_IN = 4           # audio channels (module default 7; small synthetic config)
MEL_BINS = 16      # cfg.data.n_mels
SAMPLE_RATE = 1000
HOPLEN = 100
LABEL_RES = 0.1
NUM_CLASSES = 3
OUT_DIM = NUM_CLASSES * 3                          # accdoa (x,y,z per class)
PRED_RES = int(SAMPLE_RATE / HOPLEN * LABEL_RES)   # = 1
TGT_OUTPUT_FRAMES = int(10 / 0.1)                  # = 100
T_FRAMES = TGT_OUTPUT_FRAMES * PRED_RES            # = 100 (10-second clip)

# encoder stand-in geometry
PATCH_T = 4                      # -> encoder.time_res
PATCH_F = 4
NUM_FEATURES = 32                # encoder.num_features
SF = MEL_BINS // PATCH_F         # encoder.SF             (= 4)
ST = T_FRAMES // PATCH_T         # tokens along time      (= 25)
TIME_RES = PATCH_T
K_PE = C_IN * PATCH_T * MEL_BINS       # 256 : lane-dense patch row
SFD = SF * NUM_FEATURES                # 128 : lane-dense feature width

HI = jax.lax.Precision.HIGHEST


# ----------------------------- fused Pallas kernel --------------------------
def _fused_kernel(xpT_ref, wpeT_ref, bpeT_ref, wtsT_ref, btsT_ref, wintT_ref,
                  o_ref):
    """Whole forward (all batch elements), everything VMEM / vreg resident.

    xpT_ref  : (K_PE, B*ST)        raw input patches, transposed, batch folded
    wpeT_ref : (SFD, K_PE)         block-diag patch-embed weight^T (BN folded)
    bpeT_ref : (SFD, 1)            patch-embed bias (BN shift folded in)
    wtsT_ref : (3*OUT_DIM, SFD)    tscam_conv weights^T, taps stacked on rows
    btsT_ref : (OUT_DIM, 1)        tscam_conv bias
    wintT_ref: (3, ST, OF)         (interp + frame-mean)^T matrix per tap
    o_ref    : (B, OUT_DIM, OF)    lane-dense output (frames on the lane axis)
    """
    nb, n_out, _ = o_ref.shape
    n_tok = wintT_ref.shape[1]

    # patch-embed (BN folded) + GELU, all batches in one MXU matmul
    pre = jnp.dot(wpeT_ref[...], xpT_ref[...],
                  preferred_element_type=jnp.float32, precision=HI)
    featT = jax.nn.gelu(pre + bpeT_ref[...])               # (SFD, B*ST)

    wts_all = wtsT_ref[...]                                 # (27, SFD)
    bts = btsT_ref[...]                                     # (OUT_DIM, 1)

    for b in range(nb):                                     # static unroll
        fb = featT[:, b * n_tok:(b + 1) * n_tok]            # (SFD, ST)
        # all three conv taps in one (27,128)@(128,25) push
        pT = jnp.dot(wts_all, fb,
                     preferred_element_type=jnp.float32, precision=HI)
        # tscam_conv time taps folded into shifted interp matrices:
        #   accT = sum_k pT[tap k] @ WintT_k      -> (OUT_DIM, OF)
        acc = jnp.dot(pT[0:n_out], wintT_ref[0],
                      preferred_element_type=jnp.float32, precision=HI)
        for k in (1, 2):
            acc = acc + jnp.dot(pT[k * n_out:(k + 1) * n_out], wintT_ref[k],
                                preferred_element_type=jnp.float32,
                                precision=HI)
        # conv bias passes through interp/mean (rows sum to 1); tanh on EUP
        o_ref[b] = jnp.tanh(acc + bts)


def fused_forward_call(xpT, params):
    """xpT: (K_PE, B*ST). Returns (B, OUT_DIM, TGT_OUTPUT_FRAMES)."""
    bst = xpT.shape[1]
    b = bst // ST
    of = TGT_OUTPUT_FRAMES
    flops = 2 * (SFD * K_PE * bst                       # patch-embed
                 + b * (3 * OUT_DIM) * SFD * ST         # fused tap matmul
                 + b * 3 * OUT_DIM * ST * of)           # interp/mean matmuls
    transcendentals = SFD * bst + b * OUT_DIM * of      # gelu + tanh
    nbytes = 4 * (xpT.size + params["w_peT"].size + params["b_peT"].size
                  + params["w_tsT"].size + params["b_tsT"].size
                  + params["w_intT"].size + b * OUT_DIM * of)

    vmem = pltpu.MemorySpace.VMEM
    return pl.pallas_call(
        _fused_kernel,
        out_shape=jax.ShapeDtypeStruct((b, OUT_DIM, of), jnp.float32),
        in_specs=[pl.BlockSpec(memory_space=vmem)] * 6,
        out_specs=pl.BlockSpec(memory_space=vmem),
        cost_estimate=pl.CostEstimate(flops=int(flops),
                                      transcendentals=int(transcendentals),
                                      bytes_accessed=int(nbytes)),
    )(xpT, params["w_peT"], params["b_peT"], params["w_tsT"],
      params["b_tsT"], params["w_intT"])


# ----------------------------- glue / parameters ---------------------------
def make_interp_mean_matrix(t_in, ratio, output_frames, pred_res):
    """Linear upsample by `ratio` (align_corners=False), slice to
    output_frames*pred_res, reshape (output_frames, pred_res, .) and mean."""
    t_out = t_in * ratio
    i = np.arange(t_out, dtype=np.float64)
    src = np.clip((i + 0.5) / ratio - 0.5, 0.0, t_in - 1)
    lo = np.floor(src).astype(np.int64)
    hi = np.minimum(lo + 1, t_in - 1)
    frac = src - lo
    w = np.zeros((t_out, t_in), dtype=np.float64)
    w[np.arange(t_out), lo] += (1.0 - frac)
    w[np.arange(t_out), hi] += frac
    w = w[: output_frames * pred_res]
    w = w.reshape(output_frames, pred_res, t_in).mean(axis=1)
    return w.astype(np.float32)                        # (output_frames, t_in)


def init_params(key):
    ks = jax.random.split(key, 8)
    # per-channel BatchNorm2d(mel_bins) running stats + affine (eval mode)
    gamma = 1.0 + 0.1 * jax.random.normal(ks[0], (C_IN, MEL_BINS), jnp.float32)
    beta = 0.1 * jax.random.normal(ks[1], (C_IN, MEL_BINS), jnp.float32)
    rmean = 0.1 * jax.random.normal(ks[2], (C_IN, MEL_BINS), jnp.float32)
    rvar = jax.random.uniform(ks[3], (C_IN, MEL_BINS), jnp.float32, 0.5, 1.5)

    # encoder stand-in: patch-embed linear
    k_pe = C_IN * PATCH_T * PATCH_F
    pe_w = 0.05 * jax.random.normal(ks[4], (k_pe, NUM_FEATURES), jnp.float32)
    pe_b = 0.01 * jax.random.normal(ks[5], (NUM_FEATURES,), jnp.float32)

    # tscam_conv: Conv2d(NUM_FEATURES, OUT_DIM, kernel=(SF,3), padding=(0,1))
    conv_w4 = 0.05 * jax.random.normal(ks[6], (OUT_DIM, NUM_FEATURES, SF, 3),
                                       jnp.float32)
    conv_b = 0.01 * jax.random.normal(ks[7], (OUT_DIM,), jnp.float32)

    w_interp = make_interp_mean_matrix(ST, TIME_RES, TGT_OUTPUT_FRAMES,
                                       PRED_RES)         # np f32 (100, 25)

    # ----------------- all folding in float64 numpy (exact-ish) -------------
    scale64 = np.asarray(gamma, np.float64) / np.sqrt(
        np.asarray(rvar, np.float64) + 1e-5)
    shift64 = np.asarray(beta, np.float64) - np.asarray(rmean, np.float64) * scale64
    scale32 = scale64.astype(np.float32)
    shift32 = shift64.astype(np.float32)

    pe_w64 = np.asarray(pe_w, np.float64)
    pe_b64 = np.asarray(pe_b, np.float64)
    conv_w64 = np.asarray(conv_w4, np.float64)
    conv_b64 = np.asarray(conv_b, np.float64)

    # fold BN into a block-diagonal (K_PE, SFD) patch-embed weight, then ^T
    # row index = (c, pt, f) with f = sf*PF + pf ; col index = sf*D + d
    pe_w5 = pe_w64.reshape(C_IN, PATCH_T, PATCH_F, NUM_FEATURES)   # (C,PT,PF,D)
    scale_r = scale32.astype(np.float64).reshape(C_IN, SF, PATCH_F)
    shift_r = shift32.astype(np.float64).reshape(C_IN, SF, PATCH_F)
    w_scaled = np.einsum('cpfd,csf->scpfd', pe_w5, scale_r)        # (SF,C,PT,PF,D)
    eye = np.eye(SF, dtype=np.float64)
    w_big = np.einsum('as,scpfd->cpafsd', eye, w_scaled).reshape(K_PE, SFD)
    b_big = pe_b64[None, :] + np.einsum('csf,cpfd->sd', shift_r, pe_w5)
    b_big = b_big.reshape(SFD)

    w_peT = w_big.T.astype(np.float32)                             # (SFD, K_PE)
    b_peT = b_big.reshape(SFD, 1).astype(np.float32)               # (SFD, 1)

    # tscam_conv taps -> transposed + stacked (3*OUT_DIM, SFD), rows = (k, o)
    w_ts = np.transpose(conv_w64, (3, 2, 1, 0)).reshape(3, SFD, OUT_DIM)
    w_tsT = np.transpose(w_ts, (0, 2, 1)).reshape(3 * OUT_DIM, SFD).astype(np.float32)
    b_tsT = conv_b64.reshape(OUT_DIM, 1).astype(np.float32)

    # fold the +-1 conv time-shift into the interp matrix, then transpose
    shifts = np.zeros((3, ST, ST), np.float64)
    for k in range(3):
        for t in range(ST):
            s = t + k - 1
            if 0 <= s < ST:
                shifts[k, t, s] = 1.0
    w_int = np.einsum('ot,kts->kos', w_interp.astype(np.float64), shifts)
    w_intT = np.transpose(w_int, (0, 2, 1)).astype(np.float32)     # (3, ST, OF)

    raw = dict(bn_scale=jnp.asarray(scale32), bn_shift=jnp.asarray(shift32),
               pe_w=pe_w, pe_b=pe_b, conv_w4=conv_w4, conv_b=conv_b,
               w_interp=jnp.asarray(w_interp))
    fused = dict(w_peT=jnp.asarray(w_peT), b_peT=jnp.asarray(b_peT),
                 w_tsT=jnp.asarray(w_tsT), b_tsT=jnp.asarray(b_tsT),
                 w_intT=jnp.asarray(w_intT))
    return fused, raw


def htsat_forward(x, params):
    """x: (B, C, T, F) float32 spectrogram. Returns {'accdoa': (B, 100, 9)}."""
    b, c, t, f = x.shape
    output_frames = t // PRED_RES
    assert output_frames == TGT_OUTPUT_FRAMES  # 10-second path only
    st = t // PATCH_T
    # layout plumbing only: present each (batch, time-patch) as one lane-dense
    # 256-tall column (c, pt, f) of a (K_PE, B*ST) matrix; BN is already folded
    # into the kernel weights.
    xpT = (x.reshape(b, c, st, PATCH_T, f)
            .transpose(1, 3, 4, 0, 2)
            .reshape(c * PATCH_T * f, b * st))
    accT = fused_forward_call(xpT, params)            # (B, 9, 100) lane-dense
    return {"accdoa": jnp.transpose(accT, (0, 2, 1))}  # (B, 100, 9)


# ----------------------- unfused pure-JAX reference -------------------------
def reference_forward(x, raw):
    b, c, t, f = x.shape
    xb = x * raw["bn_scale"][None, :, None, :] + raw["bn_shift"][None, :, None, :]
    st, sf = t // PATCH_T, f // PATCH_F
    p = xb.reshape(b, c, st, PATCH_T, sf, PATCH_F)
    p = p.transpose(0, 2, 4, 1, 3, 5).reshape(b * st * sf, c * PATCH_T * PATCH_F)
    feat = jax.nn.gelu(jnp.dot(p, raw["pe_w"], precision=HI) + raw["pe_b"])
    feat = feat.reshape(b, st, sf, NUM_FEATURES).transpose(0, 3, 2, 1)  # (B,D,SF,ST)
    fp = jnp.pad(feat, ((0, 0), (0, 0), (0, 0), (1, 1)))
    cols = jnp.stack([fp[..., k:k + st] for k in range(3)], axis=-1)    # (B,D,SF,ST,3)
    seq = jnp.einsum('odsk,bdstk->bto', raw["conv_w4"], cols,
                     precision=HI) + raw["conv_b"]
    y = jnp.einsum('ut,bto->buo', raw["w_interp"], seq, precision=HI)
    return jnp.tanh(y)


# --------------------------------- main -------------------------------------
if __name__ == "__main__":
    key = jax.random.PRNGKey(0)
    k_x, k_p = jax.random.split(key)
    x = jax.random.normal(k_x, (B, C_IN, T_FRAMES, MEL_BINS), jnp.float32)
    params, raw = init_params(k_p)

    fwd = jax.jit(htsat_forward)
    out = fwd(x, params)
    accdoa = jax.block_until_ready(out["accdoa"])
    assert accdoa.shape == (B, TGT_OUTPUT_FRAMES, OUT_DIM)
    assert bool(jnp.all(jnp.isfinite(accdoa)))

    # structural check against the unfused reference (HIGHEST-precision matmuls
    # on both sides + float64 host-side folding => tight tolerance).
    ref = reference_forward(x, raw)
    err = float(jnp.max(jnp.abs(accdoa - ref)))
    assert err < 1e-4, f"mismatch vs reference: {err}"

    print("KERNEL_OK")
</pallas_src>

<mosaic_0001>
module attributes {stable_mosaic.version = 11 : i64} {
  func.func @_fused_kernel(%arg0: memref<256x50xf32, #tpu.memory_space<vmem>>, %arg1: memref<128x256xf32, #tpu.memory_space<vmem>>, %arg2: memref<128x1xf32, #tpu.memory_space<vmem>>, %arg3: memref<27x128xf32, #tpu.memory_space<vmem>>, %arg4: memref<9x1xf32, #tpu.memory_space<vmem>>, %arg5: memref<3x25x100xf32, #tpu.memory_space<vmem>>, %arg6: memref<2x9x100xf32, #tpu.memory_space<vmem>>) attributes {dimension_semantics = [], scalar_prefetch = 0 : i64, scratch_operands = 0 : i64, tpu.core_type = #tpu.core_type<tc>} {
    %c0 = arith.constant 0 : index
    %c0_0 = arith.constant 0 : index
    %0 = vector.load %arg1[%c0, %c0_0] : memref<128x256xf32, #tpu.memory_space<vmem>>, vector<128x256xf32>
    %c0_1 = arith.constant 0 : index
    %c0_2 = arith.constant 0 : index
    %1 = vector.load %arg0[%c0_1, %c0_2] : memref<256x50xf32, #tpu.memory_space<vmem>>, vector<256x50xf32>
    %cst = arith.constant dense<0.000000e+00> : vector<128x50xf32>
    %2 = tpu.matmul %0, %1, %cst {dimension_numbers = #tpu.dot_dimension_numbers<[1], [0], [0], [1], [0, 0, 1, 1], [], []>, precision = #tpu.contract_precision<fp32>} : vector<128x256xf32>, vector<256x50xf32>, vector<128x50xf32> -> vector<128x50xf32>
    %c0_3 = arith.constant 0 : index
    %c0_4 = arith.constant 0 : index
    %3 = vector.load %arg2[%c0_3, %c0_4] : memref<128x1xf32, #tpu.memory_space<vmem>>, vector<128x1xf32>
    %4 = vector.broadcast %3 : vector<128x1xf32> to vector<128x50xf32>
    %5 = arith.addf %2, %4 : vector<128x50xf32>
    %6 = arith.mulf %5, %5 : vector<128x50xf32>
    %7 = arith.mulf %5, %6 : vector<128x50xf32>
    %cst_5 = arith.constant 4.471500e-02 : f32
    %8 = vector.broadcast %cst_5 : f32 to vector<128x50xf32>
    %9 = arith.mulf %8, %7 : vector<128x50xf32>
    %10 = arith.addf %5, %9 : vector<128x50xf32>
    %cst_6 = arith.constant 0.797884583 : f32
    %11 = vector.broadcast %cst_6 : f32 to vector<128x50xf32>
    %12 = arith.mulf %11, %10 : vector<128x50xf32>
    %13 = math.tanh %12 : vector<128x50xf32>
    %cst_7 = arith.constant 1.000000e+00 : f32
    %14 = vector.broadcast %cst_7 : f32 to vector<128x50xf32>
    %15 = arith.addf %14, %13 : vector<128x50xf32>
    %cst_8 = arith.constant 5.000000e-01 : f32
    %16 = vector.broadcast %cst_8 : f32 to vector<128x50xf32>
    %17 = arith.mulf %16, %15 : vector<128x50xf32>
    %18 = arith.mulf %5, %17 : vector<128x50xf32>
    %c0_9 = arith.constant 0 : index
    %c0_10 = arith.constant 0 : index
    %19 = vector.load %arg3[%c0_9, %c0_10] : memref<27x128xf32, #tpu.memory_space<vmem>>, vector<27x128xf32>
    %c0_11 = arith.constant 0 : index
    %c0_12 = arith.constant 0 : index
    %20 = vector.load %arg4[%c0_11, %c0_12] : memref<9x1xf32, #tpu.memory_space<vmem>>, vector<9x1xf32>
    %21 = vector.extract_strided_slice %18 {offsets = [0, 0], sizes = [128, 25], strides = [1, 1]} : vector<128x50xf32> to vector<128x25xf32>
    %cst_13 = arith.constant dense<0.000000e+00> : vector<27x25xf32>
    %22 = tpu.matmul %19, %21, %cst_13 {dimension_numbers = #tpu.dot_dimension_numbers<[1], [0], [0], [1], [0, 0, 1, 1], [], []>, precision = #tpu.contract_precision<fp32>} : vector<27x128xf32>, vector<128x25xf32>, vector<27x25xf32> -> vector<27x25xf32>
    %23 = vector.extract_strided_slice %22 {offsets = [0, 0], sizes = [9, 25], strides = [1, 1]} : vector<27x25xf32> to vector<9x25xf32>
    %c0_14 = arith.constant 0 : index
    %c0_15 = arith.constant 0 : index
    %c0_16 = arith.constant 0 : index
    %24 = vector.load %arg5[%c0_14, %c0_15, %c0_16] : memref<3x25x100xf32, #tpu.memory_space<vmem>>, vector<1x25x100xf32>
    %25 = vector.shape_cast %24 : vector<1x25x100xf32> to vector<25x100xf32>
    %cst_17 = arith.constant dense<0.000000e+00> : vector<9x100xf32>
    %26 = tpu.matmul %23, %25, %cst_17 {dimension_numbers = #tpu.dot_dimension_numbers<[1], [0], [0], [1], [0, 0, 1, 1], [], []>, precision = #tpu.contract_precision<fp32>} : vector<9x25xf32>, vector<25x100xf32>, vector<9x100xf32> -> vector<9x100xf32>
    %27 = vector.extract_strided_slice %22 {offsets = [9, 0], sizes = [9, 25], strides = [1, 1]} : vector<27x25xf32> to vector<9x25xf32>
    %c1 = arith.constant 1 : index
    %c0_18 = arith.constant 0 : index
    %c0_19 = arith.constant 0 : index
    %28 = vector.load %arg5[%c1, %c0_18, %c0_19] : memref<3x25x100xf32, #tpu.memory_space<vmem>>, vector<1x25x100xf32>
    %29 = vector.shape_cast %28 : vector<1x25x100xf32> to vector<25x100xf32>
    %cst_20 = arith.constant dense<0.000000e+00> : vector<9x100xf32>
    %30 = tpu.matmul %27, %29, %cst_20 {dimension_numbers = #tpu.dot_dimension_numbers<[1], [0], [0], [1], [0, 0, 1, 1], [], []>, precision = #tpu.contract_precision<fp32>} : vector<9x25xf32>, vector<25x100xf32>, vector<9x100xf32> -> vector<9x100xf32>
    %31 = arith.addf %26, %30 : vector<9x100xf32>
    %32 = vector.extract_strided_slice %22 {offsets = [18, 0], sizes = [9, 25], strides = [1, 1]} : vector<27x25xf32> to vector<9x25xf32>
    %c2 = arith.constant 2 : index
    %c0_21 = arith.constant 0 : index
    %c0_22 = arith.constant 0 : index
    %33 = vector.load %arg5[%c2, %c0_21, %c0_22] : memref<3x25x100xf32, #tpu.memory_space<vmem>>, vector<1x25x100xf32>
    %34 = vector.shape_cast %33 : vector<1x25x100xf32> to vector<25x100xf32>
    %cst_23 = arith.constant dense<0.000000e+00> : vector<9x100xf32>
    %35 = tpu.matmul %32, %34, %cst_23 {dimension_numbers = #tpu.dot_dimension_numbers<[1], [0], [0], [1], [0, 0, 1, 1], [], []>, precision = #tpu.contract_precision<fp32>} : vector<9x25xf32>, vector<25x100xf32>, vector<9x100xf32> -> vector<9x100xf32>
    %36 = arith.addf %31, %35 : vector<9x100xf32>
    %37 = vector.broadcast %20 : vector<9x1xf32> to vector<9x100xf32>
    %38 = arith.addf %36, %37 : vector<9x100xf32>
    %39 = math.tanh %38 : vector<9x100xf32>
    %c0_24 = arith.constant 0 : index
    %c0_25 = arith.constant 0 : index
    %c0_26 = arith.constant 0 : index
    %40 = vector.load %arg6[%c0_24, %c0_25, %c0_26] : memref<2x9x100xf32, #tpu.memory_space<vmem>>, vector<1x9x100xf32>
    %41 = vector.shape_cast %40 : vector<1x9x100xf32> to vector<9x100xf32>
    %42 = vector.shape_cast %39 : vector<9x100xf32> to vector<1x9x100xf32>
    tpu.vector_store %arg6[%c0_24, %c0_25, %c0_26], %42 {strides = array<i32>} : memref<2x9x100xf32, #tpu.memory_space<vmem>>, vector<1x9x100xf32>,
    %43 = vector.extract_strided_slice %18 {offsets = [0, 25], sizes = [128, 25], strides = [1, 1]} : vector<128x50xf32> to vector<128x25xf32>
    %cst_27 = arith.constant dense<0.000000e+00> : vector<27x25xf32>
    %44 = tpu.matmul %19, %43, %cst_27 {dimension_numbers = #tpu.dot_dimension_numbers<[1], [0], [0], [1], [0, 0, 1, 1], [], []>, precision = #tpu.contract_precision<fp32>} : vector<27x128xf32>, vector<128x25xf32>, vector<27x25xf32> -> vector<27x25xf32>
    %45 = vector.extract_strided_slice %44 {offsets = [0, 0], sizes = [9, 25], strides = [1, 1]} : vector<27x25xf32> to vector<9x25xf32>
    %c0_28 = arith.constant 0 : index
    %c0_29 = arith.constant 0 : index
    %c0_30 = arith.constant 0 : index
    %46 = vector.load %arg5[%c0_28, %c0_29, %c0_30] : memref<3x25x100xf32, #tpu.memory_space<vmem>>, vector<1x25x100xf32>
    %47 = vector.shape_cast %46 : vector<1x25x100xf32> to vector<25x100xf32>
    %cst_31 = arith.constant dense<0.000000e+00> : vector<9x100xf32>
    %48 = tpu.matmul %45, %47, %cst_31 {dimension_numbers = #tpu.dot_dimension_numbers<[1], [0], [0], [1], [0, 0, 1, 1], [], []>, precision = #tpu.contract_precision<fp32>} : vector<9x25xf32>, vector<25x100xf32>, vector<9x100xf32> -> vector<9x100xf32>
    %49 = vector.extract_strided_slice %44 {offsets = [9, 0], sizes = [9, 25], strides = [1, 1]} : vector<27x25xf32> to vector<9x25xf32>
    %c1_32 = arith.constant 1 : index
    %c0_33 = arith.constant 0 : index
    %c0_34 = arith.constant 0 : index
    %50 = vector.load %arg5[%c1_32, %c0_33, %c0_34] : memref<3x25x100xf32, #tpu.memory_space<vmem>>, vector<1x25x100xf32>
    %51 = vector.shape_cast %50 : vector<1x25x100xf32> to vector<25x100xf32>
    %cst_35 = arith.constant dense<0.000000e+00> : vector<9x100xf32>
    %52 = tpu.matmul %49, %51, %cst_35 {dimension_numbers = #tpu.dot_dimension_numbers<[1], [0], [0], [1], [0, 0, 1, 1], [], []>, precision = #tpu.contract_precision<fp32>} : vector<9x25xf32>, vector<25x100xf32>, vector<9x100xf32> -> vector<9x100xf32>
    %53 = arith.addf %48, %52 : vector<9x100xf32>
    %54 = vector.extract_strided_slice %44 {offsets = [18, 0], sizes = [9, 25], strides = [1, 1]} : vector<27x25xf32> to vector<9x25xf32>
    %c2_36 = arith.constant 2 : index
    %c0_37 = arith.constant 0 : index
    %c0_38 = arith.constant 0 : index
    %55 = vector.load %arg5[%c2_36, %c0_37, %c0_38] : memref<3x25x100xf32, #tpu.memory_space<vmem>>, vector<1x25x100xf32>
    %56 = vector.shape_cast %55 : vector<1x25x100xf32> to vector<25x100xf32>
    %cst_39 = arith.constant dense<0.000000e+00> : vector<9x100xf32>
    %57 = tpu.matmul %54, %56, %cst_39 {dimension_numbers = #tpu.dot_dimension_numbers<[1], [0], [0], [1], [0, 0, 1, 1], [], []>, precision = #tpu.contract_precision<fp32>} : vector<9x25xf32>, vector<25x100xf32>, vector<9x100xf32> -> vector<9x100xf32>
    %58 = arith.addf %53, %57 : vector<9x100xf32>
    %59 = vector.broadcast %20 : vector<9x1xf32> to vector<9x100xf32>
    %60 = arith.addf %58, %59 : vector<9x100xf32>
    %61 = math.tanh %60 : vector<9x100xf32>
    %c1_40 = arith.constant 1 : index
    %c0_41 = arith.constant 0 : index
    %c0_42 = arith.constant 0 : index
    %62 = vector.load %arg6[%c1_40, %c0_41, %c0_42] : memref<2x9x100xf32, #tpu.memory_space<vmem>>, vector<1x9x100xf32>
    %63 = vector.shape_cast %62 : vector<1x9x100xf32> to vector<9x100xf32>
    %64 = vector.shape_cast %61 : vector<9x100xf32> to vector<1x9x100xf32>
    tpu.vector_store %arg6[%c1_40, %c0_41, %c0_42], %64 {strides = array<i32>} : memref<2x9x100xf32, #tpu.memory_space<vmem>>, vector<1x9x100xf32>,
    return
  }
}

</mosaic_0001>

<bundles_post_ra>
// kernel: htsat_forward.1
= control target key start
LH: loop header
LB: loop body
LE: loop exit
PB: predicated region body
PF: predicated region fallthrough
CT: control target
= control target key end

     0   :  { %v4361_v3 = vmov 0   ;;  %vm2399_vm0 = vcmask 1040384   ;;  %vm2390_vm1 = vcmask 1046528   ;;  %vm2394_vm2 = vcmask 203776   ;;  %s7167_s0 = inlined_call_operand.vmem [shape: f32[256,50], index: 0, kind: input, shape index: {}]   ;;  %s7168_s2 = inlined_call_operand.vmem [shape: f32[128,1], index: 2, kind: input, shape index: {}]   ;;  %s7169_s1 = inlined_call_operand.vmem [shape: f32[128,256], index: 1, kind: input, shape index: {}]   ;;  %s7170_s3 = inlined_call_operand.vmem [shape: f32[27,128], index: 3, kind: input, shape index: {}]   ;;  %s7171_s4 = inlined_call_operand.vmem [shape: f32[9,1], index: 4, kind: input, shape index: {}]   ;;  %s7172_s5 = inlined_call_operand.vmem [shape: f32[3,25,100], index: 5, kind: input, shape index: {}]   ;;  %s7173_s6 = inlined_call_operand.vmem [shape: f32[2,9,100], index: 6, kind: output, shape index: {}]  }
   0x1   :  { %v70_v0 = vld [vmem:[%s7167_s0 + $0x78] sm:$0xff]  ;;  %v69_v1 = vld [vmem:[%s7167_s0 + $0x70] sm:$0xff]  ;;  %v68_v2 = vld [vmem:[%s7167_s0 + $0x68] sm:$0xff]  ;;  %4318 = vset.pattern.permute.xlu0 %v4361_v3  ;;  %4319 = vset.pattern.permute.xlu1 %v4361_v3  ;;  %vm2849_vm3 = vcmask 1045504   ;;  %vm3092_vm4 = vcmask 818176   ;;  %vm3094_vm5 = vcmask 811008  }
   0x2   :  { %v4407_v4 = vand.u32 4294901760, %v70_v0  ;;  %v4409_v5 = vand.u32 4294901760, %v69_v1  ;;  %v4411_v6 = vand.u32 4294901760, %v68_v2  ;;  %v67_v7 = vld [vmem:[%s7167_s0 + $0x60] sm:$0xff]  ;;  %v102_v8 = vld [vmem:[%s7168_s2 + $0x78] sm:$0xff]  ;;  %4320 = vset.pattern.permute.xlu2 %v4361_v3  ;;  %v65_v12 = vld [vmem:[%s7167_s0 + $0x50] sm:$0xff] }
   0x3   :  { %v66_v9 = vld [vmem:[%s7167_s0 + $0x58] sm:$0xff]  ;;  %v4422_v10 = vand.u32 4294901760, %v67_v7  ;;  %180 = vperm.xlu0 %4318, %v102_v8   ;;  %v64_v13 = vld [vmem:[%s7167_s0 + $0x48] sm:$0xff]  ;;  %v63_v14 = vld [vmem:[%s7167_s0 + $0x40] sm:$0xff]  ;;  %v4446_v18 = vand.u32 4294901760, %v65_v12 }
   0x4   :  { %v4424_v11 = vand.u32 4294901760, %v66_v9  ;;  %184 = vmatpush.msra.mxu0 %v4407_v4  ;;  %v4437_v15 = vsub.f32 %v70_v0, %v4407_v4  ;;  %v4440_v16 = vsub.f32 %v69_v1, %v4409_v5  ;;  %635 = vmatpush.msra.mxu3 %v4407_v4  ;;  %v4444_v17 = vsub.f32 %v68_v2, %v4411_v6  ;;  %v62_v19 = vld [vmem:[%s7167_s0 + $0x38] sm:$0xff]  ;;  %v61_v31 = vld [vmem:[%s7167_s0 + $0x30] sm:$0xff]  ;;  %v100_v32 = vld [vmem:[%s7168_s2 + $0x68] sm:$0xff] }
   0x5   :  { %v4452_v20 = vsub.f32 %v67_v7, %v4422_v10  ;;  %v4454_v21 = vand.u32 4294901760, %v64_v13  ;;  %v4459_v23 = vand.u32 4294901760, %v63_v14  ;;  %v4467_v27 = vsub.f32 %v65_v12, %v4446_v18  ;;  %v101_v36 = vld [vmem:[%s7168_s2 + $0x70] sm:$0xff]  ;;  %v60_v40 = vld [vmem:[%s7167_s0 + $0x28] sm:$0xff]  ;;  %170 = vperm.xlu1 %4319, %v100_v32   ;;  %v59_v46 = vld [vmem:[%s7167_s0 + $0x20] sm:$0xff] }
   0x6   :  { %v4457_v22 = vsub.f32 %v66_v9, %v4424_v11  ;;  %186 = vmatpush.msra.mxu0 %v4409_v5  ;;  %507 = vmatpush.msra.mxu2 %v4437_v15  ;;  %v346_v24 = vand.u32 4294901760, %v4437_v15  ;;  %v352_v25 = vand.u32 4294901760, %v4440_v16  ;;  %v358_v26 = vand.u32 4294901760, %v4444_v17  ;;  %v58_v53 = vld [vmem:[%s7167_s0 + $0x18] sm:$0xff]  ;;  %v57_v58 = vld [vmem:[%s7167_s0 + $0x10] sm:$0xff]  ;;  %v23_v59 = vld [vmem:[%s7169_s1] sm:$0xff] }
   0x7   :  { %637 = vmatpush.msra.mxu3 %v4409_v5  ;;  %v364_v28 = vand.u32 4294901760, %v4452_v20  ;;  %v4471_v29 = vand.u32 4294901760, %v62_v19  ;;  %v4474_v30 = vsub.f32 %v64_v13, %v4454_v21  ;;  %v376_v38 = vand.u32 4294901760, %v4467_v27  ;;  %v56_v0 = vld [vmem:[%s7167_s0 + $0x8] sm:$0xff] }
   0x8   :  { %188 = vmatpush.msra.mxu0 %v4411_v6  ;;  %510 = vmatpush.msra.mxu2 %v4440_v16  ;;  %v347_v33 = vsub.f32 %v4437_v15, %v346_v24  ;;  %v353_v34 = vsub.f32 %v4440_v16, %v352_v25  ;;  %v359_v35 = vsub.f32 %v4444_v17, %v358_v26  ;;  %v370_v37 = vand.u32 4294901760, %v4457_v22  ;;  %v87_v15 = vld [vmem:[%s7168_s2] sm:$0xff] }
   0x9   :  { %639 = vmatpush.msra.mxu3 %v4411_v6  ;;  %v4500_v39 = vsub.f32 %v63_v14, %v4459_v23  ;;  %v365_v43 = vsub.f32 %v4452_v20, %v364_v28  ;;  %v4510_v44 = vand.u32 4294901760, %v61_v31  ;;  %v382_v45 = vand.u32 4294901760, %v4474_v30  ;;  %v55_v14 = vld [vmem:[%s7167_s0] sm:$0xff] }
   0xa   :  { %190 = vmatpush.msra.mxu0 %v4422_v10  ;;  %v348_v41 = vand.u32 4294901760, %v347_v33  ;;  %513 = vmatpush.msra.mxu2 %v4444_v17  ;;  %v354_v42 = vand.u32 4294901760, %v353_v34  ;;  %v360_v47 = vand.u32 4294901760, %v359_v35  ;;  %v371_v48 = vsub.f32 %v4457_v22, %v370_v37  ;;  %v25_v35 = vld [vmem:[%s7169_s1 + $0x10] sm:$0xff] }
   0xb   :  { %641 = vmatpush.msra.mxu3 %v4422_v10  ;;  %175 = vperm.xlu0 %4318, %v101_v36   ;;  %v4521_v49 = vand.u32 4294901760, %v60_v40  ;;  %v4524_v50 = vsub.f32 %v62_v19, %v4471_v29  ;;  %v377_v51 = vsub.f32 %v4467_v27, %v376_v38  ;;  %v388_v52 = vand.u32 4294901760, %v4500_v39  ;;  %v96_v19 = vld [vmem:[%s7168_s2 + $0x48] sm:$0xff]  ;;  %v33_v17 = vld [vmem:[%s7169_s1 + $0x50] sm:$0xff] }
   0xc   :  { %192 = vmatpush.msra.mxu0 %v4424_v11  ;;  %349 = vmatpush.msra.mxu1 %v348_v41  ;;  %v366_v54 = vand.u32 4294901760, %v365_v43  ;;  %v4536_v55 = vand.u32 4294901760, %v59_v46  ;;  %v4539_v56 = vsub.f32 %v61_v31, %v4510_v44  ;;  %v383_v57 = vsub.f32 %v4474_v30, %v382_v45 }
   0xd   :  { %516 = vmatpush.msra.mxu2 %v4452_v20  ;;  %643 = vmatpush.msra.mxu3 %v4424_v11  ;;  %v372_v60 = vand.u32 4294901760, %v371_v48  ;;  %v4553_v61 = vand.u32 4294901760, %v58_v53  ;;  %v394_v62 = vand.u32 4294901760, %v4524_v50  ;;  %v4557_v63 = vsub.f32 %v60_v40, %v4521_v49 }
   0xe   :  { %194 = vmatpush.msra.mxu0 %v4446_v18  ;;  %355 = vmatpush.msra.mxu1 %v354_v42  ;;  %v378_v1 = vand.u32 4294901760, %v377_v51  ;;  %v389_v2 = vsub.f32 %v4500_v39, %v388_v52  ;;  %v4568_v3 = vand.u32 4294901760, %v57_v58  ;;  %v400_v7 = vand.u32 4294901760, %v4539_v56 }
   0xf   :  { %519 = vmatpush.msra.mxu2 %v4457_v22  ;;  %645 = vmatpush.msra.mxu3 %v4446_v18  ;;  %v4572_v8 = vsub.f32 %v59_v46, %v4536_v55  ;;  %v4574_v9 = vand.u32 4294901760, %v23_v59  ;;  %v384_v12 = vand.u32 4294901760, %v383_v57  ;;  %v4578_v13 = vand.u32 4294901760, %v56_v0 }
  0x10   :  { %196 = vmatpush.msra.mxu0 %v4454_v21  ;;  %361 = vmatpush.msra.mxu1 %v360_v47  ;;  %v395_v31 = vsub.f32 %v4524_v50, %v394_v62  ;;  %v406_v32 = vand.u32 4294901760, %v4557_v63  ;;  %v4592_v33 = vsub.f32 %v58_v53, %v4553_v61  ;;  %v390_v36 = vand.u32 4294901760, %v389_v2 }
  0x11   :  { %522 = vmatpush.msra.mxu2 %v4467_v27  ;;  %647 = vmatpush.msra.mxu3 %v4454_v21  ;;  %v4595_v34 = vsub.f32 %v23_v59, %v4574_v9  ;;  %v401_v40 = vsub.f32 %v4539_v56, %v400_v7  ;;  %v4606_v41 = vand.u32 4294901760, %v55_v14  ;;  %v412_v42 = vand.u32 4294901760, %v4572_v8 }
  0x12   :  { %198 = vmatpush.msra.mxu0 %v4459_v23  ;;  %367 = vmatpush.msra.mxu1 %v366_v54  ;;  %v4610_v43 = vsub.f32 %v57_v58, %v4568_v3  ;;  %v4614_v47 = vand.u32 4294901760, %v25_v35  ;;  %v396_v48 = vand.u32 4294901760, %v395_v31  ;;  %v407_v51 = vsub.f32 %v4557_v63, %v406_v32 }
  0x13   :  { %525 = vmatpush.msra.mxu2 %v4474_v30  ;;  %649 = vmatpush.msra.mxu3 %v4459_v23  ;;  %v217_v46 = vand.u32 4294901760, %v4595_v34  ;;  %v7174_v53 = vand.u32 4294901760, %v4592_v33  ;;  %v4622_v54 = vsub.f32 %v56_v0, %v4578_v13  ;;  %v402_v57 = vand.u32 4294901760, %v401_v40 }
  0x14   :  { %200 = vmatpush.msra.mxu0 %v4471_v29  ;;  %373 = vmatpush.msra.mxu1 %v372_v60  ;;  %v413_v58 = vsub.f32 %v4572_v8, %v412_v42  ;;  %v7175_v59 = vand.u32 4294901760, %v4610_v43  ;;  %v4632_v60 = vsub.f32 %v55_v14, %v4606_v41  ;;  %v408_v2 = vand.u32 4294901760, %v407_v51 }
  0x15   :  { %528 = vmatpush.msra.mxu2 %v4500_v39  ;;  %651 = vmatpush.msra.mxu3 %v4471_v29  ;;  %v218_v0 = vsub.f32 %v4595_v34, %v217_v46  ;;  %v7176_v14 = vand.u32 4294901760, %v4622_v54  ;;  %v4751_v22 = vand.u32 4294901760, %v33_v17  ;;  %v37_v39 = vld [vmem:[%s7169_s1 + $0x70] sm:$0xff] }
  0x16   :  { %202 = vmatpush.msra.mxu0 %v4510_v44  ;;  %379 = vmatpush.msra.mxu1 %v378_v1  ;;  %v4640_v1 = vsub.f32 %v25_v35, %v4614_v47  ;;  %v414_v31 = vand.u32 4294901760, %v413_v58  ;;  %v93_v35 = vld [vmem:[%s7168_s2 + $0x30] sm:$0xff]  ;;  %v7177_v40 = vand.u32 4294901760, %v4632_v60 }
  0x17   :  { %531 = vmatpush.msra.mxu2 %v4524_v50  ;;  %150 = vperm.xlu0 %4318, %v96_v19   ;;  %v27_v19 = vld [vmem:[%s7169_s1 + $0x20] sm:$0xff]  ;;  %v431_v58 = vsub.f32 %v4622_v54, %v7176_v14 }
  0x18   :  { %204 = vmatpush.msra.mxu0 %v4521_v49  ;;  %385 = vmatpush.msra.mxu1 %v384_v12  ;;  %v419_v12 = vsub.f32 %v4592_v33, %v7174_v53  ;;  %v225_v51 = vand.u32 4294901760, %v4640_v1  ;;  %v4663_v53 = vand.u32 4294901760, %v27_v19 }
  0x19   :  { %534 = vmatpush.msra.mxu2 %v4539_v56  ;;  %653 = vmatpush.msra.mxu3 %v4510_v44 }
  0x1a   :  { %206 = vmatpush.msra.mxu0 %v4536_v55  ;;  %391 = vmatpush.msra.mxu1 %v390_v36  ;;  %v425_v36 = vsub.f32 %v4610_v43, %v7175_v59  ;;  %v4680_v14 = vsub.f32 %v27_v19, %v4663_v53 }
  0x1b   :  { %537 = vmatpush.msra.mxu2 %v4557_v63  ;;  %655 = vmatpush.msra.mxu3 %v4521_v49 }
  0x1c   :  { %208 = vmatpush.msra.mxu0 %v4553_v61  ;;  %397 = vmatpush.msra.mxu1 %v396_v48  ;;  %v219_v48 = vand.u32 4294901760, %v218_v0  ;;  %v426_v59 = vand.u32 4294901760, %v425_v36  ;;  %v437_v0 = vsub.f32 %v4632_v60, %v7177_v40  ;;  %v29_v36 = vld [vmem:[%s7169_s1 + $0x30] sm:$0xff] }
  0x1d   :  { %540 = vmatpush.msra.mxu2 %v4572_v8  ;;  %657 = vmatpush.msra.mxu3 %v4536_v55  ;;  %v4696_v40 = vand.u32 4294901760, %v29_v36 }
  0x1e   :  { %210 = vmatpush.msra.mxu0 %v4568_v3  ;;  %403 = vmatpush.msra.mxu1 %v402_v57  ;;  %v420_v57 = vand.u32 4294901760, %v419_v12  ;;  %v226_v12 = vsub.f32 %v4640_v1, %v225_v51  ;;  %v438_v19 = vand.u32 4294901760, %v437_v0 }
  0x1f   :  { %543 = vmatpush.msra.mxu2 %v4592_v33  ;;  %659 = vmatpush.msra.mxu3 %v4553_v61 }
  0x20   :  { %212 = vmatpush.msra.mxu0 %v4578_v13  ;;  %409 = vmatpush.msra.mxu1 %v408_v2  ;;  %v99_v2 = vld [vmem:[%s7168_s2 + $0x60] sm:$0xff] }
  0x21   :  { %546 = vmatpush.msra.mxu2 %v4610_v43  ;;  %135 = vperm.xlu0 %4318, %v93_v35   ;;  %v98_v35 = vld [vmem:[%s7168_s2 + $0x58] sm:$0xff] }
  0x22   :  { %214 = vmatpush.msra.mxu0 %v4606_v41  ;;  %415 = vmatpush.msra.mxu1 %v414_v31  ;;  %v432_v31 = vand.u32 4294901760, %v431_v58  ;;  %v233_v58 = vand.u32 4294901760, %v4680_v14 }
  0x23   :  { %220 = vmatmul.f32.vlgmr.msra.gmra.mxu0 %v219_v48  ;;  %549 = vmatpush.msra.mxu2 %v4622_v54  ;;  %v90_v48 = vld [vmem:[%s7168_s2 + $0x18] sm:$0xff] }
  0x24   :  { %421 = vmatpush.msra.mxu1 %v420_v57  ;;  %661 = vmatpush.msra.mxu3 %v4568_v3  ;;  %v227_v57 = vand.u32 4294901760, %v226_v12  ;;  %v234_v0 = vsub.f32 %v4680_v14, %v233_v58 }
  0x25   :  { %552 = vmatpush.msra.mxu2 %v4632_v60  ;;  %165 = vperm.xlu1 %4319, %v99_v2   ;;  %v240_v2 = vsub.f32 %v29_v36, %v4696_v40 }
  0x26   :  { %427 = vmatpush.msra.mxu1 %v426_v59  ;;  %663 = vmatpush.msra.mxu3 %v4578_v13  ;;  %v95_v59 = vld [vmem:[%s7168_s2 + $0x40] sm:$0xff] }
  0x27   :  { %555 = vmatmul.f32.vlgmr.msra.gmra.mxu2 %v4595_v34  ;;  %160 = vperm.xlu2 %4320, %v98_v35   ;;  %v97_v34 = vld [vmem:[%s7168_s2 + $0x50] sm:$0xff]  ;;  %v241_v12 = vand.u32 4294901760, %v240_v2  ;;  %v86_v35 = vld [vmem:[%s7167_s0 + $0xf8] sm:$0xff] }
  0x28   :  { %433 = vmatpush.msra.mxu1 %v432_v31  ;;  %665 = vmatpush.msra.mxu3 %v4606_v41  ;;  %v4831_v36 = vand.u32 4294901760, %v86_v35 }
  0x29   :  { %669 = vmatmul.f32.vlgmr.msra.gmra.mxu3 %v217_v46  ;;  %120 = vperm.xlu0 %4318, %v90_v48   ;;  %v31_v46 = vld [vmem:[%s7169_s1 + $0x40] sm:$0xff] }
  0x2a   :  { %439 = vmatpush.msra.mxu1 %v438_v19  ;;  %766 = vmatpush.msrb.mxu0 %v346_v24  ;;  %v235_v24 = vand.u32 4294901760, %v234_v0  ;;  %v4725_v31 = vand.u32 4294901760, %v31_v46  ;;  %v85_v19 = vld [vmem:[%s7167_s0 + $0xf0] sm:$0xff]  ;;  %v84_v0 = vld [vmem:[%s7167_s0 + $0xe8] sm:$0xff] }
  0x2b   :  { %228 = vmatmul.f32.gmra.mxu0 %v227_v57  ;;  %441 = vmatmul.f32.vlgmr.msra.gmra.mxu1 %v4574_v9  ;;  %v4837_v48 = vand.u32 4294901760, %v85_v19  ;;  %v4840_v57 = vsub.f32 %v86_v35, %v4831_v36 }
  0x2c   :  { %770 = vmatpush.msrb.mxu0 %v352_v25  ;;  %893 = vmatpush.msrb.mxu1 %v4407_v4  ;;  %v92_v4 = vld [vmem:[%s7168_s2 + $0x28] sm:$0xff]  ;;  %v248_v16 = vsub.f32 %v31_v46, %v4725_v31  ;;  %v256_v25 = vsub.f32 %v33_v17, %v4751_v22  ;;  %v4858_v46 = vand.u32 4294901760, %v84_v0 }
  0x2d   :  { %145 = vperm.xlu1 %4319, %v95_v59   ;;  %990 = vmatpush.msrb.mxu2 %v4831_v36 }
  0x2e   :  { %774 = vmatpush.msrb.mxu0 %v358_v26  ;;  %895 = vmatpush.msrb.mxu1 %v4409_v5  ;;  %v242_v5 = vsub.f32 %v240_v2, %v241_v12  ;;  %v249_v20 = vand.u32 4294901760, %v248_v16  ;;  %v35_v26 = vld [vmem:[%s7169_s1 + $0x60] sm:$0xff]  ;;  %v257_v27 = vand.u32 4294901760, %v256_v25 }
  0x2f   :  { %560 = vmatmul.f32.gmra.mxu2 %v4640_v1  ;;  %155 = vperm.xlu2 %4320, %v97_v34   ;;  %v7190_v34 = vand.u32 4294901760, %v4840_v57 }
  0x30   :  { %778 = vmatpush.msrb.mxu0 %v364_v28  ;;  %897 = vmatpush.msrb.mxu1 %v4411_v6  ;;  %v94_v6 = vld [vmem:[%s7168_s2 + $0x38] sm:$0xff]  ;;  %v4776_v28 = vand.u32 4294901760, %v35_v26  ;;  %v258_v30 = vsub.f32 %v256_v25, %v257_v27 }
  0x31   :  { %675 = vmatmul.f32.gmra.mxu3 %v225_v51  ;;  %105 = vperm.xlu0 %4318, %v87_v15   ;;  %v4861_v15 = vsub.f32 %v85_v19, %v4837_v48 }
  0x32   :  { %782 = vmatpush.msrb.mxu0 %v370_v37  ;;  %899 = vmatpush.msrb.mxu1 %v4422_v10  ;;  %v243_v10 = vand.u32 4294901760, %v242_v5  ;;  %v264_v37 = vsub.f32 %v35_v26, %v4776_v28 }
  0x33   :  { %236 = vmatmul.f32.gmra.mxu0 %v235_v24  ;;  %445 = vmatmul.f32.gmra.mxu1 %v4614_v47  ;;  %v83_v24 = vld [vmem:[%s7167_s0 + $0xe0] sm:$0xff] }
  0x34   :  { %786 = vmatpush.msrb.mxu0 %v376_v38  ;;  %901 = vmatpush.msrb.mxu1 %v4424_v11  ;;  %v89_v11 = vld [vmem:[%s7168_s2 + $0x10] sm:$0xff]  ;;  %v88_v38 = vld [vmem:[%s7168_s2 + $0x8] sm:$0xff]  ;;  %v265_v50 = vand.u32 4294901760, %v264_v37  ;;  %v4873_v5 = vand.u32 4294901760, %v83_v24 }
  0x35   :  { %130 = vperm.xlu1 %4319, %v92_v4   ;;  %992 = vmatpush.msrb.mxu2 %v4837_v48  ;;  %v7189_v4 = vand.u32 4294901760, %v4861_v15 }
  0x36   :  { %790 = vmatpush.msrb.mxu0 %v382_v45  ;;  %903 = vmatpush.msrb.mxu1 %v4446_v18  ;;  %v250_v18 = vsub.f32 %v248_v16, %v249_v20  ;;  %v7238_v45 = vand.u32 4294901760, %v4622_v54  ;;  %v266_v56 = vsub.f32 %v264_v37, %v265_v50  ;;  %v4895_v26 = vsub.f32 %v83_v24, %v4873_v5  ;;  %v77_v24 = vld [vmem:[%s7167_s0 + $0xb0] sm:$0xff] }
  0x37   :  { %565 = vmatmul.f32.gmra.mxu2 %v4680_v14  ;;  %140 = vperm.xlu2 %4320, %v94_v6  }
  0x38   :  { %794 = vmatpush.msrb.mxu0 %v388_v52  ;;  %905 = vmatpush.msrb.mxu1 %v4454_v21  ;;  %v91_v21 = vld [vmem:[%s7168_s2 + $0x20] sm:$0xff]  ;;  %v4798_v52 = vand.u32 4294901760, %v37_v39  ;;  %v267_v63 = vand.u32 4294901760, %v266_v56 }
  0x39   :  { %681 = vmatmul.f32.gmra.mxu3 %v233_v58  ;;  %994 = vmatpush.msrb.mxu2 %v4858_v46 }
  0x3a   :  { %798 = vmatpush.msrb.mxu0 %v394_v62  ;;  %907 = vmatpush.msrb.mxu1 %v4459_v23  ;;  %v251_v23 = vand.u32 4294901760, %v250_v18  ;;  %v39_v62 = vld [vmem:[%s7169_s1 + $0x80] sm:$0xff]  ;;  %v1159_v18 = vsub.f32 %v4861_v15, %v7189_v4 }
  0x3b   :  { %244 = vmatmul.f32.gmra.mxu0 %v243_v10  ;;  %449 = vmatmul.f32.gmra.mxu1 %v4663_v53 }
  0x3c   :  { %802 = vmatpush.msrb.mxu0 %v400_v7  ;;  %909 = vmatpush.msrb.mxu1 %v4471_v29  ;;  %v7236_v29 = vand.u32 4294901760, %v4592_v33  ;;  %v4809_v7 = vand.u32 4294901760, %v39_v62 }
  0x3d   :  { %115 = vperm.xlu1 %4319, %v89_v11   ;;  %996 = vmatpush.msrb.mxu2 %v4873_v5 }
  0x3e   :  { %806 = vmatpush.msrb.mxu0 %v406_v32  ;;  %911 = vmatpush.msrb.mxu1 %v4510_v44  ;;  %v7237_v44 = vand.u32 4294901760, %v4610_v43  ;;  %v41_v32 = vld [vmem:[%s7169_s1 + $0x90] sm:$0xff] }
  0x3f   :  { %570 = vmatmul.f32.gmra.mxu2 %v240_v2  ;;  %125 = vperm.xlu2 %4320, %v91_v21   ;;  %v45_v2 = vld [vmem:[%s7169_s1 + $0xb0] sm:$0xff] }
  0x40   :  { %810 = vmatpush.msrb.mxu0 %v412_v42  ;;  %913 = vmatpush.msrb.mxu1 %v4521_v49  ;;  %v259_v49 = vand.u32 4294901760, %v258_v30  ;;  %v4816_v42 = vand.u32 4294901760, %v41_v32  ;;  %v4880_v10 = vand.u32 4294901760, %v45_v2 }
  0x41   :  { %687 = vmatmul.f32.gmra.mxu3 %v241_v12  ;;  %v1153_v12 = vsub.f32 %v4840_v57, %v7190_v34 }
  0x42   :  { %814 = vmatpush.msrb.mxu0 %v7236_v29  ;;  %915 = vmatpush.msrb.mxu1 %v4536_v55  ;;  %v7239_v55 = vand.u32 4294901760, %v4632_v60  ;;  %v4820_v54 = vsub.f32 %v41_v32, %v4816_v42  ;;  %v43_v60 = vld [vmem:[%s7169_s1 + $0xa0] sm:$0xff] }
  0x43   :  { %252 = vmatmul.f32.gmra.mxu0 %v251_v23  ;;  %453 = vmatmul.f32.gmra.mxu1 %v4696_v40  ;;  %v4826_v51 = vand.u32 4294901760, %v43_v60  ;;  %v1154_v11 = vand.u32 4294901760, %v1153_v12  ;;  %v81_v23 = vld [vmem:[%s7167_s0 + $0xd0] sm:$0xff] }
  0x44   :  { %818 = vmatpush.msrb.mxu0 %v7237_v44  ;;  %917 = vmatpush.msrb.mxu1 %v4553_v61  ;;  %v272_v61 = vsub.f32 %v37_v39, %v4798_v52  ;;  %v289_v14 = vand.u32 4294901760, %v4820_v54  ;;  %v4905_v30 = vand.u32 4294901760, %v81_v23  ;;  %v4915_v39 = vsub.f32 %v45_v2, %v4880_v10 }
  0x45   :  { %v4848_v59 = vsub.f32 %v43_v60, %v4826_v51  ;;  %1155 = vmatpush.msrb.mxu3 %v1154_v11  ;;  %v7187_v44 = vand.u32 4294901760, %v4895_v26 }
  0x46   :  { %822 = vmatpush.msrb.mxu0 %v7238_v45  ;;  %919 = vmatpush.msrb.mxu1 %v4568_v3  ;;  %v273_v3 = vand.u32 4294901760, %v272_v61  ;;  %v290_v58 = vsub.f32 %v4820_v54, %v289_v14  ;;  %v80_v45 = vld [vmem:[%s7167_s0 + $0xc8] sm:$0xff] }
  0x47   :  { %575 = vmatmul.f32.gmra.mxu2 %v248_v16  ;;  %110 = vperm.xlu2 %4320, %v88_v38   ;;  %v4876_v16 = vsub.f32 %v84_v0, %v4858_v46  ;;  %v297_v17 = vand.u32 4294901760, %v4848_v59  ;;  %v4926_v56 = vand.u32 4294901760, %v80_v45 }
  0x48   :  { %826 = vmatpush.msrb.mxu0 %v7239_v55  ;;  %921 = vmatpush.msrb.mxu1 %v4578_v13  ;;  %v274_v8 = vsub.f32 %v272_v61, %v273_v3  ;;  %v280_v13 = vsub.f32 %v39_v62, %v4809_v7  ;;  %v291_v6 = vand.u32 4294901760, %v290_v58  ;;  %v1171_v62 = vsub.f32 %v4895_v26, %v7187_v44 }
  0x49   :  { %693 = vmatmul.f32.gmra.mxu3 %v249_v20  ;;  %v82_v20 = vld [vmem:[%s7167_s0 + $0xd8] sm:$0xff]  ;;  %v298_v38 = vsub.f32 %v4848_v59, %v297_v17  ;;  %v4947_v32 = vsub.f32 %v80_v45, %v4926_v56 }
  0x4a   :  { %923 = vmatpush.msrb.mxu1 %v4606_v41  ;;  %v275_v33 = vand.u32 4294901760, %v274_v8  ;;  %v281_v41 = vand.u32 4294901760, %v280_v13  ;;  %1313 = vmatpush.msra.mxu0 %v4840_v57  ;;  %v4891_v21 = vand.u32 4294901760, %v82_v20  ;;  %v1172_v60 = vand.u32 4294901760, %v1171_v62 }
  0x4b   :  { %260 = vmatmul.f32.gmra.mxu0 %v259_v49  ;;  %457 = vmatmul.f32.gmra.mxu1 %v4725_v31  ;;  %v47_v49 = vld [vmem:[%s7169_s1 + $0xc0] sm:$0xff]  ;;  %v7181_v58 = vand.u32 4294901760, %v4947_v32 }
  0x4c   :  { %v282_v43 = vsub.f32 %v280_v13, %v281_v41  ;;  %1441 = vmatpush.msra.mxu1 %v4831_v36  ;;  %1316 = vmatpush.msra.mxu0 %v4861_v15 }
  0x4d   :  { %998 = vmatpush.msrb.mxu2 %v4891_v21 }
  0x4e   :  { %v283_v1 = vand.u32 4294901760, %v282_v43  ;;  %1443 = vmatpush.msra.mxu1 %v4837_v48  ;;  %1319 = vmatpush.msra.mxu0 %v4876_v16  ;;  %v4951_v43 = vand.u32 4294901760, %v47_v49 }
  0x4f   :  { %580 = vmatmul.f32.gmra.mxu2 %v256_v25  ;;  %v7188_v25 = vand.u32 4294901760, %v4876_v16 }
  0x50   :  { %1445 = vmatpush.msra.mxu1 %v4858_v46  ;;  %1000 = vmatpush.msrb.mxu2 %v4905_v30  ;;  %v4988_v11 = vsub.f32 %v47_v49, %v4951_v43 }
  0x51   :  { %699 = vmatmul.f32.gmra.mxu3 %v257_v27  ;;  %v1160_v27 = vand.u32 4294901760, %v1159_v18  ;;  %v1165_v29 = vsub.f32 %v4876_v16, %v7188_v25  ;;  %1322 = vmatpush.msra.mxu0 %v4895_v26 }
  0x52   :  { %1447 = vmatpush.msra.mxu1 %v4873_v5  ;;  %1002 = vmatpush.msrb.mxu2 %v4926_v56 }
  0x53   :  { %268 = vmatmul.f32.gmra.mxu0 %v267_v63  ;;  %461 = vmatmul.f32.gmra.mxu1 %v4751_v22  ;;  %v79_v63 = vld [vmem:[%s7167_s0 + $0xc0] sm:$0xff] }
  0x54   :  { %1161 = vmatpush.msrb.mxu3 %v1160_v27  ;;  %1449 = vmatpush.msra.mxu1 %v4891_v21  ;;  %v49_v27 = vld [vmem:[%s7169_s1 + $0xd0] sm:$0xff] }
  0x56   :  { %1451 = vmatpush.msra.mxu1 %v4905_v30 }
  0x57   :  { %585 = vmatmul.f32.gmra.mxu2 %v264_v37  ;;  %v4908_v37 = vsub.f32 %v82_v20, %v4891_v21  ;;  %v4978_v20 = vand.u32 4294901760, %v77_v24 }
  0x58   :  { %1453 = vmatpush.msra.mxu1 %v4926_v56 }
  0x59   :  { %705 = vmatmul.f32.gmra.mxu3 %v265_v50  ;;  %v1166_v50 = vand.u32 4294901760, %v1165_v29  ;;  %v7184_v55 = vand.u32 4294901760, %v4908_v37  ;;  %1325 = vmatpush.msra.mxu0 %v4908_v37  ;;  %v5002_v49 = vsub.f32 %v77_v24, %v4978_v20  ;;  %v5026_v24 = vand.u32 4294901760, %v49_v27 }
  0x5b   :  { %276 = vmatmul.f32.gmra.mxu0 %v275_v33  ;;  %465 = vmatmul.f32.gmra.mxu1 %v4776_v28  ;;  %v299_v33 = vand.u32 4294901760, %v298_v38 }
  0x5c   :  { %1167 = vmatpush.msrb.mxu3 %v1166_v50 }
  0x5e   :  { %1173 = vmatpush.msrb.mxu3 %v1172_v60 }
  0x5f   :  { %590 = vmatmul.f32.gmra.mxu2 %v272_v61  ;;  %v4929_v61 = vsub.f32 %v81_v23, %v4905_v30  ;;  %v76_v23 = vld [vmem:[%s7167_s0 + $0xa8] sm:$0xff] }
  0x60   :  { %v4999_v45 = vand.u32 4294901760, %v76_v23 }
  0x61   :  { %711 = vmatmul.f32.gmra.mxu3 %v273_v3  ;;  %v1177_v3 = vsub.f32 %v4908_v37, %v7184_v55  ;;  %v7183_v8 = vand.u32 4294901760, %v4929_v61  ;;  %1328 = vmatpush.msra.mxu0 %v4929_v61 }
  0x63   :  { %284 = vmatmul.f32.gmra.mxu0 %v283_v1  ;;  %469 = vmatmul.f32.gmra.mxu1 %v4798_v52  ;;  %v78_v1 = vld [vmem:[%s7167_s0 + $0xb8] sm:$0xff]  ;;  %v1178_v35 = vand.u32 4294901760, %v1177_v3  ;;  %v1183_v19 = vsub.f32 %v4929_v61, %v7183_v8 }
  0x64   :  { %v4962_v0 = vand.u32 4294901760, %v78_v1  ;;  %1331 = vmatpush.msra.mxu0 %v4947_v32 }
  0x65   :  { %v1184_v12 = vand.u32 4294901760, %v1183_v19  ;;  %1179 = vmatpush.msrb.mxu3 %v1178_v35  ;;  %v7185_v19 = vand.u32 4294901760, %v4988_v11 }
  0x67   :  { %595 = vmatmul.f32.gmra.mxu2 %v280_v13  ;;  %v4944_v13 = vand.u32 4294901760, %v79_v63  ;;  %1185 = vmatpush.msrb.mxu3 %v1184_v12 }
  0x69   :  { %717 = vmatmul.f32.gmra.mxu3 %v281_v41  ;;  %v7192_v41 = vand.u32 4294901760, %v4915_v39  ;;  %1004 = vmatpush.msrb.mxu2 %v4944_v13  ;;  %v4968_v2 = vsub.f32 %v79_v63, %v4944_v13  ;;  %v75_v63 = vld [vmem:[%s7167_s0 + $0xa0] sm:$0xff] }
  0x6a   :  { %v5019_v60 = vand.u32 4294901760, %v75_v63  ;;  %1455 = vmatpush.msra.mxu1 %v4944_v13 }
  0x6b   :  { %292 = vmatmul.f32.gmra.mxu0 %v291_v6  ;;  %473 = vmatmul.f32.gmra.mxu1 %v4809_v7  ;;  %v1189_v6 = vsub.f32 %v4947_v32, %v7181_v58  ;;  %v7179_v18 = vand.u32 4294901760, %v4968_v2 }
  0x6c   :  { %1006 = vmatpush.msrb.mxu2 %v4962_v0  ;;  %1334 = vmatpush.msra.mxu0 %v4968_v2 }
  0x6d   :  { %v1190_v29 = vand.u32 4294901760, %v1189_v6  ;;  %v1195_v62 = vsub.f32 %v4968_v2, %v7179_v18  ;;  %v74_v6 = vld [vmem:[%s7167_s0 + $0x98] sm:$0xff]  ;;  %1457 = vmatpush.msra.mxu1 %v4962_v0 }
  0x6e   :  { %1008 = vmatpush.msrb.mxu2 %v4978_v20  ;;  %v5037_v18 = vand.u32 4294901760, %v74_v6 }
  0x6f   :  { %600 = vmatmul.f32.gmra.mxu2 %v4820_v54  ;;  %v4981_v54 = vsub.f32 %v78_v1, %v4962_v0  ;;  %v5022_v1 = vsub.f32 %v76_v23, %v4999_v45  ;;  %v1196_v12 = vand.u32 4294901760, %v1195_v62  ;;  %1191 = vmatpush.msrb.mxu3 %v1190_v29  ;;  %v5042_v62 = vsub.f32 %v75_v63, %v5019_v60  ;;  %v73_v29 = vld [vmem:[%s7167_s0 + $0x90] sm:$0xff] }
  0x70   :  { %1010 = vmatpush.msrb.mxu2 %v4999_v45  ;;  %v5052_v58 = vand.u32 4294901760, %v73_v29  ;;  %v5062_v63 = vsub.f32 %v49_v27, %v5026_v24  ;;  %1459 = vmatpush.msra.mxu1 %v4978_v20 }
  0x71   :  { %723 = vmatmul.f32.gmra.mxu3 %v289_v14  ;;  %v306_v14 = vsub.f32 %v4915_v39, %v7192_v41  ;;  %v7178_v38 = vand.u32 4294901760, %v4981_v54  ;;  %1337 = vmatpush.msra.mxu0 %v4981_v54 }
  0x72   :  { %1012 = vmatpush.msrb.mxu2 %v5019_v60  ;;  %1197 = vmatpush.msrb.mxu3 %v1196_v12  ;;  %v7186_v12 = vand.u32 4294901760, %v5042_v62  ;;  %v5076_v27 = vsub.f32 %v73_v29, %v5052_v58 }
  0x73   :  { %300 = vmatmul.f32.gmra.mxu0 %v299_v33  ;;  %477 = vmatmul.f32.gmra.mxu1 %v4816_v42  ;;  %v1201_v3 = vsub.f32 %v4981_v54, %v7178_v38  ;;  %v7180_v33 = vand.u32 4294901760, %v5002_v49  ;;  %v307_v35 = vand.u32 4294901760, %v306_v14  ;;  %v7182_v14 = vand.u32 4294901760, %v5022_v1 }
  0x74   :  { %1014 = vmatpush.msrb.mxu2 %v5037_v18  ;;  %v1219_v55 = vsub.f32 %v5042_v62, %v7186_v12  ;;  %1340 = vmatpush.msra.mxu0 %v5002_v49 }
  0x75   :  { %v5004_v50 = vpop.permute.xlu0 %180  ;;  %v1202_v38 = vand.u32 4294901760, %v1201_v3  ;;  %v1207_v23 = vsub.f32 %v5002_v49, %v7180_v33  ;;  %v1213_v33 = vsub.f32 %v5022_v1, %v7182_v14  ;;  %1461 = vmatpush.msra.mxu1 %v4999_v45 }
  0x76   :  { %7240 = vst [vmem:[#allocation2_spill] sm:$0xff] %v5004_v50  ;;  %1016 = vmatpush.msrb.mxu2 %v5052_v58  ;;  %v1220_v34 = vand.u32 4294901760, %v1219_v55  ;;  %1343 = vmatpush.msra.mxu0 %v5022_v1  ;;  %v7242_v50 = vand.u32 4294901760, %v4915_v39  ;;  %v7243_v55 = vand.u32 4294901760, %v4840_v57 }
  0x77   :  { %605 = vmatmul.f32.gmra.mxu2 %v4848_v59  ;;  %v1208_v3 = vand.u32 4294901760, %v1207_v23  ;;  %v5055_v59 = vsub.f32 %v74_v6, %v5037_v18  ;;  %v72_v23 = vld [vmem:[%s7167_s0 + $0x88] sm:$0xff]  ;;  %v51_v6 = vld [vmem:[%s7169_s1 + $0xe0] sm:$0xff]  ;;  %1203 = vmatpush.msrb.mxu3 %v1202_v38 }
  0x78   :  { %v5073_v8 = vand.u32 4294901760, %v72_v23  ;;  %v5100_v4 = vand.u32 4294901760, %v51_v6  ;;  %1346 = vmatpush.msra.mxu0 %v5042_v62  ;;  %1463 = vmatpush.msra.mxu1 %v5019_v60 }
  0x79   :  { %729 = vmatmul.f32.gmra.mxu3 %v297_v17  ;;  %v314_v17 = vsub.f32 %v4988_v11, %v7185_v19  ;;  %v7191_v14 = vand.u32 4294901760, %v5055_v59  ;;  %v71_v19 = vld [vmem:[%s7167_s0 + $0x80] sm:$0xff] }
  0x7a   :  { %1209 = vmatpush.msrb.mxu3 %v1208_v3  ;;  %1018 = vmatpush.msrb.mxu2 %v5073_v8  ;;  %v5091_v29 = vand.u32 4294901760, %v71_v19  ;;  %v5094_v12 = vsub.f32 %v72_v23, %v5073_v8  ;;  %v321_v3 = vand.u32 4294901760, %v5062_v63  ;;  %v5125_v57 = vsub.f32 %v51_v6, %v5100_v4 }
  0x7b   :  { %308 = vmatmul.f32.gmra.mxu0 %v307_v35  ;;  %481 = vmatmul.f32.gmra.mxu1 %v4826_v51  ;;  %v1214_v35 = vand.u32 4294901760, %v1213_v33  ;;  %v1225_v38 = vsub.f32 %v5055_v59, %v7191_v14  ;;  %v7193_v33 = vand.u32 4294901760, %v5076_v27  ;;  %v315_v44 = vand.u32 4294901760, %v314_v17 }
  0x7c   :  { %1020 = vmatpush.msrb.mxu2 %v5091_v29  ;;  %v1236_v23 = vand.u32 4294901760, %v5094_v12  ;;  %v5109_v17 = vsub.f32 %v71_v19, %v5091_v29  ;;  %v7244_v19 = vand.u32 4294901760, %v4861_v15  ;;  %1349 = vmatpush.msra.mxu0 %v5055_v59  ;;  %v7245_v6 = vand.u32 4294901760, %v4876_v16 }
  0x7d   :  { %v5097_v25 = vpop.permute.xlu0 %175  ;;  %1215 = vmatpush.msrb.mxu3 %v1214_v35  ;;  %v1226_v14 = vand.u32 4294901760, %v1225_v38  ;;  %v1231_v41 = vsub.f32 %v5076_v27, %v7193_v33  ;;  %v7246_v15 = vand.u32 4294901760, %v4895_v26  ;;  %v7248_v16 = vand.u32 4294901760, %v4908_v37  ;;  %1465 = vmatpush.msra.mxu1 %v5037_v18 }
  0x7e   :  { %7241 = vst [vmem:[#allocation3_spill] sm:$0xff] %v5097_v25  ;;  %1572 = vmatpush.msra.mxu2 %v7243_v55  ;;  %v1237_v38 = vsub.f32 %v5094_v12, %v1236_v23  ;;  %v1242_v33 = vand.u32 4294901760, %v5109_v17  ;;  %v329_v55 = vand.u32 4294901760, %v5125_v57  ;;  %1352 = vmatpush.msra.mxu0 %v5076_v27  ;;  %v7250_v37 = vand.u32 4294901760, %v4947_v32 }
  0x7f   :  { %610 = vmatmul.f32.gmra.mxu2 %v4915_v39  ;;  %1221 = vmatpush.msrb.mxu3 %v1220_v34  ;;  %v1232_v35 = vand.u32 4294901760, %v1231_v41  ;;  %v322_v39 = vsub.f32 %v5062_v63, %v321_v3  ;;  %v53_v34 = vld [vmem:[%s7169_s1 + $0xf0] sm:$0xff] }
  0x80   :  { %v1238_v41 = vand.u32 4294901760, %v1237_v38  ;;  %1576 = vmatpush.msra.mxu2 %v7244_v19  ;;  %v5141_v38 = vand.u32 4294901760, %v53_v34  ;;  %v7247_v19 = vand.u32 4294901760, %v4988_v11  ;;  %1355 = vmatpush.msra.mxu0 %v5094_v12 }
  0x81   :  { %735 = vmatmul.f32.gmra.mxu3 %v7242_v50  ;;  %v5115_v25 = vpop.permute.xlu2 %160  ;;  %v1243_v50 = vsub.f32 %v5109_v17, %v1242_v33  ;;  %1467 = vmatpush.msra.mxu1 %v5052_v58 }
  0x82   :  { %1227 = vmatpush.msrb.mxu3 %v1226_v14  ;;  %1580 = vmatpush.msra.mxu2 %v7245_v6  ;;  %v323_v14 = vand.u32 4294901760, %v322_v39  ;;  %v330_v39 = vsub.f32 %v5125_v57, %v329_v55 }
  0x83   :  { %316 = vmatmul.f32.gmra.mxu0 %v315_v44  ;;  %485 = vmatmul.f32.gmra.mxu1 %v4880_v10  ;;  %v1244_v44 = vand.u32 4294901760, %v1243_v50  ;;  %v5161_v50 = vpop.permute.xlu1 %170 }
  0x84   :  { %1233 = vmatpush.msrb.mxu3 %v1232_v35  ;;  %1584 = vmatpush.msra.mxu2 %v7246_v15 }
  0x85   :  { %1358 = vmatpush.msra.mxu0 %v5109_v17  ;;  %1469 = vmatpush.msra.mxu1 %v5073_v8 }
  0x86   :  { %1239 = vmatpush.msrb.mxu3 %v1238_v41  ;;  %1588 = vmatpush.msra.mxu2 %v7248_v16  ;;  %v336_v41 = vsub.f32 %v53_v34, %v5141_v38  ;;  %v331_v34 = vand.u32 4294901760, %v330_v39 }
  0x87   :  { %615 = vmatmul.f32.gmra.mxu2 %v4988_v11  ;;  %v7249_v11 = vand.u32 4294901760, %v4929_v61  ;;  %v7251_v61 = vand.u32 4294901760, %v4968_v2  ;;  %1471 = vmatpush.msra.mxu1 %v5091_v29 }
  0x88   :  { %1245 = vmatpush.msrb.mxu3 %v1244_v44  ;;  %v337_v44 = vand.u32 4294901760, %v336_v41 }
  0x89   :  { %741 = vmatmul.f32.gmra.mxu3 %v7247_v19  ;;  %v5148_v35 = vpop.permute.xlu0 %150  ;;  %v5156_v26 = vpop.permute.xlu2 %155  ;;  %1592 = vmatpush.msra.mxu2 %v7249_v11 }
  0x8a   :  { %1699 = vmatpush.msra.mxu3 %v4831_v36  ;;  %v24_v36 = vld [vmem:[%s7169_s1 + $0x8] sm:$0xff] }
  0x8b   :  { %324 = vmatmul.f32.gmra.mxu0 %v323_v14  ;;  %489 = vmatmul.f32.gmra.mxu1 %v4951_v43  ;;  %v5183_v6 = vand.u32 4294901760, %v24_v36 }
  0x8c   :  { %1701 = vmatpush.msra.mxu3 %v4837_v48  ;;  %1596 = vmatpush.msra.mxu2 %v7250_v37  ;;  %v7252_v48 = vand.u32 4294901760, %v4981_v54 }
  0x8d   :  { %v5198_v14 = vsub.f32 %v24_v36, %v5183_v6 }
  0x8e   :  { %1703 = vmatpush.msra.mxu3 %v4858_v46  ;;  %1600 = vmatpush.msra.mxu2 %v7251_v61  ;;  %v7253_v46 = vand.u32 4294901760, %v5002_v49  ;;  %v7256_v49 = vand.u32 4294901760, %v5055_v59 }
  0x8f   :  { %620 = vmatmul.f32.gmra.mxu2 %v5062_v63  ;;  %v338_v63 = vsub.f32 %v336_v41, %v337_v44 }
  0x90   :  { %1705 = vmatpush.msra.mxu3 %v4873_v5  ;;  %1604 = vmatpush.msra.mxu2 %v7252_v48  ;;  %v7254_v5 = vand.u32 4294901760, %v5022_v1 }
  0x91   :  { %747 = vmatmul.f32.gmra.mxu3 %v321_v3  ;;  %v5189_v2 = vpop.permute.xlu2 %140  ;;  %v339_v54 = vand.u32 4294901760, %v338_v63 }
  0x92   :  { %1707 = vmatpush.msra.mxu3 %v4891_v21  ;;  %1608 = vmatpush.msra.mxu2 %v7253_v46  ;;  %v26_v21 = vld [vmem:[%s7169_s1 + $0x18] sm:$0xff] }
  0x93   :  { %332 = vmatmul.f32.gmra.mxu0 %v331_v34  ;;  %493 = vmatmul.f32.gmra.mxu1 %v5026_v24  ;;  %v5181_v32 = vpop.permute.xlu0 %135  ;;  %v5215_v15 = vand.u32 4294901760, %v26_v21 }
  0x94   :  { %1709 = vmatpush.msra.mxu3 %v4905_v30  ;;  %1612 = vmatpush.msra.mxu2 %v7254_v5  ;;  %v7255_v30 = vand.u32 4294901760, %v5042_v62 }
  0x95   :  { %v5230_v59 = vsub.f32 %v26_v21, %v5215_v15 }
  0x96   :  { %1711 = vmatpush.msra.mxu3 %v4926_v56  ;;  %1616 = vmatpush.msra.mxu2 %v7255_v30  ;;  %v7257_v56 = vand.u32 4294901760, %v5076_v27 }
  0x97   :  { %625 = vmatmul.f32.gmra.mxu2 %v5125_v57  ;;  %v5195_v3 = vpop.permute.xlu1 %165  ;;  %v1023_v57 = vand.u32 4294901760, %v5198_v14 }
  0x98   :  { %1713 = vmatpush.msra.mxu3 %v4944_v13  ;;  %1620 = vmatpush.msra.mxu2 %v7256_v49 }
  0x99   :  { %753 = vmatmul.f32.gmra.mxu3 %v329_v55  ;;  %v1024_v62 = vsub.f32 %v5198_v14, %v1023_v57  ;;  %v5232_v27 = vpop.permute.xlu2 %125  ;;  %v7208_v55 = vand.u32 4294901760, %v5230_v59 }
  0x9a   :  { %1715 = vmatpush.msra.mxu3 %v4962_v0  ;;  %1624 = vmatpush.msra.mxu2 %v7257_v56 }
  0x9b   :  { %340 = vmatmul.f32.gmra.mxu0 %v339_v54  ;;  %497 = vmatmul.f32.gmra.mxu1 %v5100_v4  ;;  %v5212_v1 = vpop.permute.xlu0 %120 }
  0x9c   :  { %1717 = vmatpush.msra.mxu3 %v4978_v20  ;;  %1628 = vmatpush.msra.mxu2 %v1236_v23  ;;  %v28_v20 = vld [vmem:[%s7169_s1 + $0x28] sm:$0xff]  ;;  %v1025_v23 = vand.u32 4294901760, %v1024_v62 }
  0x9d   :  { %v5244_v19 = vand.u32 4294901760, %v28_v20 }
  0x9e   :  { %1719 = vmatpush.msra.mxu3 %v4999_v45  ;;  %1632 = vmatpush.msra.mxu2 %v1242_v33 }
  0x9f   :  { %630 = vmatmul.f32.gmra.mxu2 %v336_v41  ;;  %v5224_v13 = vpop.permute.xlu1 %145  ;;  %v5254_v33 = vsub.f32 %v28_v20, %v5244_v19  ;;  %v30_v41 = vld [vmem:[%s7169_s1 + $0x38] sm:$0xff] }
  0xa0   :  { %v221_v0 = vpop.f32.mrf.mxu0  ;;  %1721 = vmatpush.msra.mxu3 %v5019_v60  ;;  %v1032_v60 = vsub.f32 %v5230_v59, %v7208_v55  ;;  %v5265_v36 = vand.u32 4294901760, %v30_v41 }
  0xa1   :  { %759 = vmatmul.f32.gmra.mxu3 %v337_v44  ;;  %v111_v11 = vpop.permute.xlu2 %110  ;;  %v7205_v44 = vand.u32 4294901760, %v5254_v33 }
  0xa2   :  { %1723 = vmatpush.msra.mxu3 %v5037_v18  ;;  %v1033_v34 = vand.u32 4294901760, %v1032_v60 }
  0xa3   :  { %501 = vmatmul.f32.gmra.mxu1 %v5141_v38  ;;  %828 = vmatmul.f32.vlgmr.msrb.gmra.mxu0 %v4574_v9  ;;  %v106_v12 = vpop.permute.xlu0 %105  ;;  %v1040_v63 = vsub.f32 %v5254_v33, %v7205_v44 }
  0xa4   :  { %v222_v16 = vadd.f32 %v221_v0, %v106_v12  ;;  %1725 = vmatpush.msra.mxu3 %v5052_v58 }
  0xa5   :  { %v1041_v56 = vand.u32 4294901760, %v1040_v63 }
  0xa6   :  { %1727 = vmatpush.msra.mxu3 %v5073_v8 }
  0xa7   :  { %1026 = vmatmul.f32.vlgmr.msrb.gmra.mxu2 %v1025_v23  ;;  %v5248_v45 = vpop.permute.xlu1 %130 }
  0xa8   :  { %v229_v17 = vpop.f32.mrf.mxu0  ;;  %v442_v39 = vpop.f32.mrf.mxu1  ;;  %1729 = vmatpush.msra.mxu3 %v5091_v29  ;;  %v5273_v29 = vsub.f32 %v30_v41, %v5265_v36 }
  0xa9   :  { %v443_v18 = vadd.f32 %v442_v39, %v222_v16  ;;  %1247 = vmatmul.f32.vlgmr.msrb.gmra.mxu3 %v5183_v6  ;;  %v230_v8 = vadd.f32 %v229_v17, %v111_v11 }
  0xaa   :  { %v556_v58 = vpop.f32.mrf.mxu2  ;;  %v7204_v62 = vand.u32 4294901760, %v5273_v29 }
  0xab   :  { %v557_v37 = vadd.f32 %v556_v58, %v443_v18  ;;  %832 = vmatmul.f32.gmra.mxu0 %v4614_v47  ;;  %925 = vmatmul.f32.vlgmr.msrb.gmra.mxu1 %v4574_v9  ;;  %v32_v9 = vld [vmem:[%s7169_s1 + $0x48] sm:$0xff] }
  0xac   :  { %v670_v61 = vpop.f32.mrf.mxu3  ;;  %v5282_v0 = vand.u32 4294901760, %v32_v9  ;;  %v1048_v16 = vsub.f32 %v5273_v29, %v7204_v62 }
  0xad   :  { %v5267_v48 = vadd.f32 %v670_v61, %v557_v37 }
  0xae   :  { %v5290_v60 = vsub.f32 %v32_v9, %v5282_v0  ;;  %v1049_v11 = vand.u32 4294901760, %v1048_v16 }
  0xaf   :  { %1034 = vmatmul.f32.gmra.mxu2 %v1033_v34  ;;  %v116_v30 = vpop.permute.xlu1 %115 }
  0xb0   :  { %v237_v46 = vpop.f32.mrf.mxu0  ;;  %v446_v5 = vpop.f32.mrf.mxu1  ;;  %v7202_v37 = vand.u32 4294901760, %v5290_v60 }
  0xb1   :  { %v447_v54 = vadd.f32 %v446_v5, %v230_v8  ;;  %1251 = vmatmul.f32.gmra.mxu3 %v5215_v15  ;;  %v238_v23 = vadd.f32 %v237_v46, %v116_v30 }
  0xb2   :  { %v561_v21 = vpop.f32.mrf.mxu2  ;;  %v1056_v46 = vsub.f32 %v5290_v60, %v7202_v37 }
  0xb3   :  { %v562_v49 = vadd.f32 %v561_v21, %v447_v54  ;;  %836 = vmatmul.f32.gmra.mxu0 %v4663_v53  ;;  %929 = vmatmul.f32.gmra.mxu1 %v4614_v47  ;;  %v34_v47 = vld [vmem:[%s7169_s1 + $0x58] sm:$0xff]  ;;  %v36_v54 = vld [vmem:[%s7169_s1 + $0x68] sm:$0xff] }
  0xb4   :  { %v676_v20 = vpop.f32.mrf.mxu3  ;;  %v5299_v34 = vand.u32 4294901760, %v34_v47 }
  0xb5   :  { %v5284_v12 = vadd.f32 %v676_v20, %v562_v49  ;;  %v1057_v49 = vand.u32 4294901760, %v1056_v46  ;;  %v5317_v20 = vand.u32 4294901760, %v36_v54 }
  0xb6   :  { %v5308_v5 = vsub.f32 %v34_v47, %v5299_v34 }
  0xb7   :  { %1042 = vmatmul.f32.gmra.mxu2 %v1041_v56  ;;  %v5326_v47 = vsub.f32 %v36_v54, %v5317_v20 }
  0xb8   :  { %v245_v17 = vpop.f32.mrf.mxu0  ;;  %v450_v39 = vpop.f32.mrf.mxu1  ;;  %v7200_v56 = vand.u32 4294901760, %v5308_v5 }
  0xb9   :  { %v451_v41 = vadd.f32 %v450_v39, %v238_v23  ;;  %1255 = vmatmul.f32.gmra.mxu3 %v5244_v19  ;;  %v246_v8 = vadd.f32 %v245_v17, %v5212_v1 }
  0xba   :  { %v566_v18 = vpop.f32.mrf.mxu2  ;;  %v1064_v39 = vsub.f32 %v5308_v5, %v7200_v56 }
  0xbb   :  { %v567_v58 = vadd.f32 %v566_v18, %v451_v41  ;;  %840 = vmatmul.f32.gmra.mxu0 %v4696_v40  ;;  %933 = vmatmul.f32.gmra.mxu1 %v4663_v53  ;;  %v38_v18 = vld [vmem:[%s7169_s1 + $0x78] sm:$0xff] }
  0xbc   :  { %v682_v61 = vpop.f32.mrf.mxu3  ;;  %v5335_v46 = vand.u32 4294901760, %v38_v18 }
  0xbd   :  { %v5302_v63 = vadd.f32 %v682_v61, %v567_v58  ;;  %v1065_v61 = vand.u32 4294901760, %v1064_v39 }
  0xbf   :  { %1050 = vmatmul.f32.gmra.mxu2 %v1049_v11 }
  0xc0   :  { %v253_v9 = vpop.f32.mrf.mxu0  ;;  %v454_v53 = vpop.f32.mrf.mxu1 }
  0xc1   :  { %v455_v21 = vadd.f32 %v454_v53, %v246_v8  ;;  %1259 = vmatmul.f32.gmra.mxu3 %v5265_v36  ;;  %v254_v16 = vadd.f32 %v253_v9, %v5232_v27  ;;  %v7198_v8 = vand.u32 4294901760, %v5326_v47 }
  0xc2   :  { %v571_v1 = vpop.f32.mrf.mxu2 }
  0xc3   :  { %v572_v30 = vadd.f32 %v571_v1, %v455_v21  ;;  %844 = vmatmul.f32.gmra.mxu0 %v4725_v31  ;;  %937 = vmatmul.f32.gmra.mxu1 %v4696_v40  ;;  %v1072_v21 = vsub.f32 %v5326_v47, %v7198_v8  ;;  %v5344_v1 = vsub.f32 %v38_v18, %v5335_v46 }
  0xc4   :  { %v688_v23 = vpop.f32.mrf.mxu3 }
  0xc5   :  { %v5320_v17 = vadd.f32 %v688_v23, %v572_v30  ;;  %v1073_v39 = vand.u32 4294901760, %v1072_v21 }
  0xc7   :  { %1058 = vmatmul.f32.gmra.mxu2 %v1057_v49  ;;  %v40_v49 = vld [vmem:[%s7169_s1 + $0x88] sm:$0xff] }
  0xc8   :  { %v261_v41 = vpop.f32.mrf.mxu0  ;;  %v458_v40 = vpop.f32.mrf.mxu1 }
  0xc9   :  { %v459_v58 = vadd.f32 %v458_v40, %v254_v16  ;;  %1263 = vmatmul.f32.gmra.mxu3 %v5282_v0  ;;  %v262_v53 = vadd.f32 %v261_v41, %v5248_v45  ;;  %v7196_v41 = vand.u32 4294901760, %v5344_v1  ;;  %v5353_v40 = vand.u32 4294901760, %v40_v49 }
  0xca   :  { %v576_v27 = vpop.f32.mrf.mxu2 }
  0xcb   :  { %v577_v11 = vadd.f32 %v576_v27, %v459_v58  ;;  %848 = vmatmul.f32.gmra.mxu0 %v4751_v22  ;;  %941 = vmatmul.f32.gmra.mxu1 %v4725_v31 }
  0xcc   :  { %v694_v9 = vpop.f32.mrf.mxu3 }
  0xcd   :  { %v5338_v54 = vadd.f32 %v694_v9, %v577_v11  ;;  %v1080_v11 = vsub.f32 %v5344_v1, %v7196_v41 }
  0xcf   :  { %1066 = vmatmul.f32.gmra.mxu2 %v1065_v61  ;;  %v5362_v61 = vsub.f32 %v40_v49, %v5353_v40 }
  0xd0   :  { %v269_v30 = vpop.f32.mrf.mxu0  ;;  %v462_v31 = vpop.f32.mrf.mxu1 }
  0xd1   :  { %v463_v23 = vadd.f32 %v462_v31, %v262_v53  ;;  %1267 = vmatmul.f32.gmra.mxu3 %v5299_v34  ;;  %v270_v58 = vadd.f32 %v269_v30, %v5181_v32  ;;  %v42_v53 = vld [vmem:[%s7169_s1 + $0x98] sm:$0xff]  ;;  %v1081_v31 = vand.u32 4294901760, %v1080_v11  ;;  %v44_v11 = vld [vmem:[%s7169_s1 + $0xa8] sm:$0xff] }
  0xd2   :  { %v581_v45 = vpop.f32.mrf.mxu2  ;;  %v5371_v49 = vand.u32 4294901760, %v42_v53 }
  0xd3   :  { %v582_v16 = vadd.f32 %v581_v45, %v463_v23  ;;  %852 = vmatmul.f32.gmra.mxu0 %v4776_v28  ;;  %945 = vmatmul.f32.gmra.mxu1 %v4751_v22  ;;  %v7194_v23 = vand.u32 4294901760, %v5362_v61 }
  0xd4   :  { %v700_v18 = vpop.f32.mrf.mxu3 }
  0xd5   :  { %v5356_v27 = vadd.f32 %v700_v18, %v582_v16  ;;  %v1088_v18 = vsub.f32 %v5362_v61, %v7194_v23 }
  0xd7   :  { %1074 = vmatmul.f32.gmra.mxu2 %v1073_v39 }
  0xd8   :  { %v277_v9 = vpop.f32.mrf.mxu0  ;;  %v466_v22 = vpop.f32.mrf.mxu1 }
  0xd9   :  { %v467_v21 = vadd.f32 %v466_v22, %v270_v58  ;;  %1271 = vmatmul.f32.gmra.mxu3 %v5317_v20  ;;  %v278_v16 = vadd.f32 %v277_v9, %v5189_v2  ;;  %v5380_v58 = vsub.f32 %v42_v53, %v5371_v49  ;;  %v5389_v53 = vand.u32 4294901760, %v44_v11 }
  0xda   :  { %v586_v32 = vpop.f32.mrf.mxu2 }
  0xdb   :  { %v587_v30 = vadd.f32 %v586_v32, %v467_v21  ;;  %856 = vmatmul.f32.gmra.mxu0 %v4798_v52  ;;  %949 = vmatmul.f32.gmra.mxu1 %v4776_v28  ;;  %v1089_v32 = vand.u32 4294901760, %v1088_v18  ;;  %v46_v18 = vld [vmem:[%s7169_s1 + $0xb8] sm:$0xff] }
  0xdc   :  { %v706_v45 = vpop.f32.mrf.mxu3 }
  0xdd   :  { %v5374_v39 = vadd.f32 %v706_v45, %v587_v30  ;;  %v7195_v30 = vand.u32 4294901760, %v5380_v58 }
  0xdf   :  { %1082 = vmatmul.f32.gmra.mxu2 %v1081_v31 }
  0xe0   :  { %v285_v22 = vpop.f32.mrf.mxu0  ;;  %v470_v28 = vpop.f32.mrf.mxu1 }
  0xe1   :  { %v471_v21 = vadd.f32 %v470_v28, %v278_v16  ;;  %1275 = vmatmul.f32.gmra.mxu3 %v5335_v46  ;;  %v286_v45 = vadd.f32 %v285_v22, %v5224_v13  ;;  %v1096_v16 = vsub.f32 %v5380_v58, %v7195_v30  ;;  %v5398_v28 = vsub.f32 %v44_v11, %v5389_v53 }
  0xe2   :  { %v591_v2 = vpop.f32.mrf.mxu2  ;;  %v5407_v11 = vand.u32 4294901760, %v46_v18 }
  0xe3   :  { %v592_v9 = vadd.f32 %v591_v2, %v471_v21  ;;  %860 = vmatmul.f32.gmra.mxu0 %v4809_v7  ;;  %953 = vmatmul.f32.gmra.mxu1 %v4798_v52 }
  0xe4   :  { %v712_v31 = vpop.f32.mrf.mxu3 }
  0xe5   :  { %v5392_v23 = vadd.f32 %v712_v31, %v592_v9  ;;  %v1097_v9 = vand.u32 4294901760, %v1096_v16  ;;  %v48_v16 = vld [vmem:[%s7169_s1 + $0xc8] sm:$0xff] }
  0xe7   :  { %1090 = vmatmul.f32.gmra.mxu2 %v1089_v32  ;;  %v7197_v32 = vand.u32 4294901760, %v5398_v28 }
  0xe8   :  { %v293_v21 = vpop.f32.mrf.mxu0  ;;  %v474_v52 = vpop.f32.mrf.mxu1 }
  0xe9   :  { %v475_v2 = vadd.f32 %v474_v52, %v286_v45  ;;  %1279 = vmatmul.f32.gmra.mxu3 %v5353_v40  ;;  %v294_v30 = vadd.f32 %v293_v21, %v5148_v35  ;;  %v1104_v45 = vsub.f32 %v5398_v28, %v7197_v32  ;;  %v5416_v52 = vsub.f32 %v46_v18, %v5407_v11 }
  0xea   :  { %v596_v13 = vpop.f32.mrf.mxu2  ;;  %v5425_v18 = vand.u32 4294901760, %v48_v16 }
  0xeb   :  { %v597_v22 = vadd.f32 %v596_v13, %v475_v2  ;;  %864 = vmatmul.f32.gmra.mxu0 %v4816_v42  ;;  %957 = vmatmul.f32.gmra.mxu1 %v4809_v7 }
  0xec   :  { %v718_v31 = vpop.f32.mrf.mxu3 }
  0xed   :  { %v5410_v41 = vadd.f32 %v718_v31, %v597_v22  ;;  %v1105_v22 = vand.u32 4294901760, %v1104_v45  ;;  %v50_v45 = vld [vmem:[%s7169_s1 + $0xd8] sm:$0xff] }
  0xef   :  { %1098 = vmatmul.f32.gmra.mxu2 %v1097_v9  ;;  %v7199_v9 = vand.u32 4294901760, %v5416_v52 }
  0xf0   :  { %v301_v2 = vpop.f32.mrf.mxu0  ;;  %v478_v7 = vpop.f32.mrf.mxu1 }
  0xf1   :  { %v479_v13 = vadd.f32 %v478_v7, %v294_v30  ;;  %1283 = vmatmul.f32.gmra.mxu3 %v5371_v49  ;;  %v302_v32 = vadd.f32 %v301_v2, %v5156_v26  ;;  %v1112_v30 = vsub.f32 %v5416_v52, %v7199_v9  ;;  %v5434_v7 = vsub.f32 %v48_v16, %v5425_v18 }
  0xf2   :  { %v601_v35 = vpop.f32.mrf.mxu2  ;;  %v5443_v16 = vand.u32 4294901760, %v50_v45 }
  0xf3   :  { %v602_v21 = vadd.f32 %v601_v35, %v479_v13  ;;  %868 = vmatmul.f32.gmra.mxu0 %v4826_v51  ;;  %961 = vmatmul.f32.gmra.mxu1 %v4816_v42 }
  0xf4   :  { %v724_v31 = vpop.f32.mrf.mxu3 }
  0xf5   :  { %v5428_v8 = vadd.f32 %v724_v31, %v602_v21  ;;  %v1113_v21 = vand.u32 4294901760, %v1112_v30  ;;  %v52_v30 = vld [vmem:[%s7169_s1 + $0xe8] sm:$0xff] }
  0xf7   :  { %1106 = vmatmul.f32.gmra.mxu2 %v1105_v22  ;;  %v7201_v22 = vand.u32 4294901760, %v5434_v7 }
  0xf8   :  { %v309_v13 = vpop.f32.mrf.mxu0  ;;  %v482_v42 = vpop.f32.mrf.mxu1 }
  0xf9   :  { %v483_v35 = vadd.f32 %v482_v42, %v302_v32  ;;  %1287 = vmatmul.f32.gmra.mxu3 %v5389_v53  ;;  %v310_v9 = vadd.f32 %v309_v13, %v5115_v25  ;;  %v1120_v32 = vsub.f32 %v5434_v7, %v7201_v22  ;;  %v5452_v42 = vsub.f32 %v50_v45, %v5443_v16 }
  0xfa   :  { %v606_v26 = vpop.f32.mrf.mxu2  ;;  %v5461_v45 = vand.u32 4294901760, %v52_v30 }
  0xfb   :  { %v607_v2 = vadd.f32 %v606_v26, %v483_v35  ;;  %872 = vmatmul.f32.gmra.mxu0 %v4880_v10  ;;  %965 = vmatmul.f32.gmra.mxu1 %v4826_v51 }
  0xfc   :  { %v730_v31 = vpop.f32.mrf.mxu3 }
  0xfd   :  { %v5446_v56 = vadd.f32 %v730_v31, %v607_v2  ;;  %v1121_v2 = vand.u32 4294901760, %v1120_v32  ;;  %v54_v32 = vld [vmem:[%s7169_s1 + $0xf8] sm:$0xff]  ;;  %s4362_s1 = smov 103  }
  0xff   :  { %1114 = vmatmul.f32.gmra.mxu2 %v1113_v21  ;;  %v7203_v21 = vand.u32 4294901760, %v5452_v42 }
 0x100   :  { %v317_v35 = vpop.f32.mrf.mxu0  ;;  %v486_v51 = vpop.f32.mrf.mxu1 }
 0x101   :  { %v487_v26 = vadd.f32 %v486_v51, %v310_v9  ;;  %1291 = vmatmul.f32.gmra.mxu3 %v5407_v11  ;;  %v318_v22 = vadd.f32 %v317_v35, %v5195_v3  ;;  %v1128_v9 = vsub.f32 %v5452_v42, %v7203_v21  ;;  %v5470_v51 = vsub.f32 %v52_v30, %v5461_v45 }
 0x102   :  { %v611_v25 = vpop.f32.mrf.mxu2  ;;  %v5479_v30 = vand.u32 4294901760, %v54_v32 }
 0x103   :  { %v612_v13 = vadd.f32 %v611_v25, %v487_v26  ;;  %876 = vmatmul.f32.gmra.mxu0 %v4951_v43  ;;  %969 = vmatmul.f32.gmra.mxu1 %v4880_v10 }
 0x104   :  { %v736_v31 = vpop.f32.mrf.mxu3 }
 0x105   :  { %v5464_v37 = vadd.f32 %v736_v31, %v612_v13  ;;  %v1129_v13 = vand.u32 4294901760, %v1128_v9 }
 0x107   :  { %1122 = vmatmul.f32.gmra.mxu2 %v1121_v2  ;;  %v7206_v2 = vand.u32 4294901760, %v5470_v51 }
 0x108   :  { %v325_v26 = vpop.f32.mrf.mxu0  ;;  %v490_v10 = vpop.f32.mrf.mxu1 }
 0x109   :  { %v491_v25 = vadd.f32 %v490_v10, %v318_v22  ;;  %1295 = vmatmul.f32.gmra.mxu3 %v5425_v18  ;;  %v326_v21 = vadd.f32 %v325_v26, %v5161_v50  ;;  %v1136_v22 = vsub.f32 %v5470_v51, %v7206_v2  ;;  %v5488_v10 = vsub.f32 %v54_v32, %v5479_v30 }
 0x10a   :  { %v616_v3 = vpop.f32.mrf.mxu2 }
 0x10b   :  { %v617_v35 = vadd.f32 %v616_v3, %v491_v25  ;;  %880 = vmatmul.f32.gmra.mxu0 %v5026_v24  ;;  %973 = vmatmul.f32.gmra.mxu1 %v4951_v43  ;;  %v1137_v50 = vand.u32 4294901760, %v1136_v22  ;;  %v7207_v26 = vand.u32 4294901760, %v5488_v10 }
 0x10c   :  { %v742_v31 = vpop.f32.mrf.mxu3 }
 0x10d   :  { %v5482_v62 = vadd.f32 %v742_v31, %v617_v35 }
 0x10f   :  { %1130 = vmatmul.f32.gmra.mxu2 %v1129_v13  ;;  %v7258_v13 = vld [vmem:[#allocation3_spill] sm:$0xff] }
 0x110   :  { %v333_v25 = vpop.f32.mrf.mxu0  ;;  %v494_v43 = vpop.f32.mrf.mxu1 }
 0x111   :  { %v495_v9 = vadd.f32 %v494_v43, %v326_v21  ;;  %1299 = vmatmul.f32.gmra.mxu3 %v5443_v16  ;;  %v334_v31 = vadd.f32 %v333_v25, %v7258_v13  ;;  %v1144_v21 = vsub.f32 %v5488_v10, %v7207_v26 }
 0x112   :  { %v621_v3 = vpop.f32.mrf.mxu2 }
 0x113   :  { %v622_v44 = vadd.f32 %v621_v3, %v495_v9  ;;  %884 = vmatmul.f32.gmra.mxu0 %v5100_v4  ;;  %977 = vmatmul.f32.gmra.mxu1 %v5026_v24  ;;  %v1145_v22 = vand.u32 4294901760, %v1144_v21 }
 0x114   :  { %v748_v35 = vpop.f32.mrf.mxu3 }
 0x115   :  { %v5495_v2 = vadd.f32 %v748_v35, %v622_v44  ;;  %v7259_v44 = vld [vmem:[#allocation2_spill] sm:$0xff] }
 0x117   :  { %1138 = vmatmul.f32.gmra.mxu2 %v1137_v50 }
 0x118   :  { %v341_v32 = vpop.f32.mrf.mxu0  ;;  %v498_v43 = vpop.f32.mrf.mxu1 }
 0x119   :  { %v499_v9 = vadd.f32 %v498_v43, %v334_v31  ;;  %1303 = vmatmul.f32.gmra.mxu3 %v5461_v45  ;;  %v342_v35 = vadd.f32 %v341_v32, %v7259_v44 }
 0x11a   :  { %v626_v3 = vpop.f32.mrf.mxu2 }
 0x11b   :  { %v627_v24 = vadd.f32 %v626_v3, %v499_v9  ;;  %888 = vmatmul.f32.gmra.mxu0 %v5141_v38  ;;  %981 = vmatmul.f32.gmra.mxu1 %v5100_v4 }
 0x11c   :  { %v754_v25 = vpop.f32.mrf.mxu3 }
 0x11d   :  { %v5504_v50 = vadd.f32 %v754_v25, %v627_v24 }
 0x11f   :  { %1146 = vmatmul.f32.gmra.mxu2 %v1145_v22 }
 0x120   :  { %v502_v13 = vpop.f32.mrf.mxu1  ;;  %v829_v26 = vpop.f32.mrf.mxu0 }
 0x121   :  { %v503_v55 = vadd.f32 %v502_v13, %v342_v35  ;;  %1307 = vmatmul.f32.gmra.mxu3 %v5479_v30  ;;  %v830_v21 = vadd.f32 %v829_v26, %v5267_v48 }
 0x122   :  { %v631_v31 = vpop.f32.mrf.mxu2 }
 0x123   :  { %v632_v43 = vadd.f32 %v631_v31, %v503_v55  ;;  %985 = vmatmul.f32.gmra.mxu1 %v5141_v38  ;;  %1361 = vmatmul.f32.vlgmr.msra.gmra.mxu0 %v5198_v14  ;;  %v7261_v31 = vand.u32 4294901760, %v5230_v59 }
 0x124   :  { %v760_v9 = vpop.f32.mrf.mxu3 }
 0x125   :  { %v5509_v4 = vadd.f32 %v760_v9, %v632_v43 }
 0x127   :  { %1634 = vmatmul.f32.vlgmr.msra.gmra.mxu2 %v5183_v6 }
 0x128   :  { %v833_v32 = vpop.f32.mrf.mxu0  ;;  %v926_v3 = vpop.f32.mrf.mxu1 }
 0x129   :  { %v927_v24 = vadd.f32 %v926_v3, %v830_v21  ;;  %1731 = vmatmul.f32.vlgmr.msra.gmra.mxu3 %v5183_v6  ;;  %v834_v44 = vadd.f32 %v833_v32, %v5284_v12  ;;  %v7262_v3 = vand.u32 4294901760, %v5254_v33 }
 0x12a   :  { %v1027_v22 = vpop.f32.mrf.mxu2 }
 0x12b   :  { %v1028_v25 = vadd.f32 %v1027_v22, %v927_v24  ;;  %1366 = vmatmul.f32.gmra.mxu0 %v5230_v59  ;;  %1475 = vmatmul.f32.vlgmr.msra.gmra.mxu1 %v1023_v57 }
 0x12c   :  { %v1248_v38 = vpop.f32.mrf.mxu3 }
 0x12d   :  { %v5517_v55 = vadd.f32 %v1248_v38, %v1028_v25 }
 0x12f   :  { %7260 = vst [vmem:[#allocation3_spill] sm:$0xff] %v5517_v55  ;;  %1638 = vmatmul.f32.gmra.mxu2 %v5215_v15 }
 0x130   :  { %v837_v48 = vpop.f32.mrf.mxu0  ;;  %v930_v26 = vpop.f32.mrf.mxu1 }
 0x131   :  { %v931_v35 = vadd.f32 %v930_v26, %v834_v44  ;;  %1735 = vmatmul.f32.gmra.mxu3 %v5215_v15  ;;  %v838_v43 = vadd.f32 %v837_v48, %v5302_v63  ;;  %v7264_v48 = vand.u32 4294901760, %v5273_v29 }
 0x132   :  { %v1035_v6 = vpop.f32.mrf.mxu2 }
 0x133   :  { %v1036_v13 = vadd.f32 %v1035_v6, %v931_v35  ;;  %1371 = vmatmul.f32.gmra.mxu0 %v5254_v33  ;;  %1481 = vmatmul.f32.gmra.mxu1 %v7261_v31 }
 0x134   :  { %v1252_v14 = vpop.f32.mrf.mxu3 }
 0x135   :  { %v5525_v57 = vadd.f32 %v1252_v14, %v1036_v13  ;;  %v7266_v14 = vand.u32 4294901760, %v5290_v60 }
 0x137   :  { %1642 = vmatmul.f32.gmra.mxu2 %v5244_v19 }
 0x138   :  { %v841_v12 = vpop.f32.mrf.mxu0  ;;  %v934_v9 = vpop.f32.mrf.mxu1 }
 0x139   :  { %v935_v21 = vadd.f32 %v934_v9, %v838_v43  ;;  %1739 = vmatmul.f32.gmra.mxu3 %v5244_v19  ;;  %v842_v22 = vadd.f32 %v841_v12, %v5320_v17 }
 0x13a   :  { %v1043_v15 = vpop.f32.mrf.mxu2 }
 0x13b   :  { %v1044_v32 = vadd.f32 %v1043_v15, %v935_v21  ;;  %1376 = vmatmul.f32.gmra.mxu0 %v5273_v29  ;;  %1487 = vmatmul.f32.gmra.mxu1 %v7262_v3 }
 0x13c   :  { %v1256_v59 = vpop.f32.mrf.mxu3 }
 0x13d   :  { %v5533_v24 = vadd.f32 %v1256_v59, %v1044_v32  ;;  %v7267_v32 = vand.u32 4294901760, %v5308_v5 }
 0x13f   :  { %7263 = vst [vmem:[#allocation2_spill] sm:$0xff] %v5533_v24  ;;  %1646 = vmatmul.f32.gmra.mxu2 %v5265_v36 }
 0x140   :  { %v845_v63 = vpop.f32.mrf.mxu0  ;;  %v938_v25 = vpop.f32.mrf.mxu1 }
 0x141   :  { %v939_v38 = vadd.f32 %v938_v25, %v842_v22  ;;  %1743 = vmatmul.f32.gmra.mxu3 %v5265_v36  ;;  %v846_v35 = vadd.f32 %v845_v63, %v5338_v54 }
 0x142   :  { %v1051_v19 = vpop.f32.mrf.mxu2 }
 0x143   :  { %v1052_v44 = vadd.f32 %v1051_v19, %v939_v38  ;;  %1381 = vmatmul.f32.gmra.mxu0 %v5290_v60  ;;  %1493 = vmatmul.f32.gmra.mxu1 %v7264_v48  ;;  %v7269_v38 = vand.u32 4294901760, %v5326_v47 }
 0x144   :  { %v1260_v33 = vpop.f32.mrf.mxu3 }
 0x145   :  { %v5541_v26 = vadd.f32 %v1260_v33, %v1052_v44 }
 0x147   :  { %7265 = vst [vmem:[#allocation4_spill] sm:$0xff] %v5541_v26  ;;  %1650 = vmatmul.f32.gmra.mxu2 %v5282_v0 }
 0x148   :  { %v849_v17 = vpop.f32.mrf.mxu0  ;;  %v942_v6 = vpop.f32.mrf.mxu1 }
 0x149   :  { %v943_v13 = vadd.f32 %v942_v6, %v846_v35  ;;  %1747 = vmatmul.f32.gmra.mxu3 %v5282_v0  ;;  %v850_v12 = vadd.f32 %v849_v17, %v5356_v27 }
 0x14a   :  { %v1059_v36 = vpop.f32.mrf.mxu2 }
 0x14b   :  { %v1060_v31 = vadd.f32 %v1059_v36, %v943_v13  ;;  %1386 = vmatmul.f32.gmra.mxu0 %v5308_v5  ;;  %1499 = vmatmul.f32.gmra.mxu1 %v7266_v14 }
 0x14c   :  { %v1264_v29 = vpop.f32.mrf.mxu3 }
 0x14d   :  { %v5549_v43 = vadd.f32 %v1264_v29, %v1060_v31 }
 0x14f   :  { %1654 = vmatmul.f32.gmra.mxu2 %v5299_v34 }
 0x150   :  { %v853_v54 = vpop.f32.mrf.mxu0  ;;  %v946_v9 = vpop.f32.mrf.mxu1 }
 0x151   :  { %v947_v21 = vadd.f32 %v946_v9, %v850_v12  ;;  %1751 = vmatmul.f32.gmra.mxu3 %v5299_v34  ;;  %v854_v59 = vadd.f32 %v853_v54, %v5374_v39 }
 0x152   :  { %v1067_v0 = vpop.f32.mrf.mxu2 }
 0x153   :  { %v1068_v15 = vadd.f32 %v1067_v0, %v947_v21  ;;  %1391 = vmatmul.f32.gmra.mxu0 %v5326_v47  ;;  %1505 = vmatmul.f32.gmra.mxu1 %v7267_v32  ;;  %v7271_v47 = vand.u32 4294901760, %v5344_v1 }
 0x154   :  { %v1268_v60 = vpop.f32.mrf.mxu3 }
 0x155   :  { %v5557_v3 = vadd.f32 %v1268_v60, %v1068_v15 }
 0x157   :  { %7268 = vst [vmem:[#allocation5_spill] sm:$0xff] %v5557_v3  ;;  %1658 = vmatmul.f32.gmra.mxu2 %v5317_v20 }
 0x158   :  { %v857_v27 = vpop.f32.mrf.mxu0  ;;  %v950_v22 = vpop.f32.mrf.mxu1 }
 0x159   :  { %v951_v63 = vadd.f32 %v950_v22, %v854_v59  ;;  %1755 = vmatmul.f32.gmra.mxu3 %v5317_v20  ;;  %v858_v44 = vadd.f32 %v857_v27, %v5392_v23 }
 0x15a   :  { %v1075_v34 = vpop.f32.mrf.mxu2 }
 0x15b   :  { %v1076_v25 = vadd.f32 %v1075_v34, %v951_v63  ;;  %1396 = vmatmul.f32.gmra.mxu0 %v5344_v1  ;;  %1511 = vmatmul.f32.gmra.mxu1 %v7269_v38 }
 0x15c   :  { %v1272_v5 = vpop.f32.mrf.mxu3 }
 0x15d   :  { %v5565_v19 = vadd.f32 %v1272_v5, %v1076_v25 }
 0x15f   :  { %7270 = vst [vmem:[#allocation6_spill] sm:$0xff] %v5565_v19  ;;  %1662 = vmatmul.f32.gmra.mxu2 %v5335_v46 }
 0x160   :  { %v5569_v39 = vpop.f32.mrf.mxu0  ;;  %v954_v48 = vpop.f32.mrf.mxu1 }
 0x161   :  { %v955_v33 = vadd.f32 %v954_v48, %v858_v44  ;;  %1759 = vmatmul.f32.gmra.mxu3 %v5335_v46  ;;  %v7272_v46 = vand.u32 4294901760, %v5362_v61 }
 0x162   :  { %v1083_v20 = vpop.f32.mrf.mxu2 }
 0x163   :  { %v1084_v35 = vadd.f32 %v1083_v20, %v955_v33  ;;  %1401 = vmatmul.f32.gmra.mxu0 %v5362_v61  ;;  %1517 = vmatmul.f32.gmra.mxu1 %v7271_v47 }
 0x164   :  { %v1276_v17 = vpop.f32.mrf.mxu3 }
 0x165   :  { %v5575_v6 = vadd.f32 %v1276_v17, %v1084_v35 }
 0x167   :  { %1666 = vmatmul.f32.gmra.mxu2 %v5353_v40 }
 0x168   :  { %v5578_v23 = vpop.f32.mrf.mxu0  ;;  %v5580_v13 = vpop.f32.mrf.mxu1 }
 0x169   :  { %1763 = vmatmul.f32.gmra.mxu3 %v5353_v40  ;;  %v7273_v40 = vand.u32 4294901760, %v5380_v58 }
 0x16a   :  { %v5583_v36 = vpop.f32.mrf.mxu2 }
 0x16b   :  { %1406 = vmatmul.f32.gmra.mxu0 %v5380_v58  ;;  %1523 = vmatmul.f32.gmra.mxu1 %v7272_v46 }
 0x16c   :  { %v5588_v1 = vpop.f32.mrf.mxu3 }
 0x16f   :  { %1670 = vmatmul.f32.gmra.mxu2 %v5371_v49 }
 0x170   :  { %v5591_v31 = vpop.f32.mrf.mxu0  ;;  %v5593_v14 = vpop.f32.mrf.mxu1 }
 0x171   :  { %1767 = vmatmul.f32.gmra.mxu3 %v5371_v49  ;;  %v7274_v49 = vand.u32 4294901760, %v5398_v28 }
 0x172   :  { %v5596_v29 = vpop.f32.mrf.mxu2 }
 0x173   :  { %1411 = vmatmul.f32.gmra.mxu0 %v5398_v28  ;;  %1529 = vmatmul.f32.gmra.mxu1 %v7273_v40 }
 0x174   :  { %v5601_v12 = vpop.f32.mrf.mxu3 }
 0x177   :  { %1674 = vmatmul.f32.gmra.mxu2 %v5389_v53 }
 0x178   :  { %v5604_v61 = vpop.f32.mrf.mxu0  ;;  %v5606_v54 = vpop.f32.mrf.mxu1 }
 0x179   :  { %1771 = vmatmul.f32.gmra.mxu3 %v5389_v53  ;;  %v7275_v53 = vand.u32 4294901760, %v5416_v52  ;;  %v874_v3 = vadd.f32 %v5604_v61, %v5464_v37  ;;  %v862_v37 = vadd.f32 %v5569_v39, %v5410_v41 }
 0x17a   :  { %v5609_v9 = vpop.f32.mrf.mxu2 }
 0x17b   :  { %1416 = vmatmul.f32.gmra.mxu0 %v5416_v52  ;;  %1535 = vmatmul.f32.gmra.mxu1 %v7274_v49 }
 0x17c   :  { %v5614_v21 = vpop.f32.mrf.mxu3 }
 0x17f   :  { %1678 = vmatmul.f32.gmra.mxu2 %v5407_v11 }
 0x180   :  { %v5617_v58 = vpop.f32.mrf.mxu0  ;;  %v5619_v0 = vpop.f32.mrf.mxu1 }
 0x181   :  { %1775 = vmatmul.f32.gmra.mxu3 %v5407_v11  ;;  %v7276_v11 = vand.u32 4294901760, %v5434_v7 }
 0x182   :  { %v5622_v15 = vpop.f32.mrf.mxu2 }
 0x183   :  { %1421 = vmatmul.f32.gmra.mxu0 %v5434_v7  ;;  %1541 = vmatmul.f32.gmra.mxu1 %v7275_v53 }
 0x184   :  { %v5627_v32 = vpop.f32.mrf.mxu3 }
 0x187   :  { %1682 = vmatmul.f32.gmra.mxu2 %v5425_v18 }
 0x188   :  { %v5630_v28 = vpop.f32.mrf.mxu0  ;;  %v5632_v60 = vpop.f32.mrf.mxu1 }
 0x189   :  { %1779 = vmatmul.f32.gmra.mxu3 %v5425_v18  ;;  %v7277_v18 = vand.u32 4294901760, %v5452_v42 }
 0x18a   :  { %v5635_v59 = vpop.f32.mrf.mxu2 }
 0x18b   :  { %1426 = vmatmul.f32.gmra.mxu0 %v5452_v42  ;;  %1547 = vmatmul.f32.gmra.mxu1 %v7276_v11 }
 0x18c   :  { %v5640_v27 = vpop.f32.mrf.mxu3 }
 0x18f   :  { %1686 = vmatmul.f32.gmra.mxu2 %v5443_v16 }
 0x190   :  { %v5643_v52 = vpop.f32.mrf.mxu0  ;;  %v5645_v22 = vpop.f32.mrf.mxu1 }
 0x191   :  { %1783 = vmatmul.f32.gmra.mxu3 %v5443_v16  ;;  %v7278_v16 = vand.u32 4294901760, %v5470_v51 }
 0x192   :  { %v5648_v63 = vpop.f32.mrf.mxu2 }
 0x193   :  { %1431 = vmatmul.f32.gmra.mxu0 %v5470_v51  ;;  %1553 = vmatmul.f32.gmra.mxu1 %v7277_v18 }
 0x194   :  { %v5653_v34 = vpop.f32.mrf.mxu3 }
 0x197   :  { %1690 = vmatmul.f32.gmra.mxu2 %v5461_v45 }
 0x198   :  { %v5656_v7 = vpop.f32.mrf.mxu0  ;;  %v5658_v25 = vpop.f32.mrf.mxu1 }
 0x199   :  { %1787 = vmatmul.f32.gmra.mxu3 %v5461_v45  ;;  %v7282_v45 = vand.u32 4294901760, %v5488_v10 }
 0x19a   :  { %v5661_v38 = vpop.f32.mrf.mxu2 }
 0x19b   :  { %1436 = vmatmul.f32.gmra.mxu0 %v5488_v10  ;;  %1559 = vmatmul.f32.gmra.mxu1 %v7278_v16 }
 0x19c   :  { %v5666_v5 = vpop.f32.mrf.mxu3 }
 0x19d   :  { %7279 = vst [vmem:[#allocation7_spill] sm:$0xff] %v5666_v5 }
 0x19f   :  { %1694 = vmatmul.f32.gmra.mxu2 %v5479_v30 }
 0x1a0   :  { %v5669_v42 = vpop.f32.mrf.mxu1  ;;  %v5671_v44 = vpop.f32.mrf.mxu0 }
 0x1a1   :  { %7280 = vst [vmem:[#allocation8_spill] sm:$0xff] %v5671_v44  ;;  %1791 = vmatmul.f32.gmra.mxu3 %v5479_v30 }
 0x1a2   :  { %v5674_v48 = vpop.f32.mrf.mxu2 }
 0x1a3   :  { %7281 = vst [vmem:[#allocation9_spill] sm:$0xff] %v5674_v48  ;;  %1565 = vmatmul.f32.gmra.mxu1 %v7282_v45 }
 0x1a4   :  { %v5678_v33 = vpop.f32.mrf.mxu3 }
 0x1a5   :  { %7283 = vst [vmem:[#allocation10_spill] sm:$0xff] %v5678_v33 }
 0x1a8   :  { %v5680_v20 = vpop.f32.mrf.mxu0  ;;  %v5682_v51 = vpop.f32.mrf.mxu1 }
 0x1a9   :  { %7284 = vst [vmem:[#allocation11_spill] sm:$0xff] %v5682_v51 }
 0x1aa   :  { %v5684_v35 = vpop.f32.mrf.mxu2 }
 0x1ab   :  { %7285 = vst [vmem:[#allocation12_spill] sm:$0xff] %v5684_v35 }
 0x1ac   :  { %v5686_v47 = vpop.f32.mrf.mxu3 }
 0x1ad   :  { %7286 = vst [vmem:[#allocation13_spill] sm:$0xff] %v5686_v47 }
 0x1b0   :  { %v5688_v17 = vpop.f32.mrf.mxu0  ;;  %v5690_v46 = vpop.f32.mrf.mxu1 }
 0x1b1   :  { %7287 = vst [vmem:[#allocation14_spill] sm:$0xff] %v5688_v17 }
 0x1b2   :  { %v5692_v30 = vpop.f32.mrf.mxu2 }
 0x1b3   :  { %7288 = vst [vmem:[#allocation15_spill] sm:$0xff] %v5692_v30 }
 0x1b4   :  { %v5694_v40 = vpop.f32.mrf.mxu3 }
 0x1b5   :  { %7289 = vst [vmem:[#allocation16_spill] sm:$0xff] %v5694_v40 }
 0x1b8   :  { %v5696_v10 = vpop.f32.mrf.mxu0  ;;  %v5698_v49 = vpop.f32.mrf.mxu1 }
 0x1b9   :  { %7290 = vst [vmem:[#allocation17_spill] sm:$0xff] %v5696_v10 }
 0x1ba   :  { %7291 = vst [vmem:[#allocation18_spill] sm:$0xff] %v5698_v49  ;;  %v5700_v53 = vpop.f32.mrf.mxu2 }
 0x1bb   :  { %7292 = vst [vmem:[#allocation19_spill] sm:$0xff] %v5700_v53 }
 0x1bc   :  { %v5702_v11 = vpop.f32.mrf.mxu3 }
 0x1bd   :  { %7293 = vst [vmem:[#allocation20_spill] sm:$0xff] %v5702_v11 }
 0x1c0   :  { %v5704_v18 = vpop.f32.mrf.mxu0  ;;  %v5706_v16 = vpop.f32.mrf.mxu1 }
 0x1c1   :  { %7294 = vst [vmem:[#allocation21_spill] sm:$0xff] %v5706_v16 }
 0x1c2   :  { %v5708_v45 = vpop.f32.mrf.mxu2 }
 0x1c3   :  { %7295 = vst [vmem:[#allocation22_spill] sm:$0xff] %v5708_v45 }
 0x1c4   :  { %v5710_v47 = vpop.f32.mrf.mxu3 }
 0x1c5   :  { %7296 = vst [vmem:[#allocation23_spill] sm:$0xff] %v5710_v47 }
 0x1c8   :  { %v5712_v35 = vpop.f32.mrf.mxu0  ;;  %v5714_v51 = vpop.f32.mrf.mxu1 }
 0x1c9   :  { %7297 = vst [vmem:[#allocation24_spill] sm:$0xff] %v5712_v35 }
 0x1ca   :  { %v5716_v17 = vpop.f32.mrf.mxu2 }
 0x1cc   :  { %v5718_v24 = vpop.f32.mrf.mxu3 }
 0x1cd   :  { %7298 = vst [vmem:[#allocation25_spill] sm:$0xff] %v5718_v24 }
 0x1d0   :  { %v5720_v49 = vpop.f32.mrf.mxu0  ;;  %v5722_v53 = vpop.f32.mrf.mxu1 }
 0x1d1   :  { %7299 = vst [vmem:[#allocation26_spill] sm:$0xff] %v5720_v49 }
 0x1d2   :  { %7300 = vst [vmem:[#allocation27_spill] sm:$0xff] %v5722_v53  ;;  %v5724_v11 = vpop.f32.mrf.mxu2 }
 0x1d3   :  { %7301 = vst [vmem:[#allocation28_spill] sm:$0xff] %v5724_v11 }
 0x1d4   :  { %v5726_v10 = vpop.f32.mrf.mxu3 }
 0x1d5   :  { %7302 = vst [vmem:[#allocation29_spill] sm:$0xff] %v5726_v10  ;;  %v870_v10 = vadd.f32 %v5591_v31, %v5446_v56  ;;  %v971_v56 = vadd.f32 %v5619_v0, %v874_v3 }
 0x1d8   :  { %v1397_v16 = vpop.f32.mrf.mxu0  ;;  %v5728_v45 = vpop.f32.mrf.mxu1 }
 0x1d9   :  { %7303 = vst [vmem:[#allocation30_spill] sm:$0xff] %v5728_v45 }
 0x1da   :  { %v5730_v47 = vpop.f32.mrf.mxu2 }
 0x1db   :  { %7304 = vst [vmem:[#allocation31_spill] sm:$0xff] %v5730_v47  ;;  %v967_v47 = vadd.f32 %v5606_v54, %v870_v10  ;;  %v1116_v54 = vadd.f32 %v5622_v15, %v971_v56  ;;  %v1398_v15 = vadd.f32 %v1397_v16, %v5575_v6 }
 0x1dc   :  { %v5732_v26 = vpop.f32.mrf.mxu3 }
 0x1dd   :  { %7305 = vst [vmem:[#allocation32_spill] sm:$0xff] %v5732_v26  ;;  %v1108_v24 = vadd.f32 %v5609_v9, %v967_v47  ;;  %v878_v9 = vadd.f32 %v5617_v58, %v5482_v62  ;;  %v1293_v61 = vadd.f32 %v5627_v32, %v1116_v54  ;;  %v866_v32 = vadd.f32 %v5578_v23, %v5428_v8 }
 0x1df   :  { %v1289_v48 = vadd.f32 %v5614_v21, %v1108_v24  ;;  %v975_v24 = vadd.f32 %v5632_v60, %v878_v9  ;;  %v882_v60 = vadd.f32 %v5630_v28, %v5495_v2  ;;  %v963_v6 = vadd.f32 %v5593_v14, %v866_v32 }
 0x1e0   :  { %v5734_v40 = vpop.f32.mrf.mxu0  ;;  %v1518_v33 = vpop.f32.mrf.mxu1  ;;  %v886_v2 = vadd.f32 %v5643_v52, %v5504_v50 }
 0x1e1   :  { %v1124_v58 = vadd.f32 %v5635_v59, %v975_v24  ;;  %v979_v16 = vadd.f32 %v5645_v22, %v882_v60  ;;  %v1100_v22 = vadd.f32 %v5596_v29, %v963_v6  ;;  %v1368_v24 = vadd.f32 %v5680_v20, %v5525_v57  ;;  %v7314_v6 = vld [vmem:[#allocation24_spill] sm:$0xff] }
 0x1e2   :  { %v1663_v44 = vpop.f32.mrf.mxu2 }
 0x1e3   :  { %v1297_v56 = vadd.f32 %v5640_v27, %v1124_v58  ;;  %v1132_v54 = vadd.f32 %v5648_v63, %v979_v16  ;;  %v983_v27 = vadd.f32 %v5658_v25, %v886_v2  ;;  %v1285_v25 = vadd.f32 %v5601_v12, %v1100_v22 }
 0x1e4   :  { %v5736_v55 = vpop.f32.mrf.mxu3  ;;  %v1483_v12 = vadd.f32 %v5690_v46, %v1368_v24  ;;  %v7310_v46 = vld [vmem:[#allocation7_spill] sm:$0xff]  ;;  %v7325_v24 = vld [vmem:[#allocation30_spill] sm:$0xff] }
 0x1e8   :  { %v5738_v49 = vpop.f32.mrf.mxu0  ;;  %v5740_v53 = vpop.f32.mrf.mxu1 }
 0x1e9   :  { %v1408_v57 = vadd.f32 %v5738_v49, %v1285_v25  ;;  %v7311_v49 = vld [vmem:[#allocation9_spill] sm:$0xff]  ;;  %v7324_v25 = vld [vmem:[#allocation16_spill] sm:$0xff] }
 0x1ea   :  { %v5742_v11 = vpop.f32.mrf.mxu2 }
 0x1ec   :  { %v5746_v45 = vpop.f32.mrf.mxu3 }
 0x1ed   :  { %7306 = vst [vmem:[#allocation33_spill] sm:$0xff] %v5746_v45 }
 0x1f0   :  { %v1412_v26 = vpop.f32.mrf.mxu0  ;;  %v5749_v19 = vpop.f32.mrf.mxu1 }
 0x1f1   :  { %7307 = vst [vmem:[#allocation34_spill] sm:$0xff] %v5749_v19  ;;  %v1413_v31 = vadd.f32 %v1412_v26, %v1289_v48  ;;  %v959_v26 = vadd.f32 %v5580_v13, %v862_v37  ;;  %v1519_v13 = vadd.f32 %v1518_v33, %v1398_v15 }
 0x1f2   :  { %v5752_v35 = vpop.f32.mrf.mxu2 }
 0x1f3   :  { %7308 = vst [vmem:[#allocation35_spill] sm:$0xff] %v5752_v35  ;;  %v1092_v48 = vadd.f32 %v5583_v36, %v959_v26  ;;  %v1664_v23 = vadd.f32 %v1663_v44, %v1519_v13 }
 0x1f4   :  { %v5756_v30 = vpop.f32.mrf.mxu3 }
 0x1f5   :  { %v1281_v28 = vadd.f32 %v5588_v1, %v1092_v48  ;;  %v1383_v1 = vadd.f32 %v5704_v18, %v5549_v43  ;;  %v5799_v44 = vadd.f32 %v5736_v55, %v1664_v23  ;;  %v1301_v43 = vadd.f32 %v5653_v34, %v1132_v54  ;;  %v7316_v23 = vld [vmem:[#allocation25_spill] sm:$0xff] }
 0x1f6   :  { %v1140_v55 = vadd.f32 %v5661_v38, %v983_v27 }
 0x1f7   :  { %v1501_v26 = vadd.f32 %v5714_v51, %v1383_v1 }
 0x1f8   :  { %v1417_v45 = vpop.f32.mrf.mxu0  ;;  %v1536_v5 = vpop.f32.mrf.mxu1 }
 0x1f9   :  { %v1537_v10 = vadd.f32 %v1536_v5, %v1413_v31  ;;  %v1418_v21 = vadd.f32 %v1417_v45, %v1293_v61  ;;  %v1652_v15 = vadd.f32 %v5716_v17, %v1501_v26  ;;  %v7313_v17 = vld [vmem:[#allocation5_spill] sm:$0xff] }
 0x1fa   :  { %v1675_v19 = vpop.f32.mrf.mxu2  ;;  %v1388_v16 = vadd.f32 %v7314_v6, %v7313_v17  ;;  %v7319_v22 = vld [vmem:[#allocation35_spill] sm:$0xff] }
 0x1fb   :  { %v1676_v47 = vadd.f32 %v1675_v19, %v1537_v10 }
 0x1fc   :  { %v1772_v35 = vpop.f32.mrf.mxu3 }
 0x1fd   :  { %v5767_v3 = vadd.f32 %v1772_v35, %v1676_v47  ;;  %v1403_v47 = vadd.f32 %v5734_v40, %v1281_v28  ;;  %v890_v40 = vadd.f32 %v5656_v7, %v5509_v4  ;;  %v1802_v4 = vmul.f32 %v5799_v44, %v5799_v44 }
 0x1fe   :  { %v5834_v28 = vadd.f32 %v7316_v23, %v1652_v15  ;;  %v7334_v23 = vld [vmem:[#allocation29_spill] sm:$0xff] }
 0x1ff   :  { %v1805_v0 = vmul.f32 %v5767_v3, %v5767_v3  ;;  %v1525_v29 = vadd.f32 %v5740_v53, %v1403_v47  ;;  %v7321_v47 = vld [vmem:[#allocation8_spill] sm:$0xff] }
 0x200   :  { %v1422_v62 = vpop.f32.mrf.mxu0  ;;  %v1542_v19 = vpop.f32.mrf.mxu1 }
 0x201   :  { %v1821_v41 = vmul.f32 %v1805_v0, %v5767_v3  ;;  %v1543_v39 = vadd.f32 %v1542_v19, %v1418_v21  ;;  %v1423_v36 = vadd.f32 %v1422_v62, %v1297_v56  ;;  %v987_v0 = vadd.f32 %v5669_v42, %v890_v40  ;;  %v7309_v62 = vld [vmem:[#allocation34_spill] sm:$0xff] }
 0x202   :  { %v1679_v5 = vpop.f32.mrf.mxu2  ;;  %v1668_v20 = vadd.f32 %v5742_v11, %v1525_v29  ;;  %v1531_v19 = vadd.f32 %v7309_v62, %v1408_v57  ;;  %v7312_v11 = vld [vmem:[#allocation15_spill] sm:$0xff] }
 0x203   :  { %v1837_v35 = vmul.f32 0.044715, %v1821_v41  ;;  %v1680_v45 = vadd.f32 %v1679_v5, %v1543_v39  ;;  %v1305_v41 = vadd.f32 %v7310_v46, %v1140_v55  ;;  %v1148_v60 = vadd.f32 %v7311_v49, %v987_v0  ;;  %v7330_v46 = vld [vmem:[#allocation31_spill] sm:$0xff] }
 0x204   :  { %v1776_v59 = vpop.f32.mrf.mxu3  ;;  %v1640_v13 = vadd.f32 %v7312_v11, %v1483_v12  ;;  %v1818_v5 = vmul.f32 %v1802_v4, %v5799_v44  ;;  %v1672_v54 = vadd.f32 %v7319_v22, %v1531_v19  ;;  %v7326_v12 = vld [vmem:[#allocation4_spill] sm:$0xff]  ;;  %v7327_v4 = vld [vmem:[#allocation17_spill] sm:$0xff]  ;;  %v7332_v11 = vld [vmem:[#allocation14_spill] sm:$0xff] }
 0x205   :  { %v5783_v31 = vadd.f32 %v1776_v59, %v1680_v45  ;;  %v1853_v8 = vadd.f32 %v1837_v35, %v5767_v3  ;;  %v7315_v59 = vld [vmem:[#allocation33_spill] sm:$0xff]  ;;  %v1378_v57 = vadd.f32 %v7327_v4, %v7326_v12  ;;  %v7335_v22 = vld [vmem:[#allocation18_spill] sm:$0xff]  ;;  %v7338_v12 = vld [vmem:[#allocation19_spill] sm:$0xff] }
 0x206   :  { %v5831_v56 = vadd.f32 %v7315_v59, %v1668_v20  ;;  %v5850_v40 = vadd.f32 %v7324_v25, %v1640_v13  ;;  %v5864_v20 = vadd.f32 %v5756_v30, %v1672_v54  ;;  %v7339_v4 = vld [vmem:[#allocation23_spill] sm:$0xff] }
 0x207   :  { %v1806_v33 = vmul.f32 %v5783_v31, %v5783_v31  ;;  %v1869_v14 = vmul.f32 0.7978846, %v1853_v8 }
 0x208   :  { %v1427_v10 = vpop.f32.mrf.mxu0  ;;  %v1548_v9 = vpop.f32.mrf.mxu1  ;;  %v1804_v17 = vmul.f32 %v5864_v20, %v5864_v20 }
 0x209   :  { %v1822_v50 = vmul.f32 %v1806_v33, %v5783_v31  ;;  %v1549_v52 = vadd.f32 %v1548_v9, %v1423_v36  ;;  %4321 = vtanh.f32 %v1869_v14  ;;  %v1428_v51 = vadd.f32 %v1427_v10, %v1301_v43  ;;  %v7317_v36 = vld [vmem:[#allocation6_spill] sm:$0xff]  ;;  %v7320_v9 = vld [vmem:[#allocation3_spill] sm:$0xff] }
 0x20a   :  { %v1683_v37 = vpop.f32.mrf.mxu2  ;;  %v7318_v33 = vld [vmem:[#allocation26_spill] sm:$0xff]  ;;  %v1803_v43 = vmul.f32 %v5831_v56, %v5831_v56 }
 0x20b   :  { %v1838_v63 = vmul.f32 0.044715, %v1822_v50  ;;  %v1684_v61 = vadd.f32 %v1683_v37, %v1549_v52  ;;  %v1393_v14 = vadd.f32 %v7318_v33, %v7317_v36  ;;  %v1363_v50 = vadd.f32 %v7321_v47, %v7320_v9  ;;  %v7322_v52 = vld [vmem:[#allocation27_spill] sm:$0xff]  ;;  %v7337_v47 = vld [vmem:[#allocation32_spill] sm:$0xff] }
 0x20c   :  { %v1780_v21 = vpop.f32.mrf.mxu3  ;;  %v1507_v1 = vadd.f32 %v7322_v52, %v1388_v16  ;;  %v1819_v13 = vmul.f32 %v1803_v43, %v5831_v56 }
 0x20d   :  { %v5810_v18 = vadd.f32 %v1780_v21, %v1684_v61  ;;  %v1854_v53 = vadd.f32 %v1838_v63, %v5783_v31  ;;  %v7323_v63 = vld [vmem:[#allocation10_spill] sm:$0xff]  ;;  %v1513_v26 = vadd.f32 %v7325_v24, %v1393_v14  ;;  %v1834_v21 = vmul.f32 0.044715, %v1818_v5 }
 0x20e   :  { %v1309_v61 = vadd.f32 %v7323_v63, %v1148_v60  ;;  %v7331_v60 = vld [vmem:[#allocation2_spill] sm:$0xff] }
 0x20f   :  { %v4322_v7 = vpop.eup %4321  ;;  %v1807_v34 = vmul.f32 %v5810_v18, %v5810_v18  ;;  %v1870_v38 = vmul.f32 0.7978846, %v1854_v53  ;;  %v1850_v49 = vadd.f32 %v1834_v21, %v5799_v44  ;;  %v1373_v30 = vadd.f32 %v7332_v11, %v7331_v60 }
 0x210   :  { %v1554_v42 = vpop.f32.mrf.mxu1  ;;  %v1901_v58 = vadd.f32 1.0, %v4322_v7  ;;  %v1432_v48 = vpop.f32.mrf.mxu0  ;;  %v1799_v7 = vmul.f32 %v5834_v28, %v5834_v28  ;;  %v1820_v21 = vmul.f32 %v1804_v17, %v5864_v20 }
 0x211   :  { %v1823_v39 = vmul.f32 %v1807_v34, %v5810_v18  ;;  %v1555_v32 = vadd.f32 %v1554_v42, %v1428_v51  ;;  %4323 = vtanh.f32 %v1870_v38  ;;  %v1433_v55 = vadd.f32 %v1432_v48, %v1305_v41  ;;  %v7328_v38 = vld [vmem:[#allocation28_spill] sm:$0xff]  ;;  %v7329_v42 = vld [vmem:[#allocation21_spill] sm:$0xff] }
 0x212   :  { %v1687_v35 = vpop.f32.mrf.mxu2  ;;  %v1917_v45 = vmul.f32 0.5, %v1901_v58  ;;  %v1656_v15 = vadd.f32 %v7328_v38, %v1507_v1  ;;  %v1495_v58 = vadd.f32 %v7329_v42, %v1378_v57  ;;  %v1660_v41 = vadd.f32 %v7330_v46, %v1513_v26 }
 0x213   :  { %v1839_v8 = vmul.f32 0.044715, %v1823_v39  ;;  %v1688_v2 = vadd.f32 %v1687_v35, %v1555_v32  ;;  %v1796_v35 = vmul.f32 %v5850_v40, %v5850_v40  ;;  %v1489_v54 = vadd.f32 %v7335_v22, %v1373_v30  ;;  %v7341_v30 = vld [vmem:[#allocation20_spill] sm:$0xff]  ;;  %v7342_v22 = vld [vmem:[#allocation13_spill] sm:$0xff] }
 0x214   :  { %v1784_v27 = vpop.f32.mrf.mxu3  ;;  %v5840_v10 = vmul.f32 %v1917_v45, %v5767_v3  ;;  %v1815_v45 = vmul.f32 %v1799_v7, %v5834_v28  ;;  %v5884_v36 = vadd.f32 %v7334_v23, %v1656_v15  ;;  %v5892_v52 = vadd.f32 %v7337_v47, %v1660_v41 }
 0x215   :  { %v5845_v37 = vadd.f32 %v1784_v27, %v1688_v2  ;;  %v1855_v29 = vadd.f32 %v1839_v8, %v5810_v18  ;;  %v7333_v8 = vld [vmem:[#allocation11_spill] sm:$0xff]  ;;  %v7336_v27 = vld [vmem:[#allocation22_spill] sm:$0xff]  ;;  %v1812_v24 = vmul.f32 %v1796_v35, %v5850_v40 }
 0x216   :  { %3132 = vrot.lane.b32.xlu0 %v5840_v10, %s4362_s1  ;;  %v1477_v2 = vadd.f32 %v7333_v8, %v1363_v50  ;;  %v1648_v9 = vadd.f32 %v7336_v27, %v1495_v58  ;;  %v1835_v50 = vmul.f32 0.044715, %v1819_v13  ;;  %v1831_v26 = vmul.f32 0.044715, %v1815_v45 }
 0x217   :  { %v4324_v3 = vpop.eup %4323  ;;  %v1808_v53 = vmul.f32 %v5845_v37, %v5845_v37  ;;  %v1871_v0 = vmul.f32 0.7978846, %v1855_v29  ;;  %v1801_v7 = vmul.f32 %v5892_v52, %v5892_v52  ;;  %v1828_v11 = vmul.f32 0.044715, %v1812_v24 }
 0x218   :  { %v1560_v51 = vpop.f32.mrf.mxu1  ;;  %v1902_v34 = vadd.f32 1.0, %v4324_v3  ;;  %v1437_v6 = vpop.f32.mrf.mxu0  ;;  %v5905_v57 = vadd.f32 %v7339_v4, %v1648_v9  ;;  %v1847_v46 = vadd.f32 %v1831_v26, %v5834_v28 }
 0x219   :  { %v1824_v62 = vmul.f32 %v1808_v53, %v5845_v37  ;;  %v1561_v19 = vadd.f32 %v1560_v51, %v1433_v55  ;;  %4325 = vtanh.f32 %v1871_v0  ;;  %v1438_v29 = vadd.f32 %v1437_v6, %v1309_v61 }
 0x21a   :  { %v1691_v39 = vpop.f32.mrf.mxu2  ;;  %v1918_v32 = vmul.f32 0.5, %v1902_v34  ;;  %v1800_v55 = vmul.f32 %v5884_v36, %v5884_v36  ;;  %v1644_v61 = vadd.f32 %v7338_v12, %v1489_v54  ;;  %v1844_v47 = vadd.f32 %v1828_v11, %v5850_v40 }
 0x21b   :  { %v1840_v5 = vmul.f32 0.044715, %v1824_v62  ;;  %v1692_v48 = vadd.f32 %v1691_v39, %v1561_v19  ;;  %v1851_v62 = vadd.f32 %v1835_v50, %v5831_v56  ;;  %v1836_v19 = vmul.f32 0.044715, %v1820_v21 }
 0x21c   :  { %v1788_v16 = vpop.f32.mrf.mxu3  ;;  %v5880_v59 = vmul.f32 %v1918_v32, %v5783_v31  ;;  %v1866_v31 = vmul.f32 0.7978846, %v1850_v49  ;;  %v1816_v41 = vmul.f32 %v1800_v55, %v5884_v36  ;;  %v7340_v49 = vld [vmem:[#allocation12_spill] sm:$0xff]  ;;  %v5920_v13 = vadd.f32 %v7341_v30, %v1644_v61 }
 0x21d   :  { %v5886_v33 = vadd.f32 %v1788_v16, %v1692_v48  ;;  %v1856_v14 = vadd.f32 %v1840_v5, %v5845_v37  ;;  %v1636_v60 = vadd.f32 %v7340_v49, %v1477_v2  ;;  %v1798_v5 = vmul.f32 %v5905_v57, %v5905_v57 }
 0x21e   :  { %3134 = vrot.lane.b32.xlu2 %v5880_v59, %s4362_s1  ;;  %v1817_v48 = vmul.f32 %v1801_v7, %v5892_v52  ;;  %v1867_v17 = vmul.f32 0.7978846, %v1851_v62  ;;  %v1863_v16 = vmul.f32 0.7978846, %v1847_v46  ;;  %v1852_v8 = vadd.f32 %v1836_v19, %v5864_v20 }
 0x21f   :  { %v4326_v1 = vpop.eup %4325  ;;  %v1809_v63 = vmul.f32 %v5886_v33, %v5886_v33  ;;  %v1872_v25 = vmul.f32 0.7978846, %v1856_v14  ;;  %v1832_v23 = vmul.f32 0.044715, %v1816_v41  ;;  %v5932_v54 = vadd.f32 %v7342_v22, %v1636_v60 }
 0x220   :  { %v1566_v3 = vpop.f32.mrf.mxu1  ;;  %v1903_v43 = vadd.f32 1.0, %v4326_v1  ;;  %v1797_v27 = vmul.f32 %v5920_v13, %v5920_v13  ;;  %v1833_v1 = vmul.f32 0.044715, %v1817_v48 }
 0x221   :  { %v1825_v53 = vmul.f32 %v1809_v63, %v5886_v33  ;;  %v1567_v0 = vadd.f32 %v1566_v3, %v1438_v29  ;;  %4327 = vtanh.f32 %v1872_v25  ;;  %v1868_v25 = vmul.f32 0.7978846, %v1852_v8 }
 0x222   :  { %v1695_v51 = vpop.f32.mrf.mxu2  ;;  %v1919_v34 = vmul.f32 0.5, %v1903_v43  ;;  %4329 = vtanh.f32 %v1866_v31  ;;  %v1814_v31 = vmul.f32 %v1798_v5, %v5905_v57  ;;  %v1848_v26 = vadd.f32 %v1832_v23, %v5884_v36 }
 0x223   :  { %v1841_v38 = vmul.f32 0.044715, %v1825_v53  ;;  %v1696_v15 = vadd.f32 %v1695_v51, %v1567_v0  ;;  %v1813_v21 = vmul.f32 %v1797_v27, %v5920_v13  ;;  %v1795_v43 = vmul.f32 %v5932_v54, %v5932_v54 }
 0x224   :  { %v1792_v42 = vpop.f32.mrf.mxu3  ;;  %v5911_v58 = vmul.f32 %v1919_v34, %v5810_v18  ;;  %v1860_v53 = vmul.f32 0.7978846, %v1844_v47  ;;  %v1830_v0 = vmul.f32 0.044715, %v1814_v31  ;;  %v1864_v7 = vmul.f32 0.7978846, %v1848_v26 }
 0x225   :  { %v5915_v39 = vadd.f32 %v1792_v42, %v1696_v15  ;;  %v1857_v32 = vadd.f32 %v1841_v38, %v5886_v33  ;;  %v1829_v34 = vmul.f32 0.044715, %v1813_v21  ;;  %v1811_v15 = vmul.f32 %v1795_v43, %v5932_v54 }
 0x226   :  { %3136 = vrot.lane.b32.xlu1 %v5911_v58, %s4362_s1  ;;  %v1846_v41 = vadd.f32 %v1830_v0, %v5905_v57  ;;  %v5976_v47 = vand.u32 4294901760, %v5911_v58  ;;  %v5996_v26 = vand.u32 4294901760, %v5880_v59 }
 0x227   :  { %v4328_v18 = vpop.eup %4327  ;;  %v1810_v35 = vmul.f32 %v5915_v39, %v5915_v39  ;;  %v1873_v45 = vmul.f32 0.7978846, %v1857_v32  ;;  %v1845_v60 = vadd.f32 %v1829_v34, %v5920_v13  ;;  %v1827_v30 = vmul.f32 0.044715, %v1811_v15 }
 0x228   :  { %v1904_v6 = vadd.f32 1.0, %v4328_v18  ;;  %v4330_v2 = vpop.eup %4329  ;;  %v6000_v21 = vsub.f32 %v5911_v58, %v5976_v47 }
 0x229   :  { %v1826_v14 = vmul.f32 %v1810_v35, %v5915_v39  ;;  %4331 = vtanh.f32 %v1873_v45  ;;  %v1898_v63 = vadd.f32 1.0, %v4330_v2  ;;  %v1843_v2 = vadd.f32 %v1827_v30, %v5932_v54 }
 0x22a   :  { %v1920_v9 = vmul.f32 0.5, %v1904_v6  ;;  %4333 = vtanh.f32 %v1867_v17  ;;  %v1861_v6 = vmul.f32 0.7978846, %v1845_v60 }
 0x22b   :  { %v1842_v50 = vmul.f32 0.044715, %v1826_v14  ;;  %4335 = vtanh.f32 %v1863_v16  ;;  %v1914_v61 = vmul.f32 0.5, %v1898_v63 }
 0x22c   :  { %v5939_v29 = vmul.f32 %v1920_v9, %v5845_v37  ;;  %v1849_v37 = vadd.f32 %v1833_v1, %v5892_v52  ;;  %4337 = vtanh.f32 %v1868_v25 }
 0x22d   :  { %v1858_v24 = vadd.f32 %v1842_v50, %v5915_v39  ;;  %v5952_v42 = vmul.f32 %v1914_v61, %v5799_v44  ;;  %v1862_v44 = vmul.f32 0.7978846, %v1846_v41  ;;  %v1859_v50 = vmul.f32 0.7978846, %v1843_v2 }
 0x22e   :  { %3138 = vrot.lane.b32.xlu0 %v5939_v29, %s4362_s1  ;;  %v1865_v62 = vmul.f32 0.7978846, %v1849_v37  ;;  %v5962_v8 = vand.u32 4294901760, %v5939_v29 }
 0x22f   :  { %v4332_v3 = vpop.eup %4331  ;;  %v1874_v55 = vmul.f32 0.7978846, %v1858_v24 }
 0x230   :  { %v1905_v12 = vadd.f32 1.0, %v4332_v3  ;;  %v4334_v4 = vpop.eup %4333 }
 0x231   :  { %4339 = vtanh.f32 %v1874_v55  ;;  %v4336_v51 = vpop.eup %4335  ;;  %v1899_v46 = vadd.f32 1.0, %v4334_v4  ;;  %v6022_v4 = vsub.f32 %v5880_v59, %v5996_v26 }
 0x232   :  { %v1921_v38 = vmul.f32 0.5, %v1905_v12  ;;  %4341 = vtanh.f32 %v1860_v53  ;;  %v1895_v32 = vadd.f32 1.0, %v4336_v51  ;;  %v4338_v49 = vpop.eup %4337  ;;  %v2030_v51 = vand.u32 4294901760, %v6000_v21 }
 0x233   :  { %4343 = vtanh.f32 %v1864_v7  ;;  %v1915_v5 = vmul.f32 0.5, %v1899_v46  ;;  %v1900_v45 = vadd.f32 1.0, %v4338_v49  ;;  %v2036_v60 = vand.u32 4294901760, %v6022_v4 }
 0x234   :  { %v1937_v19 = vmul.f32 %v1921_v38, %v5886_v33  ;;  %4345 = vtanh.f32 %v1865_v62  ;;  %v1911_v48 = vmul.f32 0.5, %v1895_v32 }
 0x235   :  { %v5967_v14 = vmul.f32 %v1915_v5, %v5831_v56  ;;  %4347 = vtanh.f32 %v1862_v44  ;;  %v1916_v31 = vmul.f32 0.5, %v1900_v45 }
 0x236   :  { %3140 = vrot.lane.b32.xlu2 %v1937_v19, %s4362_s1  ;;  %3126 = vrot.lane.b32.xlu0 %v5952_v42, %s4362_s1  ;;  %v5959_v35 = vand.u32 4294901760, %v1937_v19  ;;  %v5970_v27 = vmul.f32 %v1911_v48, %v5834_v28  ;;  %4349 = vtanh.f32 %v1861_v6  ;;  %v5987_v28 = vsub.f32 %v5939_v29, %v5962_v8 }
 0x237   :  { %v4340_v11 = vpop.eup %4339  ;;  %v1932_v24 = vmul.f32 %v1916_v31, %v5864_v20  ;;  %v6008_v20 = vand.u32 4294901760, %v5840_v10  ;;  %4351 = vtanh.f32 %v1859_v50  ;;  %v1944_v31 = vld [vmem:[%s7171_s4 + $0x8] sm:$0x1] }
 0x238   :  { %v1906_v33 = vadd.f32 1.0, %v4340_v11  ;;  %v4342_v18 = vpop.eup %4341  ;;  %v5973_v9 = vsub.f32 %v1937_v19, %v5959_v35  ;;  %v2024_v37 = vand.u32 4294901760, %v5987_v28 }
 0x239   :  { %v4344_v16 = vpop.eup %4343  ;;  %v1892_v1 = vadd.f32 1.0, %v4342_v18  ;;  %v6024_v7 = vand.u32 4294901760, %v1932_v24  ;;  %v6042_v19 = vsub.f32 %v5840_v10, %v6008_v20  ;;  %v2031_v10 = vsub.f32 %v6000_v21, %v2030_v51 }
 0x23a   :  { %v1922_v17 = vmul.f32 0.5, %v1906_v33  ;;  %v4346_v22 = vpop.eup %4345  ;;  %v1896_v56 = vadd.f32 1.0, %v4344_v16  ;;  %v2018_v29 = vand.u32 4294901760, %v5973_v9  ;;  %v2025_v59 = vsub.f32 %v5987_v28, %v2024_v37 }
 0x23b   :  { %v1897_v25 = vadd.f32 1.0, %v4346_v22  ;;  %v4348_v3 = vpop.eup %4347  ;;  %v1908_v55 = vmul.f32 0.5, %v1892_v1  ;;  %v6057_v49 = vsub.f32 %v1932_v24, %v6024_v7  ;;  %v2042_v44 = vand.u32 4294901760, %v6042_v19 }
 0x23c   :  { %v1938_v23 = vmul.f32 %v1922_v17, %v5915_v39  ;;  %v1912_v43 = vmul.f32 0.5, %v1896_v56  ;;  %v4350_v58 = vpop.eup %4349  ;;  %v2019_v61 = vsub.f32 %v5973_v9, %v2018_v29  ;;  %v1894_v62 = vadd.f32 1.0, %v4348_v3 }
 0x23d   :  { %v1913_v12 = vmul.f32 0.5, %v1897_v25  ;;  %v6033_v38 = vmul.f32 %v1908_v55, %v5850_v40  ;;  %v1893_v46 = vadd.f32 1.0, %v4350_v58  ;;  %v4352_v41 = vpop.eup %4351  ;;  %v2026_v30 = vand.u32 4294901760, %v2025_v59 }
 0x23e   :  { %3142 = vrot.lane.b32.xlu1 %v1938_v23, %s4362_s1  ;;  %3128 = vrot.lane.b32.xlu2 %v5967_v14, %s4362_s1  ;;  %v5981_v39 = vand.u32 4294901760, %v1938_v23  ;;  %v6030_v34 = vmul.f32 %v1912_v43, %v5884_v36  ;;  %v6045_v36 = vand.u32 4294901760, %v5967_v14  ;;  %v2020_v32 = vand.u32 4294901760, %v2019_v61 }
 0x23f   :  { %3120 = vrot.lane.b32.xlu0 %v5970_v27, %s4362_s1  ;;  %v1929_v40 = vmul.f32 %v1913_v12, %v5892_v52  ;;  %v6063_v52 = vand.u32 4294901760, %v5952_v42  ;;  %v1910_v11 = vmul.f32 0.5, %v1894_v62  ;;  %v1909_v33 = vmul.f32 0.5, %v1893_v46 }
 0x240   :  { %1946 = vmatpush.msrb.mxu0 %v5981_v39  ;;  %2193 = vmatpush.msrb.mxu3 %v5981_v39  ;;  %v5992_v63 = vsub.f32 %v1938_v23, %v5981_v39  ;;  %v6068_v5 = vsub.f32 %v5967_v14, %v6045_v36  ;;  %v1891_v48 = vadd.f32 1.0, %v4352_v41  ;;  %v2032_v45 = vand.u32 4294901760, %v2031_v10  ;;  %v1939_v14 = vld [vmem:[%s7170_s3] sm:$0xff]  ;;  %v1940_v41 = vld [vmem:[%s7170_s3 + $0x8] sm:$0xff] }
 0x241   :  { %v6073_v18 = vand.u32 4294901760, %v1929_v40  ;;  %v2037_v17 = vsub.f32 %v6022_v4, %v2036_v60  ;;  %v2048_v6 = vand.u32 4294901760, %v6057_v49  ;;  %v6084_v16 = vsub.f32 %v5952_v42, %v6063_v52  ;;  %v1943_v10 = vld [vmem:[%s7171_s4] sm:$0xff] }
 0x242   :  { %1948 = vmatpush.msrb.mxu0 %v5959_v35  ;;  %2125 = vmatpush.msrb.mxu2 %v5992_v63  ;;  %v2012_v53 = vand.u32 4294901760, %v5992_v63  ;;  %v6087_v2 = vand.u32 4294901760, %v6030_v34  ;;  %v1926_v23 = vmul.f32 %v1910_v11, %v5905_v57  ;;  %v1925_v22 = vmul.f32 %v1909_v33, %v5920_v13 }
 0x243   :  { %2195 = vmatpush.msrb.mxu3 %v5959_v35  ;;  %v2043_v42 = vsub.f32 %v6042_v19, %v2042_v44  ;;  %v2054_v56 = vand.u32 4294901760, %v6068_v5  ;;  %v6105_v57 = vsub.f32 %v1929_v40, %v6073_v18  ;;  %v6108_v1 = vand.u32 4294901760, %v5970_v27 }
 0x244   :  { %1950 = vmatpush.msrb.mxu0 %v5962_v8  ;;  %2128 = vmatpush.msrb.mxu2 %v5973_v9  ;;  %v2013_v0 = vsub.f32 %v5992_v63, %v2012_v53  ;;  %v1907_v13 = vmul.f32 0.5, %v1891_v48  ;;  %v2038_v50 = vand.u32 4294901760, %v2037_v17  ;;  %v2049_v25 = vsub.f32 %v6057_v49, %v2048_v6 }
 0x245   :  { %2197 = vmatpush.msrb.mxu3 %v5962_v8  ;;  %v6120_v3 = vsub.f32 %v6030_v34, %v6087_v2  ;;  %v6122_v43 = vand.u32 4294901760, %v1926_v23  ;;  %v2060_v55 = vand.u32 4294901760, %v6084_v16  ;;  %v2044_v58 = vand.u32 4294901760, %v2043_v42 }
 0x246   :  { %1952 = vmatpush.msrb.mxu0 %v5976_v47  ;;  %2131 = vmatpush.msrb.mxu2 %v5987_v28  ;;  %v2014_v15 = vand.u32 4294901760, %v2013_v0  ;;  %v2055_v0 = vsub.f32 %v6068_v5, %v2054_v56  ;;  %v6133_v12 = vsub.f32 %v5970_v27, %v6108_v1  ;;  %v6135_v61 = vand.u32 4294901760, %v1925_v22 }
 0x247   :  { %2199 = vmatpush.msrb.mxu3 %v5976_v47  ;;  %3130 = vrot.lane.b32.xlu1 %v1932_v24, %s4362_s1  ;;  %v6115_v24 = vand.u32 4294901760, %v1939_v14  ;;  %v2050_v62 = vand.u32 4294901760, %v2049_v25  ;;  %v2061_v27 = vsub.f32 %v6084_v16, %v2060_v55  ;;  %v6151_v46 = vsub.f32 %v1926_v23, %v6122_v43 }
 0x248   :  { %3122 = vrot.lane.b32.xlu2 %v6030_v34, %s4362_s1  ;;  %3114 = vrot.lane.b32.xlu0 %v6033_v38, %s4362_s1  ;;  %v2066_v34 = vand.u32 4294901760, %v6105_v57  ;;  %v2078_v33 = vand.u32 4294901760, %v6133_v12  ;;  %v6180_v17 = vand.u32 4294901760, %v1940_v41 }
 0x249   :  { %1954 = vmatpush.msrb.mxu0 %v5996_v26  ;;  %2015 = vmatpush.msrb.mxu1 %v2014_v15  ;;  %v6139_v15 = vmul.f32 %v1907_v13, %v5932_v54  ;;  %v6143_v59 = vsub.f32 %v1939_v14, %v6115_v24  ;;  %v6154_v54 = vand.u32 4294901760, %v6033_v38  ;;  %v2062_v14 = vand.u32 4294901760, %v2061_v27 }
 0x24a   :  { %2134 = vmatpush.msrb.mxu2 %v6000_v21  ;;  %2201 = vmatpush.msrb.mxu3 %v5996_v26  ;;  %v2067_v11 = vsub.f32 %v6105_v57, %v2066_v34  ;;  %v2084_v42 = vand.u32 4294901760, %v6151_v46 }
 0x24b   :  { %1956 = vmatpush.msrb.mxu0 %v6008_v20  ;;  %2021 = vmatpush.msrb.mxu1 %v2020_v32  ;;  %v2056_v32 = vand.u32 4294901760, %v2055_v0  ;;  %v6174_v48 = vand.u32 4294901760, %v6139_v15 }
 0x24c   :  { %2137 = vmatpush.msrb.mxu2 %v6022_v4  ;;  %2203 = vmatpush.msrb.mxu3 %v6008_v20  ;;  %v2068_v13 = vand.u32 4294901760, %v2067_v11 }
 0x24d   :  { %1958 = vmatpush.msrb.mxu0 %v6024_v7  ;;  %2027 = vmatpush.msrb.mxu1 %v2026_v30  ;;  %v6170_v30 = vsub.f32 %v1925_v22, %v6135_v61 }
 0x24e   :  { %2140 = vmatpush.msrb.mxu2 %v6042_v19  ;;  %2205 = vmatpush.msrb.mxu3 %v6024_v7 }
 0x24f   :  { %1960 = vmatpush.msrb.mxu0 %v6045_v36  ;;  %2033 = vmatpush.msrb.mxu1 %v2032_v45  ;;  %v6178_v45 = vand.u32 4294901760, %v6143_v59 }
 0x250   :  { %2143 = vmatpush.msrb.mxu2 %v6057_v49  ;;  %2207 = vmatpush.msrb.mxu3 %v6045_v36  ;;  %v4300_v49 = vld [vmem:[%s7172_s5 + $0x30] sm:$0xff] }
 0x251   :  { %3124 = vrot.lane.b32.xlu1 %v1929_v40, %s4362_s1  ;;  %3116 = vrot.lane.b32.xlu2 %v1925_v22, %s4362_s1  ;;  %v2072_v40 = vand.u32 4294901760, %v6120_v3  ;;  %v1980_v25 = vsub.f32 %v6143_v59, %v6178_v45 }
 0x252   :  { %3085 = vperm.xlu0 %4318, %v1944_v31   ;;  %1962 = vmatpush.msrb.mxu0 %v6063_v52  ;;  %v6189_v31 = vsub.f32 %v6033_v38, %v6154_v54  ;;  %v2090_v38 = vand.u32 4294901760, %v6170_v30 }
 0x253   :  { %2039 = vmatpush.msrb.mxu1 %v2038_v50  ;;  %2146 = vmatpush.msrb.mxu2 %v6068_v5  ;;  %v2073_v22 = vsub.f32 %v6120_v3, %v2072_v40  ;;  %v6199_v50 = vsub.f32 %v6139_v15, %v6174_v48  ;;  %v4299_v5 = vld [vmem:[%s7172_s5 + $0x28] sm:$0xff] }
 0x254   :  { %2209 = vmatpush.msrb.mxu3 %v6063_v52  ;;  %1964 = vmatpush.msrb.mxu0 %v6073_v18  ;;  %v2096_v27 = vand.u32 4294901760, %v6189_v31 }
 0x255   :  { %2045 = vmatpush.msrb.mxu1 %v2044_v58  ;;  %2149 = vmatpush.msrb.mxu2 %v6084_v16  ;;  %v6207_v58 = vsub.f32 %v1940_v41, %v6180_v17  ;;  %v2074_v0 = vand.u32 4294901760, %v2073_v22  ;;  %v2102_v11 = vand.u32 4294901760, %v6199_v50 }
 0x256   :  { %2211 = vmatpush.msrb.mxu3 %v6073_v18  ;;  %1966 = vmatpush.msrb.mxu0 %v6087_v2 }
 0x257   :  { %2051 = vmatpush.msrb.mxu1 %v2050_v62  ;;  %2152 = vmatpush.msrb.mxu2 %v6105_v57  ;;  %v2085_v62 = vsub.f32 %v6151_v46, %v2084_v42  ;;  %v6229_v22 = vand.u32 4294901760, %v6207_v58 }
 0x258   :  { %2213 = vmatpush.msrb.mxu3 %v6087_v2  ;;  %1968 = vmatpush.msrb.mxu0 %v6108_v1 }
 0x259   :  { %2057 = vmatpush.msrb.mxu1 %v2056_v32  ;;  %2155 = vmatpush.msrb.mxu2 %v6120_v3  ;;  %v1941_v32 = vld [vmem:[%s7170_s3 + $0x10] sm:$0xff] }
 0x25a   :  { %2215 = vmatpush.msrb.mxu3 %v6108_v1  ;;  %3118 = vrot.lane.b32.xlu1 %v1926_v23, %s4362_s1  ;;  %v2079_v23 = vsub.f32 %v6133_v12, %v2078_v33 }
 0x25b   :  { %3080 = vperm.xlu2 %4320, %v1943_v10   ;;  %1970 = vmatpush.msrb.mxu0 %v6122_v43  ;;  %v2091_v10 = vsub.f32 %v6170_v30, %v2090_v38 }
 0x25c   :  { %2063 = vmatpush.msrb.mxu1 %v2062_v14  ;;  %2158 = vmatpush.msrb.mxu2 %v6133_v12  ;;  %v2080_v41 = vand.u32 4294901760, %v2079_v23  ;;  %v6226_v14 = vand.u32 4294901760, %v1980_v25  ;;  %v2086_v23 = vand.u32 4294901760, %v2085_v62  ;;  %v1988_v62 = vsub.f32 %v6207_v58, %v6229_v22 }
 0x25d   :  { %2217 = vmatpush.msrb.mxu3 %v6122_v43  ;;  %1972 = vmatpush.msrb.mxu0 %v6135_v61  ;;  %v2092_v25 = vand.u32 4294901760, %v2091_v10 }
 0x25e   :  { %2069 = vmatpush.msrb.mxu1 %v2068_v13  ;;  %2161 = vmatpush.msrb.mxu2 %v6151_v46  ;;  %v6231_v13 = vand.u32 4294901760, %v1941_v32 }
 0x25f   :  { %2219 = vmatpush.msrb.mxu3 %v6135_v61  ;;  %1974 = vmatpush.msrb.mxu0 %v6154_v54 }
 0x260   :  { %2075 = vmatpush.msrb.mxu1 %v2074_v0  ;;  %2164 = vmatpush.msrb.mxu2 %v6170_v30  ;;  %v2097_v0 = vsub.f32 %v6189_v31, %v2096_v27 }
 0x261   :  { %2221 = vmatpush.msrb.mxu3 %v6154_v54  ;;  %1976 = vmatpush.msrb.mxu0 %v6174_v48 }
 0x262   :  { %2081 = vmatpush.msrb.mxu1 %v2080_v41  ;;  %2167 = vmatpush.msrb.mxu2 %v6189_v31  ;;  %v2103_v41 = vsub.f32 %v6199_v50, %v2102_v11  ;;  %v2098_v63 = vand.u32 4294901760, %v2097_v0 }
 0x263   :  { %3112 = vrot.lane.b32.xlu1 %v6139_v15, %s4362_s1  ;;  %2223 = vmatpush.msrb.mxu3 %v6174_v48  ;;  %v6250_v15 = vsub.f32 %v1941_v32, %v6231_v13  ;;  %v6261_v32 = vand.u32 4294901760, %v1988_v62  ;;  %v2381_v62 = vld [vmem:[%s7172_s5 + $0x10] sm:$0xff] }
 0x264   :  { %2252 = vmatpush.msra.mxu0 %v2012_v53  ;;  %2087 = vmatpush.msrb.mxu1 %v2086_v23  ;;  %v1942_v53 = vld [vmem:[%s7170_s3 + $0x18] sm:$0x7]  ;;  %v2104_v10 = vand.u32 4294901760, %v2103_v41 }
 0x265   :  { %2170 = vmatpush.msrb.mxu2 %v6199_v50  ;;  %1982 = vmatmul.f32.vlgmr.msrb.gmra.mxu0 %v6226_v14  ;;  %v6264_v9 = vand.u32 4294901760, %v6250_v15  ;;  %v2382_v23 = vld [vmem:[%s7172_s5 + $0x18] sm:$0x1] }
 0x266   :  { %2256 = vmatpush.msra.mxu0 %v2018_v29  ;;  %2093 = vmatpush.msrb.mxu1 %v2092_v25  ;;  %v6266_v29 = vand.u32 4294901760, %v1942_v53  ;;  %v2625_v0 = vsel %vm2399_vm0, %v2382_v23, 0 }
 0x267   :  { %2173 = vmatmul.f32.vlgmr.msrb.gmra.mxu2 %v6143_v59  ;;  %2227 = vmatmul.f32.vlgmr.msrb.gmra.mxu3 %v6178_v45  ;;  %v1996_v28 = vsub.f32 %v6250_v15, %v6264_v9  ;;  %v6435_v41 = vand.u32 4294901760, %v2625_v0 }
 0x268   :  { %2260 = vmatpush.msra.mxu0 %v2024_v37  ;;  %2099 = vmatpush.msrb.mxu1 %v2098_v63  ;;  %v6278_v37 = vsub.f32 %v1942_v53, %v6266_v29  ;;  %v4305_v63 = vld [vmem:[%s7172_s5 + $0x58] sm:$0x1] }
 0x26a   :  { %2264 = vmatpush.msra.mxu0 %v2030_v51  ;;  %2105 = vmatpush.msrb.mxu1 %v2104_v10  ;;  %v6291_v21 = vand.u32 4294901760, %v6278_v37  ;;  %v6445_v10 = vsub.f32 %v2625_v0, %v6435_v41 }
 0x26b   :  { %2107 = vmatmul.f32.vlgmr.msrb.gmra.mxu1 %v6115_v24 }
 0x26c   :  { %2268 = vmatpush.msra.mxu0 %v2036_v60  ;;  %2331 = vmatpush.msra.mxu1 %v5981_v39  ;;  %v6288_v39 = vand.u32 4294901760, %v1996_v28  ;;  %v6448_v28 = vand.u32 4294901760, %v2381_v62 }
 0x26d   :  { %1990 = vmatmul.f32.gmra.mxu0 %v6261_v32 }
 0x26e   :  { %2272 = vmatpush.msra.mxu0 %v2042_v44  ;;  %2333 = vmatpush.msra.mxu1 %v5959_v35  ;;  %v2004_v35 = vsub.f32 %v6278_v37, %v6291_v21  ;;  %7353 = vst [vmem:[#allocation35_spill] sm:$0xff] %v6448_v28 }
 0x26f   :  { %2178 = vmatmul.f32.gmra.mxu2 %v6207_v58  ;;  %2233 = vmatmul.f32.gmra.mxu3 %v6229_v22 }
 0x270   :  { %2276 = vmatpush.msra.mxu0 %v2048_v6  ;;  %2335 = vmatpush.msra.mxu1 %v5962_v8  ;;  %v6311_v8 = vand.u32 4294901760, %v2004_v35  ;;  %v6371_v6 = vand.u32 4294901760, %v4299_v5  ;;  %v2380_v35 = vld [vmem:[%s7172_s5 + $0x8] sm:$0xff] }
 0x272   :  { %2280 = vmatpush.msra.mxu0 %v2054_v56  ;;  %2337 = vmatpush.msra.mxu1 %v5976_v47  ;;  %v6383_v3 = vsub.f32 %v4299_v5, %v6371_v6 }
 0x273   :  { %2111 = vmatmul.f32.gmra.mxu1 %v6180_v17 }
 0x274   :  { %2284 = vmatpush.msra.mxu0 %v2060_v55  ;;  %2339 = vmatpush.msra.mxu1 %v5996_v26  ;;  %7345 = vst [vmem:[#allocation9_spill] sm:$0xff] %v6383_v3 }
 0x275   :  { %1998 = vmatmul.f32.gmra.mxu0 %v6288_v39 }
 0x276   :  { %2288 = vmatpush.msra.mxu0 %v2066_v34  ;;  %2341 = vmatpush.msra.mxu1 %v6008_v20  ;;  %v6395_v34 = vand.u32 4294901760, %v6383_v3 }
 0x277   :  { %2183 = vmatmul.f32.gmra.mxu2 %v6250_v15  ;;  %2239 = vmatmul.f32.gmra.mxu3 %v6264_v9 }
 0x278   :  { %2292 = vmatpush.msra.mxu0 %v2072_v40  ;;  %2343 = vmatpush.msra.mxu1 %v6024_v7  ;;  %v4301_v7 = vld [vmem:[%s7172_s5 + $0x38] sm:$0x1]  ;;  %7347 = vst [vmem:[#allocation5_spill] sm:$0xff] %v6395_v34  ;;  %v2467_v30 = vsub.f32 %v6383_v3, %v6395_v34 }
 0x279   :  { %v2401_v51 = vsel %vm2399_vm0, %v4301_v7, 0  ;;  %v2858_v7 = vsel %vm2399_vm0, %v4305_v63, 0 }
 0x27a   :  { %2296 = vmatpush.msra.mxu0 %v2078_v33  ;;  %2345 = vmatpush.msra.mxu1 %v6045_v36  ;;  %v2415_v36 = vand.u32 4294901760, %v2401_v51  ;;  %v6463_v5 = vand.u32 4294901760, %v2858_v7 }
 0x27b   :  { %2115 = vmatmul.f32.gmra.mxu1 %v6231_v13 }
 0x27c   :  { %2300 = vmatpush.msra.mxu0 %v2084_v42  ;;  %2347 = vmatpush.msra.mxu1 %v6063_v52  ;;  %v2453_v60 = vsub.f32 %v2401_v51, %v2415_v36  ;;  %v6362_v52 = vand.u32 4294901760, %v4300_v49 }
 0x27d   :  { %2006 = vmatmul.f32.gmra.mxu0 %v6311_v8  ;;  %2416 = vmatpush.msra.mxu2 %v2415_v36 }
 0x27e   :  { %2304 = vmatpush.msra.mxu0 %v2090_v38  ;;  %2349 = vmatpush.msra.mxu1 %v6073_v18  ;;  %v2454_v44 = vand.u32 4294901760, %v2453_v60  ;;  %v6368_v18 = vsub.f32 %v4300_v49, %v6362_v52  ;;  %v6456_v49 = vand.u32 4294901760, %v2380_v35 }
 0x27f   :  { %2188 = vmatmul.f32.gmra.mxu2 %v6278_v37  ;;  %2245 = vmatmul.f32.gmra.mxu3 %v6291_v21 }
 0x280   :  { %2308 = vmatpush.msra.mxu0 %v2096_v27  ;;  %2351 = vmatpush.msra.mxu1 %v6087_v2  ;;  %7343 = vst [vmem:[#allocation34_spill] sm:$0xff] %v6368_v18  ;;  %v4298_v2 = vld [vmem:[%s7172_s5 + $0x20] sm:$0xff]  ;;  %v2455_v57 = vsub.f32 %v2453_v60, %v2454_v44 }
 0x281   :  { %2418 = vmatpush.msra.mxu2 %v6362_v52 }
 0x282   :  { %2312 = vmatpush.msra.mxu0 %v2102_v11  ;;  %2353 = vmatpush.msra.mxu1 %v6108_v1  ;;  %v6380_v1 = vand.u32 4294901760, %v6368_v18  ;;  %v2456_v12 = vand.u32 4294901760, %v2455_v57  ;;  %v4304_v57 = vld [vmem:[%s7172_s5 + $0x50] sm:$0xff] }
 0x283   :  { %2119 = vmatmul.f32.gmra.mxu1 %v6266_v29  ;;  %2420 = vmatpush.msra.mxu2 %v6371_v6  ;;  %v6492_v0 = vand.u32 4294901760, %v4304_v57 }
 0x284   :  { %2355 = vmatpush.msra.mxu1 %v6122_v43  ;;  %2568 = vmatpush.msrb.mxu0 %v2454_v44  ;;  %7344 = vst [vmem:[#allocation7_spill] sm:$0xff] %v6380_v1  ;;  %v6386_v43 = vand.u32 4294901760, %v4298_v2 }
 0x285   :  { %2314 = vmatmul.f32.vlgmr.msra.gmra.mxu0 %v6115_v24  ;;  %2457 = vmatpush.msra.mxu3 %v2456_v12 }
 0x286   :  { %2357 = vmatpush.msra.mxu1 %v6135_v61  ;;  %7346 = vst [vmem:[#allocation15_spill] sm:$0xff] %v6386_v43  ;;  %v2461_v61 = vsub.f32 %v6368_v18, %v6380_v1  ;;  %2572 = vmatpush.msrb.mxu0 %v6380_v1  ;;  %v6398_v46 = vsub.f32 %v4298_v2, %v6386_v43 }
 0x287   :  { %2422 = vmatpush.msra.mxu2 %v6386_v43  ;;  %v6467_v2 = vsub.f32 %v2380_v35, %v6456_v49 }
 0x288   :  { %2359 = vmatpush.msra.mxu1 %v6154_v54  ;;  %7348 = vst [vmem:[#allocation24_spill] sm:$0xff] %v6398_v46  ;;  %v6404_v40 = vand.u32 4294901760, %v2461_v61  ;;  %2576 = vmatpush.msrb.mxu0 %v6395_v34  ;;  %v6410_v33 = vand.u32 4294901760, %v6398_v46 }
 0x289   :  { %2499 = vmatpush.msrb.mxu2 %v2453_v60  ;;  %v6460_v60 = vsub.f32 %v2381_v62, %v6448_v28 }
 0x28a   :  { %2361 = vmatpush.msra.mxu1 %v6174_v48  ;;  %7349 = vst [vmem:[#allocation33_spill] sm:$0xff] %v6404_v40  ;;  %2463 = vmatpush.msra.mxu3 %v6404_v40  ;;  %v6413_v48 = vand.u32 4294901760, %v2467_v30  ;;  %v2473_v31 = vsub.f32 %v6398_v46, %v6410_v33 }
 0x28b   :  { %2363 = vmatmul.f32.vlgmr.msra.gmra.mxu1 %v6115_v24  ;;  %7350 = vst [vmem:[#allocation25_spill] sm:$0xff] %v6410_v33  ;;  %2580 = vmatpush.msrb.mxu0 %v6410_v33 }
 0x28c   :  { %2603 = vmatpush.msrb.mxu1 %v2415_v36  ;;  %7351 = vst [vmem:[#allocation6_spill] sm:$0xff] %v6413_v48  ;;  %2502 = vmatpush.msrb.mxu2 %v6368_v18  ;;  %v6420_v50 = vand.u32 4294901760, %v2473_v31  ;;  %v6488_v31 = vsub.f32 %v2858_v7, %v6463_v5 }
 0x28d   :  { %2318 = vmatmul.f32.gmra.mxu0 %v6180_v17  ;;  %2469 = vmatpush.msra.mxu3 %v6413_v48  ;;  %7354 = vst [vmem:[#allocation3_spill] sm:$0xff] %v6460_v60 }
 0x28e   :  { %2605 = vmatpush.msrb.mxu1 %v6362_v52  ;;  %7352 = vst [vmem:[#allocation26_spill] sm:$0xff] %v6420_v50  ;;  %2505 = vmatpush.msrb.mxu2 %v6383_v3 }
 0x28f   :  { %2475 = vmatpush.msra.mxu3 %v6420_v50  ;;  %2723 = vmatpush.msra.mxu0 %v6445_v10 }
 0x290   :  { %2607 = vmatpush.msrb.mxu1 %v6371_v6  ;;  %2508 = vmatpush.msrb.mxu2 %v6398_v46 }
 0x291   :  { %2533 = vmatpush.msrb.mxu3 %v2415_v36  ;;  %2726 = vmatpush.msra.mxu0 %v6460_v60 }
 0x292   :  { %2609 = vmatpush.msrb.mxu1 %v6386_v43 }
 0x293   :  { %2367 = vmatmul.f32.gmra.mxu1 %v6180_v17  ;;  %2535 = vmatpush.msrb.mxu3 %v6362_v52 }
 0x294   :  { %2757 = vmatpush.msra.mxu1 %v6435_v41  ;;  %2729 = vmatpush.msra.mxu0 %v6467_v2 }
 0x295   :  { %2322 = vmatmul.f32.gmra.mxu0 %v6231_v13  ;;  %2537 = vmatpush.msrb.mxu3 %v6371_v6 }
 0x296   :  { %2759 = vmatpush.msra.mxu1 %v6448_v28 }
 0x297   :  { %2539 = vmatpush.msrb.mxu3 %v6386_v43 }
 0x298   :  { %2761 = vmatpush.msra.mxu1 %v6456_v49 }
 0x29b   :  { %2371 = vmatmul.f32.gmra.mxu1 %v6231_v13 }
 0x29d   :  { %2326 = vmatmul.f32.gmra.mxu0 %v6266_v29 }
 0x2a3   :  { %2375 = vmatmul.f32.gmra.mxu1 %v6266_v29 }
 0x2e2   :  { %v6345_v47 = vpop.f32.mrf.mxu0 }
 0x2e8   :  { %v6347_v26 = vpop.f32.mrf.mxu1 }
 0x2e9   :  { %v2109_v23 = vadd.f32 %v6347_v26, %v6345_v47 }
 0x2ea   :  { %v6349_v20 = vpop.f32.mrf.mxu0  ;;  %v6374_v16 = vpop.f32.mrf.mxu2 }
 0x2eb   :  { %v6401_v54 = vpop.f32.mrf.mxu3  ;;  %v2175_v50 = vadd.f32 %v6374_v16, %v2109_v23  ;;  %v7357_v16 = vand.u32 4294901760, %v6488_v31 }
 0x2f0   :  { %v6351_v4 = vpop.f32.mrf.mxu1 }
 0x2f1   :  { %v2113_v51 = vadd.f32 %v6351_v4, %v6349_v20  ;;  %v2379_v20 = vld [vmem:[%s7172_s5] sm:$0xff] }
 0x2f2   :  { %v6357_v19 = vpop.f32.mrf.mxu0  ;;  %v2179_v38 = vpop.f32.mrf.mxu2  ;;  %v6474_v4 = vand.u32 4294901760, %v2379_v20 }
 0x2f3   :  { %v2234_v11 = vpop.f32.mrf.mxu3  ;;  %v2180_v12 = vadd.f32 %v2179_v38, %v2113_v51  ;;  %v4302_v51 = vld [vmem:[%s7172_s5 + $0x40] sm:$0xff] }
 0x2f4   :  { %7355 = vst [vmem:[#allocation8_spill] sm:$0xff] %v6474_v4  ;;  %v6484_v30 = vsub.f32 %v2379_v20, %v6474_v4  ;;  %2763 = vmatpush.msra.mxu1 %v6474_v4 }
 0x2f5   :  { %v2235_v63 = vadd.f32 %v2234_v11, %v2180_v12  ;;  %v6509_v11 = vand.u32 4294901760, %v4302_v51  ;;  %v7212_v12 = vand.u32 4294901760, %v6445_v10 }
 0x2f6   :  { %7356 = vst [vmem:[#allocation27_spill] sm:$0xff] %v6484_v30  ;;  %2732 = vmatpush.msra.mxu0 %v6484_v30 }
 0x2f8   :  { %v2116_v56 = vpop.f32.mrf.mxu1 }
 0x2f9   :  { %v2117_v44 = vadd.f32 %v2116_v56, %v6357_v19  ;;  %v4303_v19 = vld [vmem:[%s7172_s5 + $0x48] sm:$0xff] }
 0x2fa   :  { %v6389_v55 = vpop.f32.mrf.mxu0  ;;  %v2184_v36 = vpop.f32.mrf.mxu2  ;;  %v6495_v62 = vand.u32 4294901760, %v4303_v19 }
 0x2fb   :  { %v2240_v61 = vpop.f32.mrf.mxu3  ;;  %v2185_v38 = vadd.f32 %v2184_v36, %v2117_v44  ;;  %v6504_v44 = vsub.f32 %v4304_v57, %v6492_v0 }
 0x2fc   :  { %v6507_v46 = vsub.f32 %v4303_v19, %v6495_v62 }
 0x2fd   :  { %v2241_v26 = vadd.f32 %v2240_v61, %v2185_v38  ;;  %v2229_v61 = vadd.f32 %v6401_v54, %v2175_v50  ;;  %v7213_v19 = vand.u32 4294901760, %v6504_v44  ;;  %v6522_v38 = vand.u32 4294901760, %v6460_v60 }
 0x2ff   :  { %7358 = vst [vmem:[#allocation10_spill] sm:$0xff] %v6522_v38 }
 0x300   :  { %v2120_v42 = vpop.f32.mrf.mxu1 }
 0x301   :  { %v2121_v20 = vadd.f32 %v2120_v42, %v6389_v55 }
 0x302   :  { %v6423_v27 = vpop.f32.mrf.mxu0  ;;  %v2189_v36 = vpop.f32.mrf.mxu2 }
 0x303   :  { %v2190_v7 = vadd.f32 %v2189_v36, %v2121_v20  ;;  %v2246_v23 = vpop.f32.mrf.mxu3  ;;  %v7359_v20 = vand.u32 4294901760, %v6507_v46 }
 0x308   :  { %v6433_v25 = vpop.f32.mrf.mxu1 }
 0x30a   :  { %v2319_v53 = vpop.f32.mrf.mxu0 }
 0x30b   :  { %v2320_v47 = vadd.f32 %v2319_v53, %v2235_v63  ;;  %v2912_v53 = vsub.f32 %v6488_v31, %v7357_v16  ;;  %v6526_v63 = vsub.f32 %v4302_v51, %v6509_v11  ;;  %v2918_v16 = vsub.f32 %v6504_v44, %v7213_v19 }
 0x30c   :  { %v6551_v19 = vand.u32 4294901760, %v6484_v30 }
 0x30d   :  { %v2913_v36 = vand.u32 4294901760, %v2912_v53  ;;  %v7363_v40 = vand.u32 4294901760, %v6526_v63 }
 0x30e   :  { %7361 = vst [vmem:[#allocation16_spill] sm:$0xff] %v6551_v19 }
 0x310   :  { %v2368_v56 = vpop.f32.mrf.mxu1 }
 0x311   :  { %v6512_v48 = vadd.f32 %v2368_v56, %v2320_v47  ;;  %v2316_v47 = vadd.f32 %v6423_v27, %v2229_v61  ;;  %v2924_v27 = vsub.f32 %v6507_v46, %v7359_v20  ;;  %v2919_v20 = vand.u32 4294901760, %v2918_v16 }
 0x312   :  { %v2323_v35 = vpop.f32.mrf.mxu0 }
 0x313   :  { %v2324_v55 = vadd.f32 %v2323_v35, %v2241_v26  ;;  %v2679_v35 = vsub.f32 %v6445_v10, %v7212_v12  ;;  %v2391_v54 = vrot.slane %v6512_v48, 1  ;;  %v2247_v26 = vadd.f32 %v2246_v23, %v2190_v7 }
 0x314   :  { %v2685_v12 = vsub.f32 %v6460_v60, %v6522_v38 }
 0x315   :  { %v2680_v53 = vand.u32 4294901760, %v2679_v35 }
 0x316   :  { %v6556_v7 = vand.u32 4294901760, %v2685_v12  ;;  %v2697_v12 = vsub.f32 %v6484_v30, %v6551_v19 }
 0x318   :  { %v2372_v42 = vpop.f32.mrf.mxu1  ;;  %7362 = vst [vmem:[#allocation30_spill] sm:$0xff] %v6556_v7  ;;  %v6576_v16 = vand.u32 4294901760, %v2697_v12 }
 0x319   :  { %v6518_v57 = vadd.f32 %v2372_v42, %v2324_v55 }
 0x31a   :  { %v2327_v42 = vpop.f32.mrf.mxu0  ;;  %7364 = vst [vmem:[#allocation4_spill] sm:$0xff] %v6576_v16 }
 0x31b   :  { %v2392_v50 = vrot.slane %v6518_v57, 1  ;;  %v2328_v3 = vadd.f32 %v2327_v42, %v2247_v26  ;;  %v2930_v26 = vsub.f32 %v6526_v63, %v7363_v40 }
 0x31d   :  { %v2393_v55 = vsel %vm2390_vm1, %v2391_v54, %v2392_v50  ;;  %v2397_v51 = vsel %vm2394_vm2, %v2392_v50, 0  ;;  %v7360_v54 = vand.u32 4294901760, %v6467_v2 }
 0x31e   :  { %v2395_v56 = vsel %vm2394_vm2, %v2393_v55, 0  ;;  %v2431_v23 = vand.u32 4294901760, %v2397_v51  ;;  %v2365_v55 = vadd.f32 %v6433_v25, %v2316_v47 }
 0x31f   :  { %v2423_v61 = vand.u32 4294901760, %v2395_v56  ;;  %v2691_v50 = vsub.f32 %v6467_v2, %v7360_v54  ;;  %v2925_v54 = vand.u32 4294901760, %v2924_v27 }
 0x320   :  { %v2376_v60 = vpop.f32.mrf.mxu1  ;;  %v6565_v25 = vsub.f32 %v2397_v51, %v2431_v23  ;;  %v2931_v51 = vand.u32 4294901760, %v2930_v26 }
 0x321   :  { %v6554_v33 = vsub.f32 %v2395_v56, %v2423_v61  ;;  %2477 = vmatmul.f32.vlgmr.msra.gmra.mxu3 %v2423_v61  ;;  %2582 = vmatmul.f32.vlgmr.msrb.gmra.mxu0 %v2423_v61  ;;  %v6558_v35 = vadd.f32 %v2376_v60, %v2328_v3  ;;  %v2692_v56 = vand.u32 4294901760, %v2691_v50  ;;  %v2620_v3 = vsel %vm2394_vm2, %v2365_v55, 0 }
 0x322   :  { %2611 = vmatmul.f32.vlgmr.msrb.gmra.mxu1 %v2423_v61  ;;  %2873 = vmatpush.msrb.mxu0 %v6463_v5  ;;  %v6578_v27 = vand.u32 4294901760, %v2620_v3  ;;  %v6582_v61 = vpop.permute.xlu1 %3136 }
 0x323   :  { %v2425_v42 = vand.u32 4294901760, %v6554_v33  ;;  %2914 = vmatpush.msrb.mxu1 %v2913_v36  ;;  %2681 = vmatpush.msra.mxu3 %v2680_v53  ;;  %v2851_v40 = vrot.slane %v6558_v35, 2  ;;  %v2433_v36 = vand.u32 4294901760, %v6565_v25  ;;  %v2850_v53 = vrot.slane %v6518_v57, 2 }
 0x324   :  { %2875 = vmatpush.msrb.mxu0 %v6492_v0  ;;  %v2622_v57 = vsel %vm2394_vm2, %v6512_v48, 0  ;;  %v7365_v48 = vand.u32 4294901760, %v6488_v31 }
 0x325   :  { %v2426_v60 = vsub.f32 %v6554_v33, %v2425_v42  ;;  %2920 = vmatpush.msrb.mxu1 %v2919_v20  ;;  %2687 = vmatpush.msra.mxu3 %v6556_v7  ;;  %v2852_v50 = vsel %vm2849_vm3, %v2850_v53, %v2851_v40  ;;  %v2434_v55 = vsub.f32 %v6565_v25, %v2433_v36 }
 0x326   :  { %2877 = vmatpush.msrb.mxu0 %v6495_v62  ;;  %v6588_v20 = vsub.f32 %v2620_v3, %v6578_v27  ;;  %v2853_v35 = vsel %vm2394_vm2, %v2852_v50, 0  ;;  %v6603_v3 = vpop.permute.xlu0 %3132  ;;  %v7367_v50 = vand.u32 4294901760, %v6507_v46 }
 0x327   :  { %v2427_v47 = vand.u32 4294901760, %v2426_v60  ;;  %2926 = vmatpush.msrb.mxu1 %v2925_v54  ;;  %2693 = vmatpush.msra.mxu3 %v2692_v56  ;;  %v2435_v54 = vand.u32 4294901760, %v2434_v55  ;;  %v6598_v56 = vand.u32 4294901760, %v2622_v57  ;;  %v6600_v12 = vand.u32 4294901760, %v2853_v35 }
 0x328   :  { %2879 = vmatpush.msrb.mxu0 %v6509_v11  ;;  %v2649_v26 = vand.u32 4294901760, %v6588_v20 }
 0x329   :  { %2428 = vmatmul.f32.vlgmr.msra.gmra.mxu2 %v2427_v47  ;;  %2481 = vmatmul.f32.gmra.mxu3 %v2431_v23  ;;  %v6610_v47 = vsub.f32 %v2853_v35, %v6600_v12  ;;  %v2855_v35 = vsel %vm2394_vm2, %v2851_v40, 0 }
 0x32a   :  { %2586 = vmatmul.f32.gmra.mxu0 %v2431_v23  ;;  %2615 = vmatmul.f32.gmra.mxu1 %v2431_v23  ;;  %v6595_v23 = vpop.permute.xlu2 %3134  ;;  %v3143_v60 = vpop.permute.xlu1 %3142  ;;  %v6640_v40 = vand.u32 4294901760, %v2855_v35 }
 0x32b   :  { %2932 = vmatpush.msrb.mxu1 %v2931_v51  ;;  %2699 = vmatpush.msra.mxu3 %v6576_v16  ;;  %v6613_v51 = vsub.f32 %v2622_v57, %v6598_v56  ;;  %v7219_v55 = vand.u32 4294901760, %v6610_v47 }
 0x32c   :  { %2640 = vmatpush.msra.mxu2 %v6435_v41 }
 0x32d   :  { %v7218_v57 = vand.u32 4294901760, %v6613_v51 }
 0x32e   :  { %2642 = vmatpush.msra.mxu2 %v6448_v28 }
 0x330   :  { %2644 = vmatpush.msra.mxu2 %v6456_v49 }
 0x331   :  { %2436 = vmatmul.f32.gmra.mxu2 %v2435_v54  ;;  %2543 = vmatmul.f32.vlgmr.msrb.gmra.mxu3 %v2425_v42  ;;  %v7366_v42 = vand.u32 4294901760, %v6504_v44 }
 0x332   :  { %2735 = vmatmul.f32.vlgmr.msra.gmra.mxu0 %v6588_v20  ;;  %2767 = vmatmul.f32.vlgmr.msra.gmra.mxu1 %v2649_v26  ;;  %v3141_v53 = vpop.permute.xlu2 %3140  ;;  %v6632_v54 = vpop.permute.xlu1 %3130 }
 0x333   :  { %3025 = vmatpush.msra.mxu0 %v7365_v48  ;;  %3060 = vmatpush.msra.mxu1 %v6463_v5  ;;  %v7368_v48 = vand.u32 4294901760, %v6526_v63 }
 0x334   :  { %2827 = vmatpush.msrb.mxu3 %v6435_v41  ;;  %2646 = vmatpush.msra.mxu2 %v6474_v4  ;;  %v3139_v41 = vpop.permute.xlu0 %3138 }
 0x335   :  { %3029 = vmatpush.msra.mxu0 %v7366_v42  ;;  %3062 = vmatpush.msra.mxu1 %v6492_v0  ;;  %v6648_v42 = vand.u32 4294901760, %v3141_v53  ;;  %v6655_v16 = vand.u32 4294901760, %v3139_v41 }
 0x336   :  { %2829 = vmatpush.msrb.mxu3 %v6448_v28 }
 0x337   :  { %3033 = vmatpush.msra.mxu0 %v7367_v50  ;;  %3064 = vmatpush.msra.mxu1 %v6495_v62  ;;  %v6651_v50 = vsub.f32 %v2855_v35, %v6640_v40  ;;  %v6667_v35 = vand.u32 4294901760, %v6582_v61 }
 0x338   :  { %2831 = vmatpush.msrb.mxu3 %v6456_v49  ;;  %v2883_v49 = vsub.f32 %v6610_v47, %v7219_v55 }
 0x339   :  { %2511 = vmatmul.f32.vlgmr.msrb.gmra.mxu2 %v6554_v33  ;;  %2549 = vmatmul.f32.gmra.mxu3 %v2433_v36  ;;  %v7369_v33 = vand.u32 4294901760, %v6445_v10  ;;  %v6645_v36 = vand.u32 4294901760, %v3143_v60  ;;  %v6664_v10 = vsub.f32 %v3141_v53, %v6648_v42  ;;  %v6679_v53 = vsub.f32 %v3139_v41, %v6655_v16 }
 0x33a   :  { %2740 = vmatmul.f32.gmra.mxu0 %v6613_v51  ;;  %2773 = vmatmul.f32.gmra.mxu1 %v7218_v57  ;;  %v7370_v57 = vand.u32 4294901760, %v6467_v2  ;;  %v3129_v55 = vpop.permute.xlu2 %3128 }
 0x33b   :  { %3037 = vmatpush.msra.mxu0 %v7368_v48  ;;  %3066 = vmatpush.msra.mxu1 %v6509_v11  ;;  %v2884_v48 = vand.u32 4294901760, %v2883_v49  ;;  %v6658_v7 = vsub.f32 %v3143_v60, %v6645_v36  ;;  %v2650_v60 = vsub.f32 %v6588_v20, %v2649_v26  ;;  %v3125_v49 = vpop.permute.xlu1 %3124  ;;  %v6685_v20 = vand.u32 4294901760, %v6603_v3 }
 0x33c   :  { %2833 = vmatpush.msrb.mxu3 %v6474_v4  ;;  %2792 = vmatpush.msrb.mxu2 %v7369_v33  ;;  %v3127_v2 = vpop.permute.xlu0 %3126 }
 0x33d   :  { %v2651_v26 = vand.u32 4294901760, %v2650_v60 }
 0x33e   :  { %2796 = vmatpush.msrb.mxu2 %v6522_v38 }
 0x340   :  { %2800 = vmatpush.msrb.mxu2 %v7370_v57  ;;  %v6676_v57 = vand.u32 4294901760, %v6595_v23 }
 0x341   :  { %2516 = vmatmul.f32.gmra.mxu2 %v6565_v25  ;;  %2701 = vmatmul.f32.vlgmr.msra.gmra.mxu3 %v6578_v27  ;;  %v7222_v25 = vand.u32 4294901760, %v6651_v50 }
 0x342   :  { %2885 = vmatmul.f32.vlgmr.msrb.gmra.mxu0 %v2884_v48  ;;  %2934 = vmatmul.f32.vlgmr.msrb.gmra.mxu1 %v6600_v12  ;;  %v3123_v60 = vpop.permute.xlu2 %3122  ;;  %v7372_v48 = vand.u32 4294901760, %v6658_v7 }
 0x343   :  { %3340 = vmatpush.msrb.mxu0 %v6658_v7  ;;  %3408 = vmatpush.msrb.mxu1 %v6645_v36  ;;  %v2891_v41 = vsub.f32 %v6651_v50, %v7222_v25  ;;  %v7371_v25 = vand.u32 4294901760, %v6613_v51 }
 0x344   :  { %2990 = vmatpush.msra.mxu3 %v6463_v5  ;;  %2804 = vmatpush.msrb.mxu2 %v6551_v19  ;;  %v6689_v5 = vsub.f32 %v6582_v61, %v6667_v35  ;;  %v6703_v61 = vand.u32 4294901760, %v6632_v54  ;;  %v6723_v19 = vand.u32 4294901760, %v3127_v2  ;;  %v3228_v38 = vsub.f32 %v6658_v7, %v7372_v48  ;;  %v3121_v30 = vpop.permute.xlu0 %3120 }
 0x345   :  { %3343 = vmatpush.msrb.mxu0 %v6664_v10  ;;  %3410 = vmatpush.msrb.mxu1 %v6648_v42  ;;  %v2892_v33 = vand.u32 4294901760, %v2891_v41 }
 0x346   :  { %2992 = vmatpush.msra.mxu3 %v6492_v0  ;;  %v6699_v0 = vsub.f32 %v6595_v23, %v6676_v57  ;;  %v6713_v23 = vand.u32 4294901760, %v3129_v55  ;;  %v6730_v4 = vsub.f32 %v6632_v54, %v6703_v61  ;;  %v7373_v54 = vand.u32 4294901760, %v6664_v10 }
 0x347   :  { %3346 = vmatpush.msrb.mxu0 %v6679_v53  ;;  %3412 = vmatpush.msrb.mxu1 %v6655_v16 }
 0x348   :  { %2994 = vmatpush.msra.mxu3 %v6495_v62  ;;  %v6710_v62 = vsub.f32 %v6603_v3, %v6685_v20  ;;  %v7230_v3 = vand.u32 4294901760, %v6679_v53  ;;  %v3234_v41 = vsub.f32 %v6664_v10, %v7373_v54 }
 0x349   :  { %3349 = vmatpush.msrb.mxu0 %v6689_v5  ;;  %3414 = vmatpush.msrb.mxu1 %v6667_v35 }
 0x34a   :  { %2652 = vmatmul.f32.vlgmr.msra.gmra.mxu2 %v2651_v26  ;;  %2705 = vmatmul.f32.gmra.mxu3 %v6598_v56  ;;  %v2658_v26 = vsub.f32 %v6613_v51, %v7371_v25  ;;  %v6739_v51 = vand.u32 4294901760, %v3125_v49  ;;  %v3119_v25 = vpop.permute.xlu1 %3118  ;;  %v3240_v54 = vsub.f32 %v6679_v53, %v7230_v3  ;;  %v3117_v3 = vpop.permute.xlu2 %3116 }
 0x34b   :  { %3352 = vmatpush.msrb.mxu0 %v6699_v0  ;;  %3416 = vmatpush.msrb.mxu1 %v6676_v57  ;;  %v6780_v18 = vand.u32 4294901760, %v3119_v25 }
 0x34c   :  { %2996 = vmatpush.msra.mxu3 %v6509_v11  ;;  %2956 = vmatpush.msra.mxu2 %v6488_v31  ;;  %v6737_v11 = vsub.f32 %v3129_v55, %v6713_v23  ;;  %v6749_v55 = vand.u32 4294901760, %v3123_v60  ;;  %v3229_v31 = vand.u32 4294901760, %v3228_v38  ;;  %v6764_v48 = vsub.f32 %v3125_v49, %v6739_v51 }
 0x34d   :  { %3355 = vmatpush.msrb.mxu0 %v6710_v62  ;;  %3418 = vmatpush.msrb.mxu1 %v6685_v20  ;;  %v3235_v38 = vand.u32 4294901760, %v3234_v41  ;;  %v3241_v49 = vand.u32 4294901760, %v3240_v54 }
 0x34e   :  { %2959 = vmatpush.msra.mxu2 %v6504_v44  ;;  %2893 = vmatmul.f32.gmra.mxu0 %v2892_v33  ;;  %v2659_v44 = vand.u32 4294901760, %v2658_v26  ;;  %v6752_v33 = vsub.f32 %v3127_v2, %v6723_v19  ;;  %v7374_v2 = vand.u32 4294901760, %v6689_v5  ;;  %v6792_v26 = vand.u32 4294901760, %v3117_v3 }
 0x34f   :  { %3358 = vmatpush.msrb.mxu0 %v6730_v4  ;;  %3420 = vmatpush.msrb.mxu1 %v6703_v61 }
 0x350   :  { %2962 = vmatpush.msra.mxu2 %v6507_v46  ;;  %2938 = vmatmul.f32.gmra.mxu1 %v6640_v40  ;;  %v6761_v46 = vand.u32 4294901760, %v3121_v30  ;;  %v3246_v28 = vsub.f32 %v6689_v5, %v7374_v2 }
 0x351   :  { %3361 = vmatpush.msrb.mxu0 %v6737_v11  ;;  %3422 = vmatpush.msrb.mxu1 %v6713_v23 }
 0x352   :  { %2660 = vmatmul.f32.gmra.mxu2 %v2659_v44  ;;  %2835 = vmatmul.f32.vlgmr.msrb.gmra.mxu3 %v6578_v27  ;;  %v6773_v44 = vsub.f32 %v3123_v60, %v6749_v55  ;;  %v3115_v60 = vpop.permute.xlu0 %3114  ;;  %v3247_v54 = vand.u32 4294901760, %v3246_v28  ;;  %v3113_v34 = vpop.permute.xlu1 %3112  ;;  %v6800_v28 = vsub.f32 %v3119_v25, %v6780_v18 }
 0x353   :  { %3230 = vmatpush.msrb.mxu3 %v3229_v31  ;;  %3364 = vmatpush.msrb.mxu0 %v6752_v33  ;;  %v7375_v31 = vand.u32 4294901760, %v6699_v0  ;;  %v6797_v1 = vand.u32 4294901760, %v3115_v60  ;;  %v6812_v43 = vand.u32 4294901760, %v3113_v34 }
 0x354   :  { %3424 = vmatpush.msrb.mxu1 %v6723_v19  ;;  %2965 = vmatpush.msra.mxu2 %v6526_v63  ;;  %v6785_v63 = vsub.f32 %v3121_v30, %v6761_v46 }
 0x355   :  { %3236 = vmatpush.msrb.mxu3 %v3235_v38  ;;  %3367 = vmatpush.msrb.mxu0 %v6764_v48  ;;  %v3252_v41 = vsub.f32 %v6699_v0, %v7375_v31  ;;  %v7376_v38 = vand.u32 4294901760, %v6710_v62 }
 0x356   :  { %3426 = vmatpush.msrb.mxu1 %v6739_v51  ;;  %3039 = vmatmul.f32.vlgmr.msra.gmra.mxu0 %v6600_v12 }
 0x357   :  { %3242 = vmatpush.msrb.mxu3 %v3241_v49  ;;  %3370 = vmatpush.msrb.mxu0 %v6773_v44  ;;  %v3258_v2 = vsub.f32 %v6710_v62, %v7376_v38  ;;  %v3253_v30 = vand.u32 4294901760, %v3252_v41  ;;  %v7377_v38 = vand.u32 4294901760, %v6730_v4  ;;  %v6809_v41 = vsub.f32 %v3117_v3, %v6792_v26 }
 0x358   :  { %3428 = vmatpush.msrb.mxu1 %v6749_v55  ;;  %v6822_v3 = vsub.f32 %v3115_v60, %v6797_v1 }
 0x359   :  { %3248 = vmatpush.msrb.mxu3 %v3247_v54  ;;  %3373 = vmatpush.msrb.mxu0 %v6785_v63  ;;  %v3264_v31 = vsub.f32 %v6730_v4, %v7377_v38  ;;  %v3259_v54 = vand.u32 4294901760, %v3258_v2  ;;  %v7379_v38 = vand.u32 4294901760, %v6752_v33  ;;  %v7380_v2 = vand.u32 4294901760, %v6764_v48 }
 0x35a   :  { %3430 = vmatpush.msrb.mxu1 %v6761_v46  ;;  %2806 = vmatmul.f32.vlgmr.msrb.gmra.mxu2 %v6578_v27  ;;  %v7378_v27 = vand.u32 4294901760, %v6737_v11 }
 0x35b   :  { %3161 = vmatpush.msrb.mxu2 %v6645_v36  ;;  %3254 = vmatpush.msrb.mxu3 %v3253_v30  ;;  %v3265_v30 = vand.u32 4294901760, %v3264_v31  ;;  %v3276_v49 = vsub.f32 %v6752_v33, %v7379_v38  ;;  %v3282_v31 = vsub.f32 %v6764_v48, %v7380_v2  ;;  %v7382_v38 = vand.u32 4294901760, %v6785_v63 }
 0x35c   :  { %3376 = vmatpush.msrb.mxu0 %v6800_v28  ;;  %3432 = vmatpush.msrb.mxu1 %v6780_v18  ;;  %v3270_v25 = vsub.f32 %v6737_v11, %v7378_v27  ;;  %v6833_v27 = vsub.f32 %v3113_v34, %v6812_v43  ;;  %v7381_v34 = vand.u32 4294901760, %v6773_v44 }
 0x35d   :  { %3163 = vmatpush.msrb.mxu2 %v6648_v42  ;;  %3260 = vmatpush.msrb.mxu3 %v3259_v54  ;;  %v3277_v54 = vand.u32 4294901760, %v3276_v49  ;;  %v3283_v2 = vand.u32 4294901760, %v3282_v31 }
 0x35e   :  { %3379 = vmatpush.msrb.mxu0 %v6809_v41  ;;  %3434 = vmatpush.msrb.mxu1 %v6792_v26  ;;  %v3271_v60 = vand.u32 4294901760, %v3270_v25  ;;  %v3317_v31 = vand.u32 4294901760, %v6833_v27 }
 0x35f   :  { %2839 = vmatmul.f32.gmra.mxu3 %v6598_v56  ;;  %3165 = vmatpush.msrb.mxu2 %v6655_v16 }
 0x360   :  { %3266 = vmatpush.msrb.mxu3 %v3265_v30  ;;  %3382 = vmatpush.msrb.mxu0 %v6822_v3  ;;  %v3288_v30 = vsub.f32 %v6773_v44, %v7381_v34  ;;  %v7383_v34 = vand.u32 4294901760, %v6800_v28 }
 0x361   :  { %3436 = vmatpush.msrb.mxu1 %v6797_v1  ;;  %3167 = vmatpush.msrb.mxu2 %v6667_v35 }
 0x362   :  { %3272 = vmatpush.msrb.mxu3 %v3271_v60  ;;  %3385 = vmatpush.msrb.mxu0 %v6833_v27  ;;  %v3294_v60 = vsub.f32 %v6785_v63, %v7382_v38  ;;  %v3300_v25 = vsub.f32 %v6800_v28, %v7383_v34  ;;  %v7385_v38 = vand.u32 4294901760, %v6809_v41 }
 0x363   :  { %3438 = vmatpush.msrb.mxu1 %v6812_v43  ;;  %2810 = vmatmul.f32.gmra.mxu2 %v6598_v56  ;;  %v3289_v56 = vand.u32 4294901760, %v3288_v30 }
 0x364   :  { %3169 = vmatpush.msrb.mxu2 %v6676_v57  ;;  %3278 = vmatpush.msrb.mxu3 %v3277_v54  ;;  %v7384_v54 = vand.u32 4294901760, %v6610_v47  ;;  %v3306_v49 = vsub.f32 %v6809_v41, %v7385_v38  ;;  %v3301_v30 = vand.u32 4294901760, %v3300_v25 }
 0x365   :  { %3068 = vmatmul.f32.vlgmr.msra.gmra.mxu1 %v6600_v12  ;;  %3043 = vmatmul.f32.gmra.mxu0 %v6640_v40  ;;  %v3295_v12 = vand.u32 4294901760, %v3294_v60  ;;  %v3318_v60 = vsub.f32 %v6833_v27, %v3317_v31 }
 0x366   :  { %3171 = vmatpush.msrb.mxu2 %v6685_v20  ;;  %3284 = vmatpush.msrb.mxu3 %v3283_v2  ;;  %v7386_v2 = vand.u32 4294901760, %v6822_v3 }
 0x367   :  { %3000 = vmatmul.f32.vlgmr.msra.gmra.mxu3 %v7384_v54  ;;  %v3307_v54 = vand.u32 4294901760, %v3306_v49 }
 0x368   :  { %3173 = vmatpush.msrb.mxu2 %v6703_v61  ;;  %3290 = vmatpush.msrb.mxu3 %v3289_v56  ;;  %v3312_v34 = vsub.f32 %v6822_v3, %v7386_v2  ;;  %v7387_v56 = vand.u32 4294901760, %v6651_v50 }
 0x36a   :  { %3175 = vmatpush.msrb.mxu2 %v6713_v23  ;;  %3296 = vmatpush.msrb.mxu3 %v3295_v12  ;;  %v3313_v25 = vand.u32 4294901760, %v3312_v34 }
 0x36b   :  { %2968 = vmatmul.f32.vlgmr.msra.gmra.mxu2 %v6610_v47  ;;  %v3319_v47 = vand.u32 4294901760, %v3318_v60 }
 0x36c   :  { %3177 = vmatpush.msrb.mxu2 %v6723_v19  ;;  %3302 = vmatpush.msrb.mxu3 %v3301_v30 }
 0x36d   :  { %3072 = vmatmul.f32.gmra.mxu1 %v6640_v40  ;;  %3388 = vmatmul.f32.vlgmr.msrb.gmra.mxu0 %v6143_v59  ;;  %v7388_v59 = vand.u32 4294901760, %v6658_v7  ;;  %v7391_v7 = vand.u32 4294901760, %v6689_v5 }
 0x36e   :  { %3179 = vmatpush.msrb.mxu2 %v6739_v51  ;;  %3308 = vmatpush.msrb.mxu3 %v3307_v54 }
 0x36f   :  { %3006 = vmatmul.f32.gmra.mxu3 %v7387_v56 }
 0x370   :  { %3181 = vmatpush.msrb.mxu2 %v6749_v55  ;;  %3314 = vmatpush.msrb.mxu3 %v3313_v25 }
 0x372   :  { %3183 = vmatpush.msrb.mxu2 %v6761_v46  ;;  %3320 = vmatpush.msrb.mxu3 %v3319_v47 }
 0x373   :  { %2973 = vmatmul.f32.gmra.mxu2 %v6651_v50 }
 0x374   :  { %3546 = vmatpush.msra.mxu3 %v6645_v36  ;;  %3185 = vmatpush.msrb.mxu2 %v6780_v18 }
 0x375   :  { %3442 = vmatmul.f32.vlgmr.msrb.gmra.mxu1 %v6178_v45  ;;  %3393 = vmatmul.f32.gmra.mxu0 %v6207_v58  ;;  %v7389_v45 = vand.u32 4294901760, %v6664_v10  ;;  %v7390_v58 = vand.u32 4294901760, %v6679_v53 }
 0x376   :  { %3548 = vmatpush.msra.mxu3 %v6648_v42  ;;  %3187 = vmatpush.msrb.mxu2 %v6792_v26 }
 0x377   :  { %3322 = vmatmul.f32.vlgmr.msrb.gmra.mxu3 %v6115_v24 }
 0x378   :  { %3550 = vmatpush.msra.mxu3 %v6655_v16  ;;  %3189 = vmatpush.msrb.mxu2 %v6797_v1 }
 0x37a   :  { %3552 = vmatpush.msra.mxu3 %v6667_v35  ;;  %3191 = vmatpush.msrb.mxu2 %v6812_v43 }
 0x37b   :  { %3197 = vmatmul.f32.vlgmr.msrb.gmra.mxu2 %v6226_v14  ;;  %v7392_v14 = vand.u32 4294901760, %v6699_v0 }
 0x37c   :  { %3467 = vmatpush.msra.mxu2 %v7388_v59  ;;  %3554 = vmatpush.msra.mxu3 %v6676_v57 }
 0x37d   :  { %3448 = vmatmul.f32.gmra.mxu1 %v6229_v22  ;;  %3398 = vmatmul.f32.gmra.mxu0 %v6250_v15  ;;  %v7393_v22 = vand.u32 4294901760, %v6710_v62  ;;  %v7394_v15 = vand.u32 4294901760, %v6730_v4  ;;  %v7399_v4 = vand.u32 4294901760, %v6785_v63 }
 0x37e   :  { %3471 = vmatpush.msra.mxu2 %v7389_v45  ;;  %3556 = vmatpush.msra.mxu3 %v6685_v20 }
 0x37f   :  { %3326 = vmatmul.f32.gmra.mxu3 %v6180_v17 }
 0x380   :  { %3475 = vmatpush.msra.mxu2 %v7390_v58  ;;  %3558 = vmatpush.msra.mxu3 %v6703_v61 }
 0x382   :  { %3479 = vmatpush.msra.mxu2 %v7391_v7  ;;  %3560 = vmatpush.msra.mxu3 %v6713_v23 }
 0x383   :  { %3205 = vmatmul.f32.gmra.mxu2 %v6261_v32  ;;  %v7396_v32 = vand.u32 4294901760, %v6752_v33 }
 0x384   :  { %3483 = vmatpush.msra.mxu2 %v7392_v14  ;;  %3562 = vmatpush.msra.mxu3 %v6723_v19  ;;  %v7395_v19 = vand.u32 4294901760, %v6737_v11 }
 0x385   :  { %3454 = vmatmul.f32.gmra.mxu1 %v6264_v9  ;;  %3403 = vmatmul.f32.gmra.mxu0 %v6278_v37  ;;  %v7397_v9 = vand.u32 4294901760, %v6764_v48  ;;  %v7398_v37 = vand.u32 4294901760, %v6773_v44 }
 0x386   :  { %3487 = vmatpush.msra.mxu2 %v7393_v22  ;;  %3564 = vmatpush.msra.mxu3 %v6739_v51 }
 0x387   :  { %3330 = vmatmul.f32.gmra.mxu3 %v6231_v13 }
 0x388   :  { %3491 = vmatpush.msra.mxu2 %v7394_v15  ;;  %3566 = vmatpush.msra.mxu3 %v6749_v55 }
 0x38a   :  { %3495 = vmatpush.msra.mxu2 %v7395_v19  ;;  %3568 = vmatpush.msra.mxu3 %v6761_v46 }
 0x38b   :  { %3213 = vmatmul.f32.gmra.mxu2 %v6288_v39  ;;  %v7400_v39 = vand.u32 4294901760, %v6800_v28 }
 0x38c   :  { %3499 = vmatpush.msra.mxu2 %v7396_v32  ;;  %3570 = vmatpush.msra.mxu3 %v6780_v18  ;;  %v7401_v18 = vmov %v7385_v38 }
 0x38d   :  { %3460 = vmatmul.f32.gmra.mxu1 %v6291_v21  ;;  %v7402_v21 = vmov %v7386_v2 }
 0x38e   :  { %3503 = vmatpush.msra.mxu2 %v7397_v9  ;;  %3572 = vmatpush.msra.mxu3 %v6792_v26 }
 0x38f   :  { %3334 = vmatmul.f32.gmra.mxu3 %v6266_v29 }
 0x390   :  { %3507 = vmatpush.msra.mxu2 %v7398_v37  ;;  %3574 = vmatpush.msra.mxu3 %v6797_v1 }
 0x392   :  { %3511 = vmatpush.msra.mxu2 %v7399_v4  ;;  %3576 = vmatpush.msra.mxu3 %v6812_v43 }
 0x393   :  { %3221 = vmatmul.f32.gmra.mxu2 %v6311_v8 }
 0x394   :  { %3515 = vmatpush.msra.mxu2 %v7400_v39 }
 0x396   :  { %3519 = vmatpush.msra.mxu2 %v7401_v18 }
 0x397   :  { %3578 = vmatmul.f32.vlgmr.msra.gmra.mxu3 %v6115_v24 }
 0x398   :  { %3523 = vmatpush.msra.mxu2 %v7402_v21 }
 0x39a   :  { %3527 = vmatpush.msra.mxu2 %v3317_v31 }
 0x39b   :  { %3529 = vmatmul.f32.vlgmr.msra.gmra.mxu2 %v6115_v24 }
 0x39e   :  { %v2583_v16 = vpop.f32.mrf.mxu0 }
 0x39f   :  { %3582 = vmatmul.f32.gmra.mxu3 %v6180_v17  ;;  %v2612_v42 = vpop.f32.mrf.mxu1 }
 0x3a3   :  { %3533 = vmatmul.f32.gmra.mxu2 %v6180_v17 }
 0x3a4   :  { %v2478_v1 = vpop.f32.mrf.mxu3 }
 0x3a7   :  { %3586 = vmatmul.f32.gmra.mxu3 %v6231_v13  ;;  %v2587_v10 = vpop.f32.mrf.mxu0  ;;  %v2616_v35 = vpop.f32.mrf.mxu1 }
 0x3ab   :  { %3537 = vmatmul.f32.gmra.mxu2 %v6231_v13 }
 0x3ac   :  { %v2429_v8 = vpop.f32.mrf.mxu2  ;;  %v2482_v43 = vpop.f32.mrf.mxu3 }
 0x3ad   :  { %v2479_v61 = vadd.f32 %v2478_v1, %v2429_v8  ;;  %v6959_v1 = vpop.permute.xlu2 %3080 }
 0x3af   :  { %3590 = vmatmul.f32.gmra.mxu3 %v6266_v29  ;;  %v2736_v53 = vpop.f32.mrf.mxu0  ;;  %v2768_v20 = vpop.f32.mrf.mxu1 }
 0x3b3   :  { %3541 = vmatmul.f32.gmra.mxu2 %v6266_v29 }
 0x3b4   :  { %v2437_v40 = vpop.f32.mrf.mxu2  ;;  %v2544_v36 = vpop.f32.mrf.mxu3 }
 0x3b5   :  { %v2483_v55 = vadd.f32 %v2482_v43, %v2437_v40 }
 0x3b7   :  { %v2741_v0 = vpop.f32.mrf.mxu0  ;;  %v2774_v62 = vpop.f32.mrf.mxu1 }
 0x3bc   :  { %v2512_v24 = vpop.f32.mrf.mxu2  ;;  %v2550_v50 = vpop.f32.mrf.mxu3 }
 0x3bd   :  { %v2513_v23 = vadd.f32 %v2512_v24, %v2479_v61 }
 0x3bf   :  { %v2545_v48 = vadd.f32 %v2544_v36, %v2513_v23  ;;  %v2886_v29 = vpop.f32.mrf.mxu0  ;;  %v2935_v44 = vpop.f32.mrf.mxu1 }
 0x3c0   :  { %v2936_v60 = vadd.f32 %v2935_v44, %v2886_v29 }
 0x3c1   :  { %v2584_v26 = vadd.f32 %v2583_v16, %v2545_v48 }
 0x3c3   :  { %v2613_v28 = vadd.f32 %v2612_v42, %v2584_v26 }
 0x3c4   :  { %v2517_v17 = vpop.f32.mrf.mxu2  ;;  %v2702_v57 = vpop.f32.mrf.mxu3 }
 0x3c5   :  { %v2518_v33 = vadd.f32 %v2517_v17, %v2483_v55  ;;  %v4309_v55 = vld [vmem:[%s7172_s5 + $0x38] sm:$0x1] }
 0x3c6   :  { %v3612_v29 = vsel %vm2399_vm0, %v4309_v55, 0 }
 0x3c7   :  { %v2551_v63 = vadd.f32 %v2550_v50, %v2518_v33  ;;  %v3626_v26 = vand.u32 4294901760, %v3612_v29 }
 0x3c9   :  { %v2588_v27 = vadd.f32 %v2587_v10, %v2551_v63  ;;  %v3664_v44 = vsub.f32 %v3612_v29, %v3626_v26  ;;  %3627 = vmatpush.msra.mxu0 %v3626_v26  ;;  %3814 = vmatpush.msrb.mxu3 %v3626_v26 }
 0x3cb   :  { %v2894_v49 = vpop.f32.mrf.mxu0  ;;  %v2617_v30 = vadd.f32 %v2616_v35, %v2588_v27  ;;  %3629 = vmatpush.msra.mxu0 %v6362_v52  ;;  %3816 = vmatpush.msrb.mxu3 %v6362_v52 }
 0x3cd   :  { %v2653_v5 = vpop.f32.mrf.mxu2  ;;  %v2706_v13 = vpop.f32.mrf.mxu3  ;;  %3631 = vmatpush.msra.mxu0 %v6371_v6  ;;  %3818 = vmatpush.msrb.mxu3 %v6371_v6 }
 0x3ce   :  { %v2654_v3 = vadd.f32 %v2653_v5, %v2613_v28  ;;  %v2939_v38 = vpop.f32.mrf.mxu1  ;;  %v3665_v28 = vand.u32 4294901760, %v3664_v44 }
 0x3cf   :  { %v2940_v9 = vadd.f32 %v2939_v38, %v2894_v49 }
 0x3d0   :  { %v2703_v12 = vadd.f32 %v2702_v57, %v2654_v3  ;;  %v6964_v57 = vpop.permute.xlu0 %3085  ;;  %v3666_v3 = vsub.f32 %v3664_v44, %v3665_v28  ;;  %3779 = vmatpush.msrb.mxu2 %v3665_v28  ;;  %v7415_v28 = vld [vmem:[#allocation8_spill] sm:$0xff] }
 0x3d2   :  { %v2737_v54 = vadd.f32 %v2736_v53, %v2703_v12  ;;  %v3667_v49 = vand.u32 4294901760, %v3666_v3  ;;  %v7404_v12 = vld [vmem:[#allocation7_spill] sm:$0xff] }
 0x3d3   :  { %v3040_v45 = vpop.f32.mrf.mxu0  ;;  %3783 = vmatpush.msrb.mxu2 %v7404_v12 }
 0x3d4   :  { %v2769_v47 = vadd.f32 %v2768_v20, %v2737_v54  ;;  %3668 = vmatpush.msra.mxu1 %v3667_v49 }
 0x3d5   :  { %v2661_v11 = vpop.f32.mrf.mxu2  ;;  %v2836_v51 = vpop.f32.mrf.mxu3 }
 0x3d6   :  { %v2662_v34 = vadd.f32 %v2661_v11, %v2617_v30 }
 0x3d8   :  { %v2707_v56 = vadd.f32 %v2706_v13, %v2662_v34  ;;  %v7406_v34 = vld [vmem:[#allocation34_spill] sm:$0xff] }
 0x3da   :  { %v2742_v22 = vadd.f32 %v2741_v0, %v2707_v56  ;;  %v7408_v56 = vld [vmem:[#allocation25_spill] sm:$0xff] }
 0x3dc   :  { %v2775_v39 = vadd.f32 %v2774_v62, %v2742_v22 }
 0x3dd   :  { %v2807_v46 = vpop.f32.mrf.mxu2 }
 0x3de   :  { %v2808_v58 = vadd.f32 %v2807_v46, %v2769_v47 }
 0x3e0   :  { %v2837_v32 = vadd.f32 %v2836_v51, %v2808_v58  ;;  %v7410_v58 = vld [vmem:[#allocation6_spill] sm:$0xff] }
 0x3e2   :  { %v2840_v41 = vpop.f32.mrf.mxu3  ;;  %v3069_v14 = vpop.f32.mrf.mxu1 }
 0x3e3   :  { %v3044_v40 = vpop.f32.mrf.mxu0 }
 0x3e6   :  { %v2811_v31 = vpop.f32.mrf.mxu2 }
 0x3e7   :  { %v2812_v8 = vadd.f32 %v2811_v31, %v2775_v39  ;;  %v7403_v31 = vld [vmem:[#allocation15_spill] sm:$0xff]  ;;  %v3597_v39 = vld [vmem:[%s7172_s5 + $0x18] sm:$0x1] }
 0x3e8   :  { %3633 = vmatpush.msra.mxu0 %v7403_v31  ;;  %3820 = vmatpush.msrb.mxu3 %v7403_v31 }
 0x3e9   :  { %v2841_v50 = vadd.f32 %v2840_v41, %v2812_v8 }
 0x3ea   :  { %v3001_v2 = vpop.f32.mrf.mxu3  ;;  %v3073_v24 = vpop.f32.mrf.mxu1  ;;  %3710 = vmatpush.msrb.mxu0 %v3664_v44 }
 0x3eb   :  { %v3389_v23 = vpop.f32.mrf.mxu0 }
 0x3ec   :  { %3713 = vmatpush.msrb.mxu0 %v7406_v34 }
 0x3ee   :  { %v2969_v25 = vpop.f32.mrf.mxu2 }
 0x3ef   :  { %v2970_v59 = vadd.f32 %v2969_v25, %v2936_v60  ;;  %v7407_v25 = vld [vmem:[#allocation33_spill] sm:$0xff] }
 0x3f0   :  { %3674 = vmatpush.msra.mxu1 %v7407_v25  ;;  %v7417_v25 = vld [vmem:[#allocation30_spill] sm:$0xff] }
 0x3f1   :  { %v3002_v7 = vadd.f32 %v3001_v2, %v2970_v59  ;;  %v7405_v2 = vld [vmem:[#allocation5_spill] sm:$0xff] }
 0x3f2   :  { %v3007_v19 = vpop.f32.mrf.mxu3  ;;  %v6975_v51 = vpop.f32.mrf.mxu1  ;;  %3787 = vmatpush.msrb.mxu2 %v7405_v2  ;;  %v7409_v59 = vld [vmem:[#allocation9_spill] sm:$0xff]  ;;  %3680 = vmatpush.msra.mxu1 %v7410_v58 }
 0x3f3   :  { %v3041_v15 = vadd.f32 %v3040_v45, %v3002_v7  ;;  %v3394_v33 = vpop.f32.mrf.mxu0  ;;  %3716 = vmatpush.msrb.mxu0 %v7409_v59  ;;  %v7411_v7 = vld [vmem:[#allocation24_spill] sm:$0xff] }
 0x3f4   :  { %3791 = vmatpush.msrb.mxu2 %v7408_v56 }
 0x3f5   :  { %v3070_v37 = vadd.f32 %v3069_v14, %v3041_v15  ;;  %3719 = vmatpush.msrb.mxu0 %v7411_v7  ;;  %v7412_v15 = vld [vmem:[#allocation26_spill] sm:$0xff] }
 0x3f6   :  { %v2974_v4 = vpop.f32.mrf.mxu2  ;;  %3686 = vmatpush.msra.mxu1 %v7412_v15 }
 0x3f7   :  { %v3076_v18 = vadd.f32 %v3070_v37, %v2837_v32  ;;  %v2975_v21 = vadd.f32 %v2974_v4, %v2940_v9 }
 0x3f8   :  { %3744 = vmatpush.msrb.mxu1 %v3626_v26 }
 0x3f9   :  { %v3088_v43 = vadd.f32 %v6959_v1, %v3076_v18  ;;  %v3008_v16 = vadd.f32 %v3007_v19, %v2975_v21 }
 0x3fa   :  { %v6962_v42 = vpop.f32.mrf.mxu3  ;;  %v3449_v63 = vpop.f32.mrf.mxu1  ;;  %3746 = vmatpush.msrb.mxu1 %v6362_v52 }
 0x3fb   :  { %4353 = vtanh.f32 %v3088_v43  ;;  %v3045_v36 = vadd.f32 %v3044_v40, %v3008_v16  ;;  %v3399_v30 = vpop.f32.mrf.mxu0  ;;  %v3836_v43 = vsel %vm2399_vm0, %v3597_v39, 0 }
 0x3fc   :  { %3748 = vmatpush.msrb.mxu1 %v6371_v6 }
 0x3fd   :  { %v3074_v10 = vadd.f32 %v3073_v24, %v3045_v36  ;;  %v7007_v36 = vand.u32 4294901760, %v3836_v43 }
 0x3fe   :  { %v3198_v17 = vpop.f32.mrf.mxu2  ;;  %3750 = vmatpush.msrb.mxu1 %v7403_v31 }
 0x3ff   :  { %v3077_v35 = vadd.f32 %v3074_v10, %v2841_v50  ;;  %v3324_v19 = vadd.f32 %v6962_v42, %v3198_v17  ;;  %v7013_v24 = vsub.f32 %v3836_v43, %v7007_v36  ;;  %3968 = vmatpush.msra.mxu3 %v7007_v36  ;;  %v3595_v10 = vld [vmem:[%s7172_s5 + $0x8] sm:$0xff] }
 0x401   :  { %v4354_v53 = vpop.eup %4353  ;;  %v3089_v20 = vadd.f32 %v6964_v57, %v3077_v35  ;;  %v3390_v21 = vadd.f32 %v3389_v23, %v3324_v19  ;;  %3934 = vmatpush.msra.mxu2 %v7013_v24 }
 0x402   :  { %3093 = vst.msk [vmem:[%s7173_s6] sm:$0xff] %vm3092_vm4, %v4354_v53  ;;  %v3327_v5 = vpop.f32.mrf.mxu3  ;;  %v3455_v45 = vpop.f32.mrf.mxu1  ;;  %v3889_v53 = vand.u32 4294901760, %v7013_v24 }
 0x403   :  { %4355 = vtanh.f32 %v3089_v20  ;;  %v3404_v18 = vpop.f32.mrf.mxu0  ;;  %v3444_v6 = vadd.f32 %v6975_v51, %v3390_v21  ;;  %v7024_v20 = vand.u32 4294901760, %v3595_v10  ;;  %v7414_v51 = vld [vmem:[#allocation3_spill] sm:$0xff] }
 0x404   :  { %v3890_v23 = vsub.f32 %v7013_v24, %v3889_v53  ;;  %3937 = vmatpush.msra.mxu2 %v7414_v51 }
 0x406   :  { %v3206_v13 = vpop.f32.mrf.mxu2  ;;  %v3891_v26 = vand.u32 4294901760, %v3890_v23 }
 0x407   :  { %v3328_v27 = vadd.f32 %v3327_v5, %v3206_v13  ;;  %v7413_v5 = vld [vmem:[#allocation35_spill] sm:$0xff] }
 0x408   :  { %3970 = vmatpush.msra.mxu3 %v7413_v5 }
 0x409   :  { %v4356_v0 = vpop.eup %4355  ;;  %v3395_v60 = vadd.f32 %v3394_v33, %v3328_v27 }
 0x40a   :  { %3095 = vst.msk [vmem:[%s7173_s6 + $0x8] sm:$0x1] %vm3094_vm5, %v4356_v0  ;;  %v3331_v61 = vpop.f32.mrf.mxu3  ;;  %v3461_v50 = vpop.f32.mrf.mxu1  ;;  %3972 = vmatpush.msra.mxu3 %v7024_v20 }
 0x40b   :  { %v3450_v14 = vadd.f32 %v3449_v63, %v3395_v60 }
 0x40c   :  { %3974 = vmatpush.msra.mxu3 %v7415_v28 }
 0x40e   :  { %v3214_v62 = vpop.f32.mrf.mxu2 }
 0x40f   :  { %v3332_v54 = vadd.f32 %v3331_v61, %v3214_v62 }
 0x411   :  { %v3400_v22 = vadd.f32 %v3399_v30, %v3332_v54  ;;  %v4312_v30 = vld [vmem:[%s7172_s5 + $0x50] sm:$0xff]  ;;  %v7416_v54 = vld [vmem:[#allocation27_spill] sm:$0xff] }
 0x412   :  { %v3335_v11 = vpop.f32.mrf.mxu3  ;;  %v7067_v56 = vand.u32 4294901760, %v4312_v30 }
 0x413   :  { %v3456_v37 = vadd.f32 %v3455_v45, %v3400_v22  ;;  %v4310_v22 = vld [vmem:[%s7172_s5 + $0x40] sm:$0xff] }
 0x416   :  { %v3222_v48 = vpop.f32.mrf.mxu2 }
 0x417   :  { %v3336_v9 = vadd.f32 %v3335_v11, %v3222_v48  ;;  %v7033_v11 = vsub.f32 %v3595_v10, %v7024_v20 }
 0x419   :  { %v3405_v52 = vadd.f32 %v3404_v18, %v3336_v9  ;;  %3940 = vmatpush.msra.mxu2 %v7033_v11  ;;  %v3901_v31 = vand.u32 4294901760, %v7033_v11  ;;  %v7090_v18 = vand.u32 4294901760, %v4310_v22 }
 0x41a   :  { %v6981_v46 = vpop.f32.mrf.mxu3 }
 0x41b   :  { %v3462_v0 = vadd.f32 %v3461_v50, %v3405_v52  ;;  %3943 = vmatpush.msra.mxu2 %v7416_v54  ;;  %v7098_v52 = vsub.f32 %v4310_v22, %v7090_v18  ;;  %v7418_v50 = vld [vmem:[#allocation4_spill] sm:$0xff] }
 0x41e   :  { %v3530_v41 = vpop.f32.mrf.mxu2 }
 0x41f   :  { %v3531_v13 = vadd.f32 %v3530_v41, %v3444_v6  ;;  %v4313_v41 = vld [vmem:[%s7172_s5 + $0x58] sm:$0x1] }
 0x420   :  { %v4067_v3 = vsel %vm2399_vm0, %v4313_v41, 0 }
 0x421   :  { %v3580_v27 = vadd.f32 %v6981_v46, %v3531_v13  ;;  %v7048_v12 = vand.u32 4294901760, %v4067_v3  ;;  %v3902_v46 = vsub.f32 %v7033_v11, %v3901_v31 }
 0x422   :  { %v3583_v38 = vpop.f32.mrf.mxu3 }
 0x423   :  { %v7063_v60 = vsub.f32 %v4067_v3, %v7048_v12  ;;  %v3831_v59 = vsel %vm2394_vm2, %v3580_v27, 0  ;;  %v3903_v58 = vand.u32 4294901760, %v3902_v46 }
 0x426   :  { %v3534_v47 = vpop.f32.mrf.mxu2 }
 0x427   :  { %v3535_v32 = vadd.f32 %v3534_v47, %v3450_v14  ;;  %v4311_v47 = vld [vmem:[%s7172_s5 + $0x48] sm:$0xff]  ;;  %v4120_v14 = vand.u32 4294901760, %v7063_v60 }
 0x428   :  { %v7084_v9 = vand.u32 4294901760, %v4311_v47 }
 0x429   :  { %v7005_v16 = vadd.f32 %v3583_v38, %v3535_v32  ;;  %v7082_v32 = vsub.f32 %v4312_v30, %v7067_v56  ;;  %v4121_v39 = vsub.f32 %v7063_v60, %v4120_v14 }
 0x42a   :  { %v3587_v4 = vpop.f32.mrf.mxu3 }
 0x42b   :  { %v3604_v35 = vrot.slane %v7005_v16, 1  ;;  %v4126_v21 = vand.u32 4294901760, %v7082_v32  ;;  %v3833_v13 = vsel %vm2394_vm2, %v7005_v16, 0 }
 0x42d   :  { %v4127_v6 = vsub.f32 %v7082_v32, %v4126_v21 }
 0x42e   :  { %v3538_v8 = vpop.f32.mrf.mxu2 }
 0x42f   :  { %v3539_v40 = vadd.f32 %v3538_v8, %v3456_v37  ;;  %v7086_v37 = vand.u32 4294901760, %v3831_v59  ;;  %v7094_v8 = vsub.f32 %v4311_v47, %v7084_v9 }
 0x431   :  { %v7010_v42 = vadd.f32 %v3587_v4, %v3539_v40  ;;  %v4122_v40 = vand.u32 4294901760, %v4121_v39  ;;  %v4132_v10 = vand.u32 4294901760, %v7094_v8 }
 0x432   :  { %v3591_v63 = vpop.f32.mrf.mxu3 }
 0x433   :  { %v3605_v17 = vrot.slane %v7010_v42, 1  ;;  %v4059_v4 = vrot.slane %v7010_v42, 2 }
 0x435   :  { %v3606_v61 = vsel %vm2390_vm1, %v3604_v35, %v3605_v17  ;;  %v3609_v62 = vsel %vm2394_vm2, %v3605_v17, 0  ;;  %v3859_v35 = vsub.f32 %v3831_v59, %v7086_v37  ;;  %v4138_v17 = vand.u32 4294901760, %v7098_v52 }
 0x436   :  { %v3607_v48 = vsel %vm2394_vm2, %v3606_v61, 0  ;;  %v3542_v55 = vpop.f32.mrf.mxu2  ;;  %v3642_v33 = vand.u32 4294901760, %v3609_v62  ;;  %v4128_v61 = vand.u32 4294901760, %v4127_v6 }
 0x437   :  { %v3634_v29 = vand.u32 4294901760, %v3607_v48  ;;  %v3543_v44 = vadd.f32 %v3542_v55, %v3462_v0  ;;  %v4139_v23 = vsub.f32 %v7098_v52, %v4138_v17  ;;  %v7116_v55 = vand.u32 4294901760, %v3833_v13 }
 0x438   :  { %v7056_v34 = vsub.f32 %v3609_v62, %v3642_v33  ;;  %v4133_v62 = vsub.f32 %v7094_v8, %v4132_v10 }
 0x439   :  { %v7045_v49 = vsub.f32 %v3607_v48, %v3634_v29  ;;  %3688 = vmatmul.f32.vlgmr.msra.gmra.mxu1 %v3634_v29  ;;  %3793 = vmatmul.f32.vlgmr.msrb.gmra.mxu2 %v3634_v29  ;;  %v7050_v38 = vadd.f32 %v3591_v63, %v3543_v44  ;;  %v3860_v48 = vand.u32 4294901760, %v3859_v35 }
 0x43a   :  { %3822 = vmatmul.f32.vlgmr.msrb.gmra.mxu3 %v3634_v29  ;;  %3892 = vmatpush.msra.mxu1 %v3891_v26  ;;  %v3644_v19 = vand.u32 4294901760, %v7056_v34  ;;  %v4134_v16 = vand.u32 4294901760, %v4133_v62  ;;  %v3867_v26 = vsub.f32 %v3833_v13, %v7116_v55 }
 0x43b   :  { %v3636_v2 = vand.u32 4294901760, %v7045_v49  ;;  %4082 = vmatpush.msrb.mxu2 %v7048_v12  ;;  %v4060_v7 = vrot.slane %v7050_v38, 2  ;;  %4123 = vmatpush.msrb.mxu3 %v4122_v40  ;;  %v3861_v24 = vsub.f32 %v3859_v35, %v3860_v48 }
 0x43c   :  { %3898 = vmatpush.msra.mxu1 %v7417_v25  ;;  %v3645_v42 = vsub.f32 %v7056_v34, %v3644_v19  ;;  %v3868_v27 = vand.u32 4294901760, %v3867_v26 }
 0x43d   :  { %v3637_v45 = vsub.f32 %v7045_v49, %v3636_v2  ;;  %4084 = vmatpush.msrb.mxu2 %v7067_v56  ;;  %v4061_v43 = vsel %vm2849_vm3, %v4059_v4, %v4060_v7  ;;  %4129 = vmatpush.msrb.mxu3 %v4128_v61  ;;  %v4064_v63 = vsel %vm2394_vm2, %v4060_v7, 0  ;;  %v3862_v11 = vand.u32 4294901760, %v3861_v24 }
 0x43e   :  { %3904 = vmatpush.msra.mxu1 %v3903_v58  ;;  %v4062_v0 = vsel %vm2394_vm2, %v4061_v43, 0  ;;  %v3646_v51 = vand.u32 4294901760, %v3645_v42  ;;  %v4097_v3 = vand.u32 4294901760, %v4064_v63  ;;  %v3869_v30 = vsub.f32 %v3867_v26, %v3868_v27 }
 0x43f   :  { %v3638_v15 = vand.u32 4294901760, %v3637_v45  ;;  %4086 = vmatpush.msrb.mxu2 %v7084_v9  ;;  %v7118_v29 = vand.u32 4294901760, %v4062_v0  ;;  %4135 = vmatpush.msrb.mxu3 %v4134_v16 }
 0x440   :  { %3910 = vmatpush.msra.mxu1 %v7418_v50 }
 0x441   :  { %3639 = vmatmul.f32.vlgmr.msra.gmra.mxu0 %v3638_v15  ;;  %3692 = vmatmul.f32.gmra.mxu1 %v3642_v33  ;;  %v4090_v44 = vsub.f32 %v4062_v0, %v7118_v29 }
 0x442   :  { %3797 = vmatmul.f32.gmra.mxu2 %v3642_v33  ;;  %3826 = vmatmul.f32.gmra.mxu3 %v3642_v33  ;;  %v4140_v33 = vand.u32 4294901760, %v4139_v23 }
 0x443   :  { %3851 = vmatpush.msra.mxu0 %v7007_v36  ;;  %4088 = vmatpush.msrb.mxu2 %v7090_v18  ;;  %v4091_v41 = vand.u32 4294901760, %v4090_v44 }
 0x444   :  { %4141 = vmatpush.msrb.mxu3 %v4140_v33 }
 0x445   :  { %3853 = vmatpush.msra.mxu0 %v7413_v5 }
 0x447   :  { %3855 = vmatpush.msra.mxu0 %v7024_v20 }
 0x449   :  { %3647 = vmatmul.f32.gmra.mxu0 %v3646_v51  ;;  %3754 = vmatmul.f32.vlgmr.msrb.gmra.mxu1 %v3636_v2 }
 0x44a   :  { %3946 = vmatmul.f32.vlgmr.msra.gmra.mxu2 %v3859_v35  ;;  %3978 = vmatmul.f32.vlgmr.msra.gmra.mxu3 %v3860_v48 }
 0x44b   :  { %3857 = vmatpush.msra.mxu0 %v7415_v28  ;;  %4038 = vmatpush.msrb.mxu1 %v7007_v36  ;;  %v4092_v36 = vsub.f32 %v4090_v44, %v4091_v41 }
 0x44c   :  { %4234 = vmatpush.msra.mxu2 %v4120_v14  ;;  %4269 = vmatpush.msra.mxu3 %v7048_v12 }
 0x44d   :  { %4040 = vmatpush.msrb.mxu1 %v7413_v5  ;;  %v4098_v5 = vsub.f32 %v4064_v63, %v4097_v3 }
 0x44e   :  { %4238 = vmatpush.msra.mxu2 %v4126_v21  ;;  %4271 = vmatpush.msra.mxu3 %v7067_v56 }
 0x44f   :  { %4042 = vmatpush.msrb.mxu1 %v7024_v20  ;;  %v7419_v20 = vld [vmem:[#allocation10_spill] sm:$0xff]  ;;  %v4099_v38 = vand.u32 4294901760, %v4098_v5 }
 0x450   :  { %4242 = vmatpush.msra.mxu2 %v4132_v10  ;;  %4273 = vmatpush.msra.mxu3 %v7084_v9 }
 0x451   :  { %3722 = vmatmul.f32.vlgmr.msrb.gmra.mxu0 %v7045_v49  ;;  %3760 = vmatmul.f32.gmra.mxu1 %v3644_v19  ;;  %v4093_v49 = vand.u32 4294901760, %v4092_v36 }
 0x452   :  { %3951 = vmatmul.f32.gmra.mxu2 %v3867_v26  ;;  %3984 = vmatmul.f32.gmra.mxu3 %v3868_v27 }
 0x453   :  { %4003 = vmatpush.msrb.mxu0 %v3889_v53  ;;  %4044 = vmatpush.msrb.mxu1 %v7415_v28  ;;  %v7420_v53 = vld [vmem:[#allocation16_spill] sm:$0xff]  ;;  %v4100_v28 = vsub.f32 %v4098_v5, %v4099_v38 }
 0x454   :  { %4246 = vmatpush.msra.mxu2 %v4138_v17  ;;  %4275 = vmatpush.msra.mxu3 %v7090_v18 }
 0x455   :  { %4007 = vmatpush.msrb.mxu0 %v7419_v20 }
 0x457   :  { %4011 = vmatpush.msrb.mxu0 %v3901_v31  ;;  %v4101_v31 = vand.u32 4294901760, %v4100_v28 }
 0x459   :  { %3727 = vmatmul.f32.gmra.mxu0 %v7056_v34  ;;  %3912 = vmatmul.f32.vlgmr.msra.gmra.mxu1 %v7086_v37 }
 0x45a   :  { %4094 = vmatmul.f32.vlgmr.msrb.gmra.mxu2 %v4093_v49  ;;  %4143 = vmatmul.f32.vlgmr.msrb.gmra.mxu3 %v7118_v29 }
 0x45b   :  { %4015 = vmatpush.msrb.mxu0 %v7420_v53  ;;  %4199 = vmatpush.msra.mxu1 %v7048_v12  ;;  %v3870_v12 = vand.u32 4294901760, %v3869_v30 }
 0x45d   :  { %4201 = vmatpush.msra.mxu1 %v7067_v56 }
 0x45f   :  { %4203 = vmatpush.msra.mxu1 %v7084_v9 }
 0x461   :  { %3863 = vmatmul.f32.vlgmr.msra.gmra.mxu0 %v3862_v11  ;;  %3916 = vmatmul.f32.gmra.mxu1 %v7116_v55 }
 0x462   :  { %4102 = vmatmul.f32.gmra.mxu2 %v4101_v31  ;;  %4147 = vmatmul.f32.gmra.mxu3 %v4097_v3 }
 0x463   :  { %4165 = vmatpush.msra.mxu0 %v7063_v60  ;;  %4205 = vmatpush.msra.mxu1 %v7090_v18 }
 0x465   :  { %4168 = vmatpush.msra.mxu0 %v7082_v32 }
 0x467   :  { %4171 = vmatpush.msra.mxu0 %v7094_v8 }
 0x469   :  { %3871 = vmatmul.f32.gmra.mxu0 %v3870_v12  ;;  %4046 = vmatmul.f32.vlgmr.msrb.gmra.mxu1 %v7086_v37 }
 0x46a   :  { %4248 = vmatmul.f32.vlgmr.msra.gmra.mxu2 %v7118_v29  ;;  %4277 = vmatmul.f32.vlgmr.msra.gmra.mxu3 %v7118_v29 }
 0x46b   :  { %4174 = vmatpush.msra.mxu0 %v7098_v52 }
 0x471   :  { %4017 = vmatmul.f32.vlgmr.msrb.gmra.mxu0 %v7086_v37  ;;  %4050 = vmatmul.f32.gmra.mxu1 %v7116_v55 }
 0x472   :  { %4252 = vmatmul.f32.gmra.mxu2 %v4097_v3  ;;  %4281 = vmatmul.f32.gmra.mxu3 %v4097_v3 }
 0x479   :  { %4021 = vmatmul.f32.gmra.mxu0 %v7116_v55  ;;  %4209 = vmatmul.f32.vlgmr.msra.gmra.mxu1 %v4091_v41 }
 0x481   :  { %4177 = vmatmul.f32.vlgmr.msra.gmra.mxu0 %v4090_v44  ;;  %4215 = vmatmul.f32.gmra.mxu1 %v4099_v38 }
 0x489   :  { %4182 = vmatmul.f32.gmra.mxu0 %v4098_v5 }
 0x4b6   :  { %v3689_v2 = vpop.f32.mrf.mxu1 }
 0x4bc   :  { %v3794_v54 = vpop.f32.mrf.mxu2 }
 0x4bd   :  { %v3823_v60 = vpop.f32.mrf.mxu3 }
 0x4be   :  { %v3640_v34 = vpop.f32.mrf.mxu0  ;;  %v3693_v46 = vpop.f32.mrf.mxu1 }
 0x4bf   :  { %v3690_v37 = vadd.f32 %v3689_v2, %v3640_v34 }
 0x4c5   :  { %v3798_v47 = vpop.f32.mrf.mxu2  ;;  %v3827_v58 = vpop.f32.mrf.mxu3 }
 0x4c6   :  { %v3648_v25 = vpop.f32.mrf.mxu0  ;;  %v3755_v56 = vpop.f32.mrf.mxu1 }
 0x4c7   :  { %v3694_v43 = vadd.f32 %v3693_v46, %v3648_v25 }
 0x4cd   :  { %v3947_v22 = vpop.f32.mrf.mxu2  ;;  %v3979_v15 = vpop.f32.mrf.mxu3 }
 0x4ce   :  { %v3723_v59 = vpop.f32.mrf.mxu0  ;;  %v3761_v45 = vpop.f32.mrf.mxu1 }
 0x4cf   :  { %v3724_v39 = vadd.f32 %v3723_v59, %v3690_v37 }
 0x4d1   :  { %v3756_v21 = vadd.f32 %v3755_v56, %v3724_v39 }
 0x4d3   :  { %v3795_v52 = vadd.f32 %v3794_v54, %v3756_v21 }
 0x4d5   :  { %v3952_v9 = vpop.f32.mrf.mxu2  ;;  %v3985_v4 = vpop.f32.mrf.mxu3  ;;  %v3824_v10 = vadd.f32 %v3823_v60, %v3795_v52 }
 0x4d6   :  { %v3728_v7 = vpop.f32.mrf.mxu0  ;;  %v3913_v14 = vpop.f32.mrf.mxu1 }
 0x4d7   :  { %v3729_v42 = vadd.f32 %v3728_v7, %v3694_v43 }
 0x4d9   :  { %v3762_v35 = vadd.f32 %v3761_v45, %v3729_v42 }
 0x4db   :  { %v3799_v0 = vadd.f32 %v3798_v47, %v3762_v35 }
 0x4dd   :  { %v4095_v40 = vpop.f32.mrf.mxu2  ;;  %v4144_v6 = vpop.f32.mrf.mxu3  ;;  %v3828_v48 = vadd.f32 %v3827_v58, %v3799_v0 }
 0x4de   :  { %v3864_v19 = vpop.f32.mrf.mxu0  ;;  %v3917_v32 = vpop.f32.mrf.mxu1  ;;  %v4145_v16 = vadd.f32 %v4144_v6, %v4095_v40 }
 0x4df   :  { %v3865_v17 = vadd.f32 %v3864_v19, %v3824_v10 }
 0x4e1   :  { %v3914_v23 = vadd.f32 %v3913_v14, %v3865_v17 }
 0x4e3   :  { %v3948_v55 = vadd.f32 %v3947_v22, %v3914_v23 }
 0x4e5   :  { %v4103_v62 = vpop.f32.mrf.mxu2  ;;  %v4148_v51 = vpop.f32.mrf.mxu3  ;;  %v3980_v44 = vadd.f32 %v3979_v15, %v3948_v55 }
 0x4e6   :  { %v3872_v18 = vpop.f32.mrf.mxu0  ;;  %v4047_v8 = vpop.f32.mrf.mxu1  ;;  %v4149_v24 = vadd.f32 %v4148_v51, %v4103_v62 }
 0x4e7   :  { %v3873_v29 = vadd.f32 %v3872_v18, %v3828_v48 }
 0x4e9   :  { %v3918_v63 = vadd.f32 %v3917_v32, %v3873_v29 }
 0x4eb   :  { %v3953_v20 = vadd.f32 %v3952_v9, %v3918_v63 }
 0x4ed   :  { %v4249_v3 = vpop.f32.mrf.mxu2  ;;  %v4278_v5 = vpop.f32.mrf.mxu3  ;;  %v3986_v11 = vadd.f32 %v3985_v4, %v3953_v20 }
 0x4ee   :  { %v4018_v50 = vpop.f32.mrf.mxu0  ;;  %v4051_v13 = vpop.f32.mrf.mxu1 }
 0x4ef   :  { %v4019_v27 = vadd.f32 %v4018_v50, %v3980_v44 }
 0x4f1   :  { %v4048_v38 = vadd.f32 %v4047_v8, %v4019_v27 }
 0x4f5   :  { %v4253_v54 = vpop.f32.mrf.mxu2  ;;  %v4282_v25 = vpop.f32.mrf.mxu3 }
 0x4f6   :  { %v4022_v61 = vpop.f32.mrf.mxu0  ;;  %v4210_v26 = vpop.f32.mrf.mxu1 }
 0x4f7   :  { %v4023_v2 = vadd.f32 %v4022_v61, %v3986_v11 }
 0x4f9   :  { %v4052_v56 = vadd.f32 %v4051_v13, %v4023_v2 }
 0x4fe   :  { %v4178_v33 = vpop.f32.mrf.mxu0  ;;  %v4216_v12 = vpop.f32.mrf.mxu1 }
 0x4ff   :  { %v4179_v41 = vadd.f32 %v4178_v33, %v4145_v16 }
 0x501   :  { %v4211_v36 = vadd.f32 %v4210_v26, %v4179_v41 }
 0x503   :  { %v4250_v49 = vadd.f32 %v4249_v3, %v4211_v36 }
 0x505   :  { %v4279_v53 = vadd.f32 %v4278_v5, %v4250_v49 }
 0x506   :  { %v4183_v28 = vpop.f32.mrf.mxu0 }
 0x507   :  { %v4285_v31 = vadd.f32 %v4279_v53, %v4048_v38  ;;  %v4184_v30 = vadd.f32 %v4183_v28, %v4149_v24 }
 0x509   :  { %v4287_v34 = vadd.f32 %v4285_v31, %v6959_v1  ;;  %v4217_v46 = vadd.f32 %v4216_v12, %v4184_v30 }
 0x50b   :  { %4357 = vtanh.f32 %v4287_v34  ;;  %v4254_v60 = vadd.f32 %v4253_v54, %v4217_v46 }
 0x50d   :  { %v4283_v47 = vadd.f32 %v4282_v25, %v4254_v60 }
 0x50f   :  { %v4286_v59 = vadd.f32 %v4283_v47, %v4052_v56 }
 0x511   :  { %v4358_v45 = vpop.eup %4357  ;;  %v4288_v58 = vadd.f32 %v4286_v59, %v6964_v57 }
 0x512   :  { %4314 = vst.msk [vmem:[%s7173_s6 + $0x10] sm:$0xff] %vm3092_vm4, %v4358_v45 }
 0x513   :  { %4359 = vtanh.f32 %v4288_v58 }
 0x519   :  { %v4360_v7 = vpop.eup %4359 }
 0x51a   :  { %4315 = vst.msk [vmem:[%s7173_s6 + $0x18] sm:$0x1] %vm3094_vm5, %v4360_v7 }

</bundles_post_ra>
